<compile_context>
chip_gen: v6e
topology: v6e:2x2x1
jax: 0.10.0
libtpu: 0.0.40
codegen_flags: <defaults>
</compile_context>

<pallas_src>
import functools

import jax
import jax.numpy as jnp
from jax.experimental import pallas as pl
from jax.experimental.pallas import tpu as pltpu


def _round_up(v: int, m: int) -> int:
    return ((v + m - 1) // m) * m


def _default_weight_format() -> str:
    """int8 on v5e/v6e (cheap int converts / int MXU path); fp8 e4m3 on v7x (no int MXU)."""
    try:
        kind = jax.devices()[0].device_kind.lower()
    except Exception:
        return "int8"
    if "v7" in kind or "7x" in kind:
        return "fp8"
    return "int8"


def _quantize_per_channel(w, fmt: str):
    """Per-output-channel symmetric quantization of a (K, N) f32 weight."""
    amax = jnp.max(jnp.abs(w), axis=0)  # (N,)
    if fmt == "int8":
        qmax = 127.0
        scale = jnp.where(amax > 0, amax / qmax, 1.0)
        q = jnp.clip(jnp.round(w / scale), -qmax, qmax).astype(jnp.int8)
    elif fmt == "fp8":
        qmax = 448.0  # float8_e4m3fn max finite
        scale = jnp.where(amax > 0, amax / qmax, 1.0)
        q = (w / scale).astype(jnp.float8_e4m3fn)
    else:
        raise ValueError(f"unknown weight format {fmt}")
    return q, scale.astype(jnp.float32)


def _dequant_bf16(wq, scale_row):
    """Dequantize 8-bit weights to bf16 (8-bit values are exact in bf16)."""
    return wq.astype(jnp.bfloat16) * scale_row.astype(jnp.bfloat16)


# ----------------------------------------------------------------------------
# Pallas kernel: the whole MLP, fused. Refs: x, (wq0, sb0, ..., wq5, sb5), out.
#   wq_i: (K_i, N_i) int8/fp8 quantized weight
#   sb_i: (2, N_i)   f32; row 0 = per-output-channel scale, row 1 = bias
# ----------------------------------------------------------------------------
def _fused_mlp_kernel(x_ref, *rest, num_layers: int):
    o_ref = rest[-1]
    refs = rest[:-1]

    h = x_ref[...].astype(jnp.bfloat16)  # f32 -> bf16 cast happens in-kernel (no wrapper pass)
    for i in range(num_layers):
        wq_ref = refs[2 * i]
        sb_ref = refs[2 * i + 1]
        # Dequant to bf16 feeds the MXU natively; VPU work can interleave with
        # the previous layer's MXU pushes (different VLIW slots).
        w = _dequant_bf16(wq_ref[...], sb_ref[0:1, :])
        acc = jnp.dot(h, w, preferred_element_type=jnp.float32) + sb_ref[1:2, :]
        if i + 1 < num_layers:
            h = jnp.maximum(acc, 0.0).astype(jnp.bfloat16)
        else:
            o_ref[...] = acc  # f32, lane-dense (N padded to multiple of 128)


# ----------------------------------------------------------------------------
# Parameter init (Kaiming-normal fan_out/relu, zero bias) and kernel packing.
# ----------------------------------------------------------------------------
def init_fully_connected_params(key, num_classes: int, size_input):
    # TODO(synk): cannot bit-match torch.Generator().manual_seed(56); uses jax.random instead.
    num_features, H, W = size_input
    flattened = num_features * H * W
    dims = [flattened, 1024, 512, 256, 128, 64, num_classes]

    params = []
    for i in range(len(dims) - 1):
        key, wkey = jax.random.split(key)
        fan_in, fan_out = dims[i], dims[i + 1]
        # kaiming_normal_(mode='fan_out', nonlinearity='relu'): std = sqrt(2 / fan_out)
        std = (2.0 / fan_out) ** 0.5
        # PyTorch weight is (out, in); we store the transposed (in, out) layout.
        w = std * jax.random.normal(wkey, (fan_in, fan_out), dtype=jnp.float32)
        b = jnp.zeros((fan_out,), dtype=jnp.float32)
        params.append((w, b))
    return params


def prepare_kernel_params(params, num_classes: int, weight_format: str | None = None):
    """Quantize weights to 8-bit, pad every layer to 128-lane multiples, pack scale+bias."""
    if weight_format is None:
        weight_format = _default_weight_format()
    layers = []
    for w, b in params:
        k_in, n_out = w.shape
        k_pad = _round_up(k_in, 128)
        n_pad = _round_up(n_out, 128)
        q, scale = _quantize_per_channel(w, weight_format)
        qp = jnp.zeros((k_pad, n_pad), q.dtype).at[:k_in, :n_out].set(q)
        sb = jnp.zeros((2, n_pad), jnp.float32)
        sb = sb.at[0, :].set(1.0)            # neutral scale on padded lanes
        sb = sb.at[0, :n_out].set(scale)
        sb = sb.at[1, :n_out].set(b)
        layers.append((qp, sb))
    return {
        "layers": layers,
        "num_classes": num_classes,
        "in_features": params[0][0].shape[0],
        "weight_format": weight_format,
    }


def _estimate_vmem_limit(layers, tm, k0_pad, n_last_pad):
    """Right-sized VMEM request (stay well under v7x's 32 MiB scoped default)."""
    w_bytes = sum(wq.size * wq.dtype.itemsize + sb.size * sb.dtype.itemsize
                  for wq, sb in layers)
    max_w_elems = max(wq.size for wq, _ in layers)
    widest = max(wq.shape[1] for wq, _ in layers)
    est = (2 * w_bytes                      # resident 8-bit weights + scale/bias, double-buffered
           + 2 * tm * k0_pad * 4            # f32 input tile, double-buffered
           + 2 * tm * n_last_pad * 4        # f32 output tile, double-buffered
           + 6 * tm * widest * 4            # activation temporaries inside the body
           + 3 * max_w_elems * 2)           # dequantized bf16 weight temporaries
    return int(max(20 << 20, min(est, 30 << 20)))


# ----------------------------------------------------------------------------
# Forward pass
# ----------------------------------------------------------------------------
def fully_connected_forward(prepared, x: jax.Array) -> jax.Array:
    # Mirror torch.flatten: 3D -> flatten everything (single sample),
    # 4D -> flatten all but the batch dim.
    if x.ndim == 3:
        h = x.reshape(1, -1)
        squeeze_batch = True
    elif x.ndim == 4:
        h = x.reshape(x.shape[0], -1)
        squeeze_batch = False
    else:
        raise ValueError(f"expected 3D or 4D input, got {x.ndim}D")

    batch, feat = h.shape
    assert feat == prepared["in_features"], (feat, prepared["in_features"])

    layers = prepared["layers"]
    num_classes = prepared["num_classes"]
    num_layers = len(layers)
    k0_pad = layers[0][0].shape[0]
    n_last_pad = layers[-1][0].shape[1]

    # Batch tile: one grid step (single TC, single weight stream) for batch <= 512;
    # 512-row tiles beyond that (megacore-shardable, fewer per-step overheads).
    tm = min(512, _round_up(max(batch, 8), 8))
    grid_m = pl.cdiv(batch, tm)

    if feat == k0_pad:
        # No wrapper-side pad/cast pass over x; kernel casts f32 -> bf16.
        x_in = h
    else:
        # feat not lane-aligned: K must be zero-padded (garbage lanes * padded-zero
        # weight rows would be NaN-unsafe otherwise).
        x_in = jnp.zeros((batch, k0_pad), h.dtype).at[:, :feat].set(h)

    flat = []
    in_specs = [pl.BlockSpec((tm, k0_pad), lambda i: (i, 0))]
    for wq, sb in layers:
        flat.extend([wq, sb])
        in_specs.append(pl.BlockSpec(wq.shape, lambda i: (0, 0)))  # resident, fetched once
        in_specs.append(pl.BlockSpec(sb.shape, lambda i: (0, 0)))

    out = pl.pallas_call(
        functools.partial(_fused_mlp_kernel, num_layers=num_layers),
        out_shape=jax.ShapeDtypeStruct((batch, n_last_pad), jnp.float32),
        grid=(grid_m,),
        in_specs=in_specs,
        out_specs=pl.BlockSpec((tm, n_last_pad), lambda i: (i, 0)),
        compiler_params=pltpu.CompilerParams(
            dimension_semantics=("parallel",),  # only engages >1 TC once grid_m > 1
            vmem_limit_bytes=_estimate_vmem_limit(layers, tm, k0_pad, n_last_pad),
        ),
    )(x_in, *flat)

    logits = out[:, :num_classes]
    if squeeze_batch:
        logits = logits.reshape(-1)
    return logits


# ----------------------------------------------------------------------------
# Demo
# ----------------------------------------------------------------------------
if __name__ == "__main__":
    num_classes = 10
    size_input = (4, 16, 16)          # (C, H, W) -> flattened_dims = 1024
    batch = 2

    key = jax.random.PRNGKey(0)
    pkey, xkey = jax.random.split(key)

    params = init_fully_connected_params(pkey, num_classes, size_input)
    prepared = prepare_kernel_params(params, num_classes)
    x = jax.random.normal(xkey, (batch, *size_input), dtype=jnp.float32)  # NCHW

    out = jax.block_until_ready(fully_connected_forward(prepared, x))

    # Reference: plain JAX with the SAME 8-bit-weight recipe as the kernel
    # (dequant -> bf16 matmul, f32 accumulation, f32 bias). The deviation from a
    # pure-f32 PyTorch reference is the intentional per-channel quantization error.
    ref = x.reshape(batch, -1).astype(jnp.bfloat16)
    n_layers = len(prepared["layers"])
    for i, (wq, sb) in enumerate(prepared["layers"]):
        w_deq = _dequant_bf16(wq, sb[0:1, :])
        acc = jnp.dot(ref, w_deq, preferred_element_type=jnp.float32) + sb[1:2, :]
        ref = jnp.maximum(acc, 0.0).astype(jnp.bfloat16) if i + 1 < n_layers else acc
    ref = ref[:, :num_classes]

    assert out.shape == (batch, num_classes), out.shape
    assert jnp.allclose(out, ref, atol=1e-2, rtol=1e-2), "mismatch vs reference"

    print("KERNEL_OK")
</pallas_src>

<mosaic_0001>
module attributes {stable_mosaic.version = 11 : i64} {
  func.func @_fused_mlp_kernel(%arg0: i32, %arg1: memref<8x1024xf32, #tpu.memory_space<vmem>>, %arg2: memref<1024x1024xi8, #tpu.memory_space<vmem>>, %arg3: memref<2x1024xf32, #tpu.memory_space<vmem>>, %arg4: memref<1024x512xi8, #tpu.memory_space<vmem>>, %arg5: memref<2x512xf32, #tpu.memory_space<vmem>>, %arg6: memref<512x256xi8, #tpu.memory_space<vmem>>, %arg7: memref<2x256xf32, #tpu.memory_space<vmem>>, %arg8: memref<256x128xi8, #tpu.memory_space<vmem>>, %arg9: memref<2x128xf32, #tpu.memory_space<vmem>>, %arg10: memref<128x128xi8, #tpu.memory_space<vmem>>, %arg11: memref<2x128xf32, #tpu.memory_space<vmem>>, %arg12: memref<128x128xi8, #tpu.memory_space<vmem>>, %arg13: memref<2x128xf32, #tpu.memory_space<vmem>>, %arg14: memref<8x128xf32, #tpu.memory_space<vmem>>) attributes {dimension_semantics = [#tpu.dimension_semantics<parallel>], iteration_bounds = array<i64: 1>, scalar_prefetch = 0 : i64, scratch_operands = 0 : i64, tpu.core_type = #tpu.core_type<tc>, window_params = [{transform_indices = @transform_0, window_bounds = array<i64: 8, 1024>}, {pipeline_mode = #tpu.pipeline_mode<synchronous>, transform_indices = @transform_1, window_bounds = array<i64: 1024, 1024>}, {pipeline_mode = #tpu.pipeline_mode<synchronous>, transform_indices = @transform_2, window_bounds = array<i64: 2, 1024>}, {pipeline_mode = #tpu.pipeline_mode<synchronous>, transform_indices = @transform_3, window_bounds = array<i64: 1024, 512>}, {pipeline_mode = #tpu.pipeline_mode<synchronous>, transform_indices = @transform_4, window_bounds = array<i64: 2, 512>}, {pipeline_mode = #tpu.pipeline_mode<synchronous>, transform_indices = @transform_5, window_bounds = array<i64: 512, 256>}, {pipeline_mode = #tpu.pipeline_mode<synchronous>, transform_indices = @transform_6, window_bounds = array<i64: 2, 256>}, {pipeline_mode = #tpu.pipeline_mode<synchronous>, transform_indices = @transform_7, window_bounds = array<i64: 256, 128>}, {pipeline_mode = #tpu.pipeline_mode<synchronous>, transform_indices = @transform_8, window_bounds = array<i64: 2, 128>}, {pipeline_mode = #tpu.pipeline_mode<synchronous>, transform_indices = @transform_9, window_bounds = array<i64: 128, 128>}, {pipeline_mode = #tpu.pipeline_mode<synchronous>, transform_indices = @transform_10, window_bounds = array<i64: 2, 128>}, {pipeline_mode = #tpu.pipeline_mode<synchronous>, transform_indices = @transform_11, window_bounds = array<i64: 128, 128>}, {pipeline_mode = #tpu.pipeline_mode<synchronous>, transform_indices = @transform_12, window_bounds = array<i64: 2, 128>}, {transform_indices = @transform_13, window_bounds = array<i64: 8, 128>}]} {
    %c0 = arith.constant 0 : index
    %c0_0 = arith.constant 0 : index
    %0 = vector.load %arg1[%c0, %c0_0] : memref<8x1024xf32, #tpu.memory_space<vmem>>, vector<8x1024xf32>
    %1 = arith.truncf %0 : vector<8x1024xf32> to vector<8x1024xbf16>
    %c0_1 = arith.constant 0 : index
    %c0_2 = arith.constant 0 : index
    %2 = vector.load %arg2[%c0_1, %c0_2] : memref<1024x1024xi8, #tpu.memory_space<vmem>>, vector<1024x1024xi8>
    %c0_3 = arith.constant 0 : index
    %c0_4 = arith.constant 0 : index
    %3 = vector.load %arg3[%c0_3, %c0_4] : memref<2x1024xf32, #tpu.memory_space<vmem>>, vector<1x1024xf32>
    %4 = arith.sitofp %2 : vector<1024x1024xi8> to vector<1024x1024xbf16>
    %5 = arith.truncf %3 : vector<1x1024xf32> to vector<1x1024xbf16>
    %6 = vector.broadcast %5 : vector<1x1024xbf16> to vector<1024x1024xbf16>
    %7 = arith.mulf %4, %6 : vector<1024x1024xbf16>
    %cst = arith.constant dense<0.000000e+00> : vector<8x1024xf32>
    %8 = tpu.matmul %1, %7, %cst {dimension_numbers = #tpu.dot_dimension_numbers<[1], [0], [0], [1], [0, 0, 1, 1], [], []>} : vector<8x1024xbf16>, vector<1024x1024xbf16>, vector<8x1024xf32> -> vector<8x1024xf32>
    %c1 = arith.constant 1 : index
    %c0_5 = arith.constant 0 : index
    %9 = vector.load %arg3[%c1, %c0_5] : memref<2x1024xf32, #tpu.memory_space<vmem>>, vector<1x1024xf32>
    %10 = vector.broadcast %9 : vector<1x1024xf32> to vector<8x1024xf32>
    %11 = arith.addf %8, %10 : vector<8x1024xf32>
    %cst_6 = arith.constant 0.000000e+00 : f32
    %12 = vector.broadcast %cst_6 : f32 to vector<8x1024xf32>
    %13 = arith.maximumf %11, %12 : vector<8x1024xf32>
    %14 = arith.truncf %13 : vector<8x1024xf32> to vector<8x1024xbf16>
    %c0_7 = arith.constant 0 : index
    %c0_8 = arith.constant 0 : index
    %15 = vector.load %arg4[%c0_7, %c0_8] : memref<1024x512xi8, #tpu.memory_space<vmem>>, vector<1024x512xi8>
    %c0_9 = arith.constant 0 : index
    %c0_10 = arith.constant 0 : index
    %16 = vector.load %arg5[%c0_9, %c0_10] : memref<2x512xf32, #tpu.memory_space<vmem>>, vector<1x512xf32>
    %17 = arith.sitofp %15 : vector<1024x512xi8> to vector<1024x512xbf16>
    %18 = arith.truncf %16 : vector<1x512xf32> to vector<1x512xbf16>
    %19 = vector.broadcast %18 : vector<1x512xbf16> to vector<1024x512xbf16>
    %20 = arith.mulf %17, %19 : vector<1024x512xbf16>
    %cst_11 = arith.constant dense<0.000000e+00> : vector<8x512xf32>
    %21 = tpu.matmul %14, %20, %cst_11 {dimension_numbers = #tpu.dot_dimension_numbers<[1], [0], [0], [1], [0, 0, 1, 1], [], []>} : vector<8x1024xbf16>, vector<1024x512xbf16>, vector<8x512xf32> -> vector<8x512xf32>
    %c1_12 = arith.constant 1 : index
    %c0_13 = arith.constant 0 : index
    %22 = vector.load %arg5[%c1_12, %c0_13] : memref<2x512xf32, #tpu.memory_space<vmem>>, vector<1x512xf32>
    %23 = vector.broadcast %22 : vector<1x512xf32> to vector<8x512xf32>
    %24 = arith.addf %21, %23 : vector<8x512xf32>
    %cst_14 = arith.constant 0.000000e+00 : f32
    %25 = vector.broadcast %cst_14 : f32 to vector<8x512xf32>
    %26 = arith.maximumf %24, %25 : vector<8x512xf32>
    %27 = arith.truncf %26 : vector<8x512xf32> to vector<8x512xbf16>
    %c0_15 = arith.constant 0 : index
    %c0_16 = arith.constant 0 : index
    %28 = vector.load %arg6[%c0_15, %c0_16] : memref<512x256xi8, #tpu.memory_space<vmem>>, vector<512x256xi8>
    %c0_17 = arith.constant 0 : index
    %c0_18 = arith.constant 0 : index
    %29 = vector.load %arg7[%c0_17, %c0_18] : memref<2x256xf32, #tpu.memory_space<vmem>>, vector<1x256xf32>
    %30 = arith.sitofp %28 : vector<512x256xi8> to vector<512x256xbf16>
    %31 = arith.truncf %29 : vector<1x256xf32> to vector<1x256xbf16>
    %32 = vector.broadcast %31 : vector<1x256xbf16> to vector<512x256xbf16>
    %33 = arith.mulf %30, %32 : vector<512x256xbf16>
    %cst_19 = arith.constant dense<0.000000e+00> : vector<8x256xf32>
    %34 = tpu.matmul %27, %33, %cst_19 {dimension_numbers = #tpu.dot_dimension_numbers<[1], [0], [0], [1], [0, 0, 1, 1], [], []>} : vector<8x512xbf16>, vector<512x256xbf16>, vector<8x256xf32> -> vector<8x256xf32>
    %c1_20 = arith.constant 1 : index
    %c0_21 = arith.constant 0 : index
    %35 = vector.load %arg7[%c1_20, %c0_21] : memref<2x256xf32, #tpu.memory_space<vmem>>, vector<1x256xf32>
    %36 = vector.broadcast %35 : vector<1x256xf32> to vector<8x256xf32>
    %37 = arith.addf %34, %36 : vector<8x256xf32>
    %cst_22 = arith.constant 0.000000e+00 : f32
    %38 = vector.broadcast %cst_22 : f32 to vector<8x256xf32>
    %39 = arith.maximumf %37, %38 : vector<8x256xf32>
    %40 = arith.truncf %39 : vector<8x256xf32> to vector<8x256xbf16>
    %c0_23 = arith.constant 0 : index
    %c0_24 = arith.constant 0 : index
    %41 = vector.load %arg8[%c0_23, %c0_24] : memref<256x128xi8, #tpu.memory_space<vmem>>, vector<256x128xi8>
    %c0_25 = arith.constant 0 : index
    %c0_26 = arith.constant 0 : index
    %42 = vector.load %arg9[%c0_25, %c0_26] : memref<2x128xf32, #tpu.memory_space<vmem>>, vector<1x128xf32>
    %43 = arith.sitofp %41 : vector<256x128xi8> to vector<256x128xbf16>
    %44 = arith.truncf %42 : vector<1x128xf32> to vector<1x128xbf16>
    %45 = vector.broadcast %44 : vector<1x128xbf16> to vector<256x128xbf16>
    %46 = arith.mulf %43, %45 : vector<256x128xbf16>
    %cst_27 = arith.constant dense<0.000000e+00> : vector<8x128xf32>
    %47 = tpu.matmul %40, %46, %cst_27 {dimension_numbers = #tpu.dot_dimension_numbers<[1], [0], [0], [1], [0, 0, 1, 1], [], []>} : vector<8x256xbf16>, vector<256x128xbf16>, vector<8x128xf32> -> vector<8x128xf32>
    %c1_28 = arith.constant 1 : index
    %c0_29 = arith.constant 0 : index
    %48 = vector.load %arg9[%c1_28, %c0_29] : memref<2x128xf32, #tpu.memory_space<vmem>>, vector<1x128xf32>
    %49 = vector.broadcast %48 : vector<1x128xf32> to vector<8x128xf32>
    %50 = arith.addf %47, %49 : vector<8x128xf32>
    %cst_30 = arith.constant 0.000000e+00 : f32
    %51 = vector.broadcast %cst_30 : f32 to vector<8x128xf32>
    %52 = arith.maximumf %50, %51 : vector<8x128xf32>
    %53 = arith.truncf %52 : vector<8x128xf32> to vector<8x128xbf16>
    %c0_31 = arith.constant 0 : index
    %c0_32 = arith.constant 0 : index
    %54 = vector.load %arg10[%c0_31, %c0_32] : memref<128x128xi8, #tpu.memory_space<vmem>>, vector<128x128xi8>
    %c0_33 = arith.constant 0 : index
    %c0_34 = arith.constant 0 : index
    %55 = vector.load %arg11[%c0_33, %c0_34] : memref<2x128xf32, #tpu.memory_space<vmem>>, vector<1x128xf32>
    %56 = arith.sitofp %54 : vector<128x128xi8> to vector<128x128xbf16>
    %57 = arith.truncf %55 : vector<1x128xf32> to vector<1x128xbf16>
    %58 = vector.broadcast %57 : vector<1x128xbf16> to vector<128x128xbf16>
    %59 = arith.mulf %56, %58 : vector<128x128xbf16>
    %cst_35 = arith.constant dense<0.000000e+00> : vector<8x128xf32>
    %60 = tpu.matmul %53, %59, %cst_35 {dimension_numbers = #tpu.dot_dimension_numbers<[1], [0], [0], [1], [0, 0, 1, 1], [], []>} : vector<8x128xbf16>, vector<128x128xbf16>, vector<8x128xf32> -> vector<8x128xf32>
    %c1_36 = arith.constant 1 : index
    %c0_37 = arith.constant 0 : index
    %61 = vector.load %arg11[%c1_36, %c0_37] : memref<2x128xf32, #tpu.memory_space<vmem>>, vector<1x128xf32>
    %62 = vector.broadcast %61 : vector<1x128xf32> to vector<8x128xf32>
    %63 = arith.addf %60, %62 : vector<8x128xf32>
    %cst_38 = arith.constant 0.000000e+00 : f32
    %64 = vector.broadcast %cst_38 : f32 to vector<8x128xf32>
    %65 = arith.maximumf %63, %64 : vector<8x128xf32>
    %66 = arith.truncf %65 : vector<8x128xf32> to vector<8x128xbf16>
    %c0_39 = arith.constant 0 : index
    %c0_40 = arith.constant 0 : index
    %67 = vector.load %arg12[%c0_39, %c0_40] : memref<128x128xi8, #tpu.memory_space<vmem>>, vector<128x128xi8>
    %c0_41 = arith.constant 0 : index
    %c0_42 = arith.constant 0 : index
    %68 = vector.load %arg13[%c0_41, %c0_42] : memref<2x128xf32, #tpu.memory_space<vmem>>, vector<1x128xf32>
    %69 = arith.sitofp %67 : vector<128x128xi8> to vector<128x128xbf16>
    %70 = arith.truncf %68 : vector<1x128xf32> to vector<1x128xbf16>
    %71 = vector.broadcast %70 : vector<1x128xbf16> to vector<128x128xbf16>
    %72 = arith.mulf %69, %71 : vector<128x128xbf16>
    %cst_43 = arith.constant dense<0.000000e+00> : vector<8x128xf32>
    %73 = tpu.matmul %66, %72, %cst_43 {dimension_numbers = #tpu.dot_dimension_numbers<[1], [0], [0], [1], [0, 0, 1, 1], [], []>} : vector<8x128xbf16>, vector<128x128xbf16>, vector<8x128xf32> -> vector<8x128xf32>
    %c1_44 = arith.constant 1 : index
    %c0_45 = arith.constant 0 : index
    %74 = vector.load %arg13[%c1_44, %c0_45] : memref<2x128xf32, #tpu.memory_space<vmem>>, vector<1x128xf32>
    %75 = vector.broadcast %74 : vector<1x128xf32> to vector<8x128xf32>
    %76 = arith.addf %73, %75 : vector<8x128xf32>
    %c0_46 = arith.constant 0 : index
    %c0_47 = arith.constant 0 : index
    %77 = vector.load %arg14[%c0_46, %c0_47] : memref<8x128xf32, #tpu.memory_space<vmem>>, vector<8x128xf32>
    tpu.vector_store %arg14[%c0_46, %c0_47], %76 {strides = array<i32>} : memref<8x128xf32, #tpu.memory_space<vmem>>, vector<8x128xf32>,
    return
  }
  func.func @transform_0(%arg0: i32) -> (i32, i32) {
    %c0_i32 = arith.constant 0 : i32
    %c0_i32_0 = arith.constant 0 : i32
    return %arg0, %c0_i32 : i32, i32
  }
  func.func @transform_1(%arg0: i32) -> (i32, i32) {
    %c0_i32 = arith.constant 0 : i32
    %c0_i32_0 = arith.constant 0 : i32
    %c0_i32_1 = arith.constant 0 : i32
    return %c0_i32, %c0_i32_0 : i32, i32
  }
  func.func @transform_2(%arg0: i32) -> (i32, i32) {
    %c0_i32 = arith.constant 0 : i32
    %c0_i32_0 = arith.constant 0 : i32
    %c0_i32_1 = arith.constant 0 : i32
    return %c0_i32, %c0_i32_0 : i32, i32
  }
  func.func @transform_3(%arg0: i32) -> (i32, i32) {
    %c0_i32 = arith.constant 0 : i32
    %c0_i32_0 = arith.constant 0 : i32
    %c0_i32_1 = arith.constant 0 : i32
    return %c0_i32, %c0_i32_0 : i32, i32
  }
  func.func @transform_4(%arg0: i32) -> (i32, i32) {
    %c0_i32 = arith.constant 0 : i32
    %c0_i32_0 = arith.constant 0 : i32
    %c0_i32_1 = arith.constant 0 : i32
    return %c0_i32, %c0_i32_0 : i32, i32
  }
  func.func @transform_5(%arg0: i32) -> (i32, i32) {
    %c0_i32 = arith.constant 0 : i32
    %c0_i32_0 = arith.constant 0 : i32
    %c0_i32_1 = arith.constant 0 : i32
    return %c0_i32, %c0_i32_0 : i32, i32
  }
  func.func @transform_6(%arg0: i32) -> (i32, i32) {
    %c0_i32 = arith.constant 0 : i32
    %c0_i32_0 = arith.constant 0 : i32
    %c0_i32_1 = arith.constant 0 : i32
    return %c0_i32, %c0_i32_0 : i32, i32
  }
  func.func @transform_7(%arg0: i32) -> (i32, i32) {
    %c0_i32 = arith.constant 0 : i32
    %c0_i32_0 = arith.constant 0 : i32
    %c0_i32_1 = arith.constant 0 : i32
    return %c0_i32, %c0_i32_0 : i32, i32
  }
  func.func @transform_8(%arg0: i32) -> (i32, i32) {
    %c0_i32 = arith.constant 0 : i32
    %c0_i32_0 = arith.constant 0 : i32
    %c0_i32_1 = arith.constant 0 : i32
    return %c0_i32, %c0_i32_0 : i32, i32
  }
  func.func @transform_9(%arg0: i32) -> (i32, i32) {
    %c0_i32 = arith.constant 0 : i32
    %c0_i32_0 = arith.constant 0 : i32
    %c0_i32_1 = arith.constant 0 : i32
    return %c0_i32, %c0_i32_0 : i32, i32
  }
  func.func @transform_10(%arg0: i32) -> (i32, i32) {
    %c0_i32 = arith.constant 0 : i32
    %c0_i32_0 = arith.constant 0 : i32
    %c0_i32_1 = arith.constant 0 : i32
    return %c0_i32, %c0_i32_0 : i32, i32
  }
  func.func @transform_11(%arg0: i32) -> (i32, i32) {
    %c0_i32 = arith.constant 0 : i32
    %c0_i32_0 = arith.constant 0 : i32
    %c0_i32_1 = arith.constant 0 : i32
    return %c0_i32, %c0_i32_0 : i32, i32
  }
  func.func @transform_12(%arg0: i32) -> (i32, i32) {
    %c0_i32 = arith.constant 0 : i32
    %c0_i32_0 = arith.constant 0 : i32
    %c0_i32_1 = arith.constant 0 : i32
    return %c0_i32, %c0_i32_0 : i32, i32
  }
  func.func @transform_13(%arg0: i32) -> (i32, i32) {
    %c0_i32 = arith.constant 0 : i32
    %c0_i32_0 = arith.constant 0 : i32
    return %arg0, %c0_i32 : i32, i32
  }
}

</mosaic_0001>

<bundles_post_ra>
// kernel: tpu_custom_call.1
= control target key start
LH: loop header
LB: loop body
LE: loop exit
PB: predicated region body
PF: predicated region fallthrough
CT: control target
= control target key end

     0   :  { %18 = vsyncpa [#allocation3], 0  ;;  %s5672_s0 = inlined_call_operand.hbm [shape: f32[2,1024], index: 0, kind: input, shape index: {}]   ;;  %s5673_s1 = inlined_call_operand.hbm [shape: s8[1024,1024], index: 1, kind: input, shape index: {}]   ;;  %s5674_s2 = inlined_call_operand.hbm [shape: f32[2,1024], index: 2, kind: input, shape index: {}]   ;;  %s5675_s3 = inlined_call_operand.hbm [shape: s8[1024,512], index: 3, kind: input, shape index: {}]   ;;  %s5676_s4 = inlined_call_operand.hbm [shape: f32[2,512], index: 4, kind: input, shape index: {}]   ;;  %s5677_s5 = inlined_call_operand.hbm [shape: s8[512,256], index: 5, kind: input, shape index: {}]   ;;  %s5678_s6 = inlined_call_operand.vmem [shape: f32[2,256], index: 6, kind: input, shape index: {}]   ;;  %s5679_s7 = inlined_call_operand.hbm [shape: s8[256,128], index: 7, kind: input, shape index: {}]   ;;  %s5680_s8 = inlined_call_operand.vmem [shape: f32[2,128], index: 8, kind: input, shape index: {}]   ;;  %s5681_s9 = inlined_call_operand.hbm [shape: s8[128,128], index: 9, kind: input, shape index: {}]   ;;  %s5682_s10 = inlined_call_operand.vmem [shape: f32[2,128], index: 10, kind: input, shape index: {}]   ;;  %s5683_s11 = inlined_call_operand.hbm [shape: s8[128,128], index: 11, kind: input, shape index: {}]   ;;  %s5684_s12 = inlined_call_operand.vmem [shape: f32[2,128], index: 12, kind: input, shape index: {}]   ;;  %s5685_s13 = inlined_call_operand.hbm [shape: f32[2,128], index: 13, kind: output, shape index: {}]  }
   0x1   :  { %19 = vsyncpa [#allocation6], 0 }
   0x2   :  { %20 = vsyncpa [#allocation9], 0 }
   0x3   :  { %21 = vsyncpa [#allocation12], 0 }
   0x4   :  { %22 = vsyncpa [#allocation15], 0 }
   0x5   :  { %23 = vsyncpa [#allocation4], 0 }
   0x6   :  { %28 = vsyncadd [#allocation3], 768  ;;  %s4311_s25 = smov [#allocation5]  }
   0x7   :  { %s41_s26 = sshll.u32 %s4311_s25, 4  ;;  %s42_s26 = int_to_ptr.vmem [resolvable:$true] %s41_s26 }
   0x8   :  { %s4107_s27 = scalar_lea.vmem %s42_s26, 32768  ;;  %p4112_p1 = scmp.lt.s32.totalorder %s42_s26, %s42_s26 }
   0x9   :  { %p4108_p0 = scmp.ne.s32.totalorder %s42_s26, %s4107_s27  ;;  %p4113_p2 = scmp.lt.s32.totalorder %s4107_s27, %s4107_s27 }
   0xb   :  { %p4114_p3 = por %p4113_p2, %p4112_p1 }
   0xd   :  { %p4115_p4 = pnand %p4114_p3, %p4108_p0 }
   0xf   :  { %4118 = shalt.err (!%p4115_p4)
}
  0x10   :  { %s4312_s28 = smov 1024   ;;  %s4313_s29 = smov 64  }
  0x11   :  { %47 = dma.hbm_to_vmem [thread:$0]  %s5673_s1, 32768, %s42_s26, [#allocation6], %s4312_s28, %s4312_s28, %s4313_s29  }
  0x12   :  { %s4314_s15 = smov [#allocation8]  }
  0x13   :  { %s63_s16 = sshll.u32 %s4314_s15, 4  ;;  %s64_s16 = int_to_ptr.vmem [resolvable:$true] %s63_s16 }
  0x14   :  { %s4127_s17 = scalar_lea.vmem %s64_s16, 16384  ;;  %p4132_p6 = scmp.lt.s32.totalorder %s64_s16, %s64_s16 }
  0x15   :  { %p4128_p5 = scmp.ne.s32.totalorder %s64_s16, %s4127_s17  ;;  %p4133_p7 = scmp.lt.s32.totalorder %s4127_s17, %s4127_s17 }
  0x17   :  { %p4134_p8 = por %p4133_p7, %p4132_p6 }
  0x19   :  { %p4135_p9 = pnand %p4134_p8, %p4128_p5 }
  0x1b   :  { %4138 = shalt.err (!%p4135_p9)
}
  0x1c   :  { %s4315_s18 = smov 512   ;;  %s4316_s19 = smov 32  }
  0x1d   :  { %69 = dma.hbm_to_vmem [thread:$0]  %s5675_s3, 16384, %s64_s16, [#allocation9], %s4315_s18, %s4315_s18, %s4316_s19  }
  0x1e   :  { %s4317_s22 = smov [#allocation11]  }
  0x1f   :  { %s85_s23 = sshll.u32 %s4317_s22, 4  ;;  %s86_s23 = int_to_ptr.vmem [resolvable:$true] %s85_s23 }
  0x20   :  { %s4147_s1 = scalar_lea.vmem %s86_s23, 4096  ;;  %p4152_p11 = scmp.lt.s32.totalorder %s86_s23, %s86_s23 }
  0x21   :  { %p4148_p10 = scmp.ne.s32.totalorder %s86_s23, %s4147_s1  ;;  %p4153_p12 = scmp.lt.s32.totalorder %s4147_s1, %s4147_s1 }
  0x23   :  { %p4154_p13 = por %p4153_p12, %p4152_p11 }
  0x25   :  { %p4155_p0 = pnand %p4154_p13, %p4148_p10 }
  0x27   :  { %4158 = shalt.err (!%p4155_p0)
}
  0x28   :  { %s4318_s24 = smov 256   ;;  %s4319_s25 = smov 16  }
  0x29   :  { %91 = dma.hbm_to_vmem [thread:$0]  %s5677_s5, 4096, %s86_s23, [#allocation12], %s4318_s24, %s4318_s24, %s4319_s25  }
  0x2a   :  { %s4320_s3 = smov [#allocation14]   ;;  %s4321_s29 = smov [#allocation2]  }
  0x2b   :  { %s113_s28 = sshll.u32 %s4320_s3, 4  ;;  %s29_s30 = sshll.u32 %s4321_s29, 4  ;;  %s114_s28 = int_to_ptr.vmem [resolvable:$true] %s113_s28  ;;  %s30_s30 = int_to_ptr.vmem [resolvable:$true] %s29_s30 }
  0x2c   :  { %s4167_s14 = scalar_lea.vmem %s114_s28, 512  ;;  %p4172_p2 = scmp.lt.s32.totalorder %s114_s28, %s114_s28 }
  0x2d   :  { %p4168_p1 = scmp.ne.s32.totalorder %s114_s28, %s4167_s14  ;;  %p4173_p3 = scmp.lt.s32.totalorder %s4167_s14, %s4167_s14 }
  0x2f   :  { %p4174_p4 = por %p4173_p3, %p4172_p2 }
  0x31   :  { %p4175_p5 = pnand %p4174_p4, %p4168_p1 }
  0x33   :  { %4178 = shalt.err (!%p4175_p5)
}
  0x34   :  { %s4322_s15 = smov 128   ;;  %s4323_s16 = smov 8  }
  0x35   :  { %119 = dma.hbm_to_vmem [thread:$0]  %s5681_s9, 512, %s114_s28, [#allocation15], %s4322_s15, %s4322_s15, %s4323_s16  }
  0x36   :  { %s4187_s5 = scalar_lea.vmem %s30_s30, 256  ;;  %s4191_s20 = scalar_lea.vmem %s30_s30, 1024 }
  0x37   :  { %p4188_p6 = scmp.ne.s32.totalorder %s30_s30, %s4187_s5  ;;  %p4192_p7 = scmp.lt.s32.totalorder %s30_s30, %s30_s30 }
  0x38   :  { %p4193_p8 = scmp.lt.s32.totalorder %s4191_s20, %s4187_s5 }
  0x3a   :  { %p4194_p9 = por %p4193_p8, %p4192_p7 }
  0x3c   :  { %p4195_p10 = pnand %p4194_p9, %p4188_p6 }
  0x3e   :  { %4198 = shalt.err (!%p4195_p10)
}
  0x3f   :  { %35 = dma.hbm_to_vmem [thread:$0]  %s5672_s0, 256, %s30_s30, [#allocation3], %s4318_s24, %s4318_s24, %s4319_s25  }
  0x40   :  { %s4324_s23 = smov [#allocation7]   ;;  %s4325_s9 = smov [#allocation10]  }
  0x41   :  { %s54_s1 = sshll.u32 %s4324_s23, 4  ;;  %s76_s26 = sshll.u32 %s4325_s9, 4  ;;  %s55_s1 = int_to_ptr.vmem [resolvable:$true] %s54_s1  ;;  %s77_s26 = int_to_ptr.vmem [resolvable:$true] %s76_s26 }
  0x42   :  { %s4207_s27 = scalar_lea.vmem %s55_s1, 256  ;;  %p4212_p12 = scmp.lt.s32.totalorder %s55_s1, %s55_s1 }
  0x43   :  { %p4208_p11 = scmp.ne.s32.totalorder %s55_s1, %s4207_s27  ;;  %p4213_p13 = scmp.lt.s32.totalorder %s4207_s27, %s4207_s27 }
  0x45   :  { %p4214_p0 = por %p4213_p13, %p4212_p12 }
  0x47   :  { %p4215_p1 = pnand %p4214_p0, %p4208_p11 }
  0x49   :  { %4218 = shalt.err (!%p4215_p1)
}
  0x4a   :  { %57 = dma.hbm_to_vmem [thread:$0]  %s5674_s2, 256, %s55_s1, [#allocation6]  }
  0x4b   :  { %s4227_s29 = scalar_lea.vmem %s77_s26, 128  ;;  %p4232_p3 = scmp.lt.s32.totalorder %s77_s26, %s77_s26 }
  0x4c   :  { %p4228_p2 = scmp.ne.s32.totalorder %s77_s26, %s4227_s29  ;;  %p4233_p4 = scmp.lt.s32.totalorder %s4227_s29, %s4227_s29 }
  0x4e   :  { %p4234_p5 = por %p4233_p4, %p4232_p3 }
  0x50   :  { %p4235_p6 = pnand %p4234_p5, %p4228_p2 }
  0x52   :  { %4238 = shalt.err (!%p4235_p6)
}
  0x53   :  { %79 = dma.hbm_to_vmem [thread:$0]  %s5676_s4, 128, %s77_s26, [#allocation9]  }
  0x54   :  { %s4326_s25 = smov [#allocation13]   ;;  %s4327_s14 = smov [#allocation16]  }
  0x55   :  { %s99_s30 = sshll.u32 %s4326_s25, 4  ;;  %s127_s17 = sshll.u32 %s4327_s14, 4  ;;  %s100_s30 = int_to_ptr.vmem [resolvable:$true] %s99_s30  ;;  %s128_s17 = int_to_ptr.vmem [resolvable:$true] %s127_s17 }
  0x56   :  { %s4247_s18 = scalar_lea.vmem %s100_s30, 1024  ;;  %p4252_p8 = scmp.lt.s32.totalorder %s100_s30, %s100_s30 }
  0x57   :  { %p4248_p7 = scmp.ne.s32.totalorder %s100_s30, %s4247_s18  ;;  %p4253_p9 = scmp.lt.s32.totalorder %s4247_s18, %s4247_s18 }
  0x59   :  { %p4254_p10 = por %p4253_p9, %p4252_p8 }
  0x5b   :  { %p4255_p11 = pnand %p4254_p10, %p4248_p7 }
  0x5d   :  { %4258 = shalt.err (!%p4255_p11)
}
  0x5e   :  { %105 = dma.hbm_to_vmem [thread:$0]  %s5679_s7, 1024, %s100_s30, [#allocation12], %s4322_s15, %s4322_s15, %s4323_s16  }
  0x5f   :  { %s4267_s4 = scalar_lea.vmem %s128_s17, 512  ;;  %p4272_p13 = scmp.lt.s32.totalorder %s128_s17, %s128_s17 }
  0x60   :  { %p4268_p12 = scmp.ne.s32.totalorder %s128_s17, %s4267_s4  ;;  %p4273_p0 = scmp.lt.s32.totalorder %s4267_s4, %s4267_s4 }
  0x62   :  { %p4274_p1 = por %p4273_p0, %p4272_p13 }
  0x64   :  { %p4275_p2 = pnand %p4274_p1, %p4268_p12 }
  0x66   :  { %4278 = shalt.err (!%p4275_p2)
}
  0x67   :  { %133 = dma.hbm_to_vmem [thread:$0]  %s5683_s11, 512, %s128_s17, [#allocation15], %s4322_s15, %s4322_s15, %s4323_s16  }
  0x68   :  { %4299 = dma.done.wait [#allocation3], 1024  }
  0x69   :  { %4300 = vsyncadd [#allocation3], 4294966272 }
  0x6a   :  { %4301 = dma.done.wait [#allocation6], 33024  }
  0x6b   :  { %4302 = vsyncadd [#allocation6], 4294934272 }
  0x6c   :  { %4303 = dma.done.wait [#allocation9], 16512  }
  0x6d   :  { %4304 = vsyncadd [#allocation9], 4294950784 }
  0x6e   :  { %4305 = dma.done.wait [#allocation12], 5120  }
  0x6f   :  { %4306 = vsyncadd [#allocation12], 4294962176 }
  0x70   :  { %4307 = dma.done.wait [#allocation15], 1024  }
  0x71   :  { %4308 = vsyncadd [#allocation15], 4294966272  ;;  %v187_v0 = vlaneseq  ;;  %v4454_v4 = vld [vmem:[#allocation7] ss:$2 sm:$0xff]  ;;  %v4328_v57 = vmov 1983009808  }
  0x72   :  { %v293_v6 = vld [vmem:[#allocation5 + $0xc8] sm:$0xff]  ;;  %v292_v10 = vld [vmem:[#allocation5 + $0xc0] sm:$0xff]  ;;  %v185_v58 = vunpack.c.l.s4 %v4328_v57  ;;  %vm4330_vm0 = vmmov 0  }
  0x73   :  { %v4446_v1 = vshrl.u32 %v187_v0, 7  ;;  %v357_v7 = vld [vmem:[#allocation5 + $0x2c8] sm:$0xff]  ;;  %v356_v11 = vld [vmem:[#allocation5 + $0x2c0] sm:$0xff]  ;;  %v574_v12 = vunpack.c.l.s8.bf16 %v293_v6  ;;  %v582_v14 = vunpack.c.h.s8.bf16 %v293_v6  ;;  %v581_v20 = vunpack.c.h.s8.bf16 %v292_v10 }
  0x74   :  { %v702_v16 = vunpack.c.l.s8.bf16 %v357_v7  ;;  %v710_v17 = vunpack.c.h.s8.bf16 %v357_v7  ;;  %v285_v18 = vld [vmem:[#allocation5 + $0x88] sm:$0xff]  ;;  %v709_v22 = vunpack.c.h.s8.bf16 %v356_v11  ;;  %v573_v24 = vunpack.c.l.s8.bf16 %v292_v10  ;;  %v284_v33 = vld [vmem:[#allocation5 + $0x80] sm:$0xff] }
  0x75   :  { %v4449_v2 = vsub.s32 1, %v4446_v1  ;;  %v4452_v3 = vsub.s32 0, %v4446_v1  ;;  %v349_v19 = vld [vmem:[#allocation5 + $0x288] sm:$0xff]  ;;  %v701_v26 = vunpack.c.l.s8.bf16 %v356_v11  ;;  %v566_v27 = vunpack.c.h.s8.bf16 %v285_v18  ;;  %v348_v34 = vld [vmem:[#allocation5 + $0x280] sm:$0xff] }
  0x76   :  { %v694_v28 = vunpack.c.h.s8.bf16 %v349_v19  ;;  %v565_v39 = vunpack.c.h.s8.bf16 %v284_v33  ;;  %v693_v40 = vunpack.c.h.s8.bf16 %v348_v34  ;;  %v558_v43 = vunpack.c.l.s8.bf16 %v285_v18  ;;  %v277_v45 = vld [vmem:[#allocation5 + $0x48] sm:$0xff]  ;;  %v276_v55 = vld [vmem:[#allocation5 + $0x40] sm:$0xff] }
  0x77   :  { %v1045_v5 = vrot.slane %v4454_v4, %v4449_v2  ;;  %v1041_v8 = vrot.slane %v4454_v4, %v4452_v3  ;;  %v686_v44 = vunpack.c.l.s8.bf16 %v349_v19  ;;  %v341_v46 = vld [vmem:[#allocation5 + $0x248] sm:$0xff]  ;;  %v557_v49 = vunpack.c.l.s8.bf16 %v284_v33  ;;  %v340_v56 = vld [vmem:[#allocation5 + $0x240] sm:$0xff] }
  0x78   :  { %v685_v50 = vunpack.c.l.s8.bf16 %v348_v34  ;;  %v550_v53 = vunpack.c.h.s8.bf16 %v277_v45  ;;  %v678_v54 = vunpack.c.h.s8.bf16 %v341_v46  ;;  %v549_v61 = vunpack.c.h.s8.bf16 %v276_v55  ;;  %v269_v7 = vld [vmem:[#allocation5 + $0x8] sm:$0xff]  ;;  %v332_v19 = vld [vmem:[#allocation5 + $0x200] sm:$0xff] }
  0x79   :  { %v1079_v9 = vpack.c.bf16 %v1045_v5, %v1045_v5  ;;  %v1078_v13 = vpack.c.bf16 %v1041_v8, %v1041_v8  ;;  %v677_v62 = vunpack.c.h.s8.bf16 %v340_v56  ;;  %v542_v5 = vunpack.c.l.s8.bf16 %v277_v45  ;;  %v333_v8 = vld [vmem:[#allocation5 + $0x208] sm:$0xff]  ;;  %v4085_v34 = vld [vmem:[#allocation2 + $0x20] ss:$16 sps:$4 sm:$0xff]  }
  0x7a   :  { %v670_v6 = vunpack.c.l.s8.bf16 %v341_v46  ;;  %v662_v18 = vunpack.c.h.s8.bf16 %v333_v8  ;;  %v389_v33 = vld [vmem:[#allocation5 + $0x3c8] sm:$0xff]  ;;  %v388_v46 = vld [vmem:[#allocation5 + $0x3c0] sm:$0xff] }
  0x7b   :  { %v1094_v15 = vpack.i.b16 %v1079_v9, %v1079_v9  ;;  %v1087_v21 = vpack.i.b16 %v1078_v13, %v1078_v13  ;;  %v186_v9 = vunpack.c.0.s8 %v185_v58  ;;  %v669_v13 = vunpack.c.l.s8.bf16 %v340_v56 }
  0x7c   :  { %v774_v45 = vunpack.c.h.s8.bf16 %v389_v33 }
  0x7d   :  { %v4461_v23 = vrot.slane %v1094_v15, %v4452_v3  ;;  %v4464_v25 = vrot.slane %v1087_v21, %v4452_v3 }
  0x7f   :  { %v1199_v29 = vmul.bf16 %v4461_v23, %v582_v14  ;;  %v1327_v30 = vmul.bf16 %v4461_v23, %v710_v17  ;;  %v1191_v31 = vmul.bf16 %v4461_v23, %v574_v12  ;;  %v1319_v32 = vmul.bf16 %v4461_v23, %v702_v16  ;;  %v268_v14 = vld [vmem:[#allocation5] sm:$0xff] }
  0x80   :  { %v1198_v35 = vmul.bf16 %v4464_v25, %v581_v20  ;;  %v1326_v36 = vmul.bf16 %v4464_v25, %v709_v22  ;;  %v1190_v37 = vmul.bf16 %v4464_v25, %v573_v24  ;;  %v1318_v38 = vmul.bf16 %v4464_v25, %v701_v26 }
  0x81   :  { %1697 = vmatprep.subr.bf16.mxu0 %v1199_v29  ;;  %1738 = vmatprep.subr.bf16.mxu1 %v1327_v30  ;;  %v1183_v41 = vmul.bf16 %v4461_v23, %v566_v27  ;;  %v1311_v42 = vmul.bf16 %v4461_v23, %v694_v28  ;;  %v1182_v47 = vmul.bf16 %v4464_v25, %v565_v39  ;;  %v541_v12 = vunpack.c.l.s8.bf16 %v276_v55 }
  0x82   :  { %1698 = vmatpush1.bf16.msra.mxu0 %v1198_v35  ;;  %1739 = vmatpush1.bf16.msra.mxu1 %v1326_v36  ;;  %v1310_v48 = vmul.bf16 %v4464_v25, %v693_v40  ;;  %v1175_v51 = vmul.bf16 %v4461_v23, %v558_v43  ;;  %v1303_v52 = vmul.bf16 %v4461_v23, %v686_v44  ;;  %v534_v17 = vunpack.c.h.s8.bf16 %v269_v7  ;;  %v4087_v35 = vld [vmem:[#allocation2 + $0x4] ss:$16 sps:$4 sm:$0xff]  }
  0x83   :  { %1699 = vmatprep.subr.bf16.mxu0 %v1191_v31  ;;  %1740 = vmatprep.subr.bf16.mxu1 %v1319_v32  ;;  %v1174_v59 = vmul.bf16 %v4464_v25, %v557_v49  ;;  %v1302_v60 = vmul.bf16 %v4464_v25, %v685_v50  ;;  %v1167_v63 = vmul.bf16 %v4461_v23, %v550_v53  ;;  %v533_v24 = vunpack.c.h.s8.bf16 %v268_v14  ;;  %v325_v31 = vld [vmem:[#allocation5 + $0x1c8] sm:$0xff]  ;;  %v4083_v32 = vld [vmem:[#allocation2] ss:$16 sps:$4 sm:$0xff]  }
  0x84   :  { %v1295_v0 = vmul.bf16 %v4461_v23, %v678_v54  ;;  %v1166_v10 = vmul.bf16 %v4464_v25, %v549_v61  ;;  %v1294_v11 = vmul.bf16 %v4464_v25, %v677_v62  ;;  %v1159_v15 = vmul.bf16 %v4461_v23, %v542_v5  ;;  %v317_v61 = vld [vmem:[#allocation5 + $0x188] sm:$0xff] }
  0x85   :  { %v1287_v16 = vmul.bf16 %v4461_v23, %v670_v6  ;;  %v4489_v20 = vsub.s32 %v186_v9, %v4446_v1  ;;  %v1158_v21 = vmul.bf16 %v4464_v25, %v541_v12  ;;  %v1286_v22 = vmul.bf16 %v4464_v25, %v669_v13  ;;  %v381_v62 = vld [vmem:[#allocation5 + $0x388] sm:$0xff]  ;;  %v316_v13 = vld [vmem:[#allocation5 + $0x180] sm:$0xff] }
  0x86   :  { %1700 = vmatpush1.bf16.msra.mxu0 %v1190_v37  ;;  %1741 = vmatpush1.bf16.msra.mxu1 %v1318_v38  ;;  %v661_v26 = vunpack.c.h.s8.bf16 %v332_v19  ;;  %v1151_v27 = vmul.bf16 %v4461_v23, %v534_v17  ;;  %v1279_v28 = vmul.bf16 %v4461_v23, %v662_v18  ;;  %v526_v29 = vunpack.c.l.s8.bf16 %v269_v7  ;;  %v4088_v37 = vld [vmem:[#allocation2 + $0x24] ss:$16 sps:$4 sm:$0xff]  }
  0x87   :  { %1701 = vmatprep.subr.bf16.mxu0 %v1183_v41  ;;  %1742 = vmatprep.subr.bf16.mxu1 %v1311_v42  ;;  %v654_v30 = vunpack.c.l.s8.bf16 %v333_v8  ;;  %v525_v36 = vunpack.c.l.s8.bf16 %v268_v14  ;;  %v1150_v38 = vmul.bf16 %v4464_v25, %v533_v24  ;;  %v653_v40 = vunpack.c.l.s8.bf16 %v332_v19  ;;  %v324_v42 = vld [vmem:[#allocation5 + $0x1c0] sm:$0xff] }
  0x88   :  { %v1278_v39 = vmul.bf16 %v4464_v25, %v661_v26  ;;  %v646_v41 = vunpack.c.h.s8.bf16 %v325_v31  ;;  %v1143_v43 = vmul.bf16 %v4461_v23, %v526_v29  ;;  %v4506_v49 = vrot.slane %v4087_v35, %v4489_v20  ;;  %v380_v14 = vld [vmem:[#allocation5 + $0x380] sm:$0xff]  ;;  %v309_v26 = vld [vmem:[#allocation5 + $0x148] sm:$0xff] }
  0x89   :  { %v1271_v44 = vmul.bf16 %v4461_v23, %v654_v30  ;;  %v1142_v50 = vmul.bf16 %v4464_v25, %v525_v36  ;;  %v1270_v53 = vmul.bf16 %v4464_v25, %v653_v40  ;;  %v773_v55 = vunpack.c.h.s8.bf16 %v388_v46  ;;  %v308_v36 = vld [vmem:[#allocation5 + $0x140] sm:$0xff] }
  0x8a   :  { %1702 = vmatpush1.bf16.msra.mxu0 %v1182_v47  ;;  %1743 = vmatpush1.bf16.msra.mxu1 %v1310_v48  ;;  %v4500_v47 = vrot.slane %v4083_v32, %v4489_v20  ;;  %v4503_v48 = vrot.slane %v4085_v34, %v4489_v20  ;;  %v1263_v54 = vmul.bf16 %v4461_v23, %v646_v41  ;;  %v638_v58 = vunpack.c.l.s8.bf16 %v325_v31 }
  0x8b   :  { %1703 = vmatprep.subr.bf16.mxu0 %v1175_v51  ;;  %1744 = vmatprep.subr.bf16.mxu1 %v1303_v52  ;;  %v645_v51 = vunpack.c.h.s8.bf16 %v324_v42  ;;  %v4510_v52 = vrot.slane %v4088_v37, %v4489_v20  ;;  %v1391_v57 = vmul.bf16 %v4461_v23, %v774_v45  ;;  %v1390_v6 = vmul.bf16 %v4464_v25, %v773_v55  ;;  %v372_v37 = vld [vmem:[#allocation5 + $0x340] sm:$0xff] }
  0x8c   :  { %v213_v56 = vcombine.high %v4500_v47, %v4503_v48  ;;  %v637_v7 = vunpack.c.l.s8.bf16 %v324_v42  ;;  %v765_v8 = vunpack.c.l.s8.bf16 %v388_v46  ;;  %v1255_v9 = vmul.bf16 %v4461_v23, %v638_v58  ;;  %v301_v46 = vld [vmem:[#allocation5 + $0x108] sm:$0xff] }
  0x8d   :  { %v1262_v5 = vmul.bf16 %v4464_v25, %v645_v51  ;;  %v758_v12 = vunpack.c.h.s8.bf16 %v381_v62  ;;  %v629_v17 = vunpack.c.h.s8.bf16 %v316_v13  ;;  %v757_v18 = vunpack.c.h.s8.bf16 %v380_v14 }
  0x8e   :  { %1704 = vmatpush1.bf16.msra.mxu0 %v1174_v59  ;;  %1745 = vmatpush1.bf16.msra.mxu1 %v1302_v60  ;;  %v766_v59 = vunpack.c.l.s8.bf16 %v389_v33  ;;  %v215_v60 = vcombine.high %v4506_v49, %v4510_v52  ;;  %v750_v24 = vunpack.c.l.s8.bf16 %v381_v62  ;;  %v621_v30 = vunpack.c.l.s8.bf16 %v316_v13  ;;  %v485_v13 = vld [vmem:[#allocation5 + $0x6c8] sm:$0xff] }
  0x8f   :  { %1705 = vmatprep.subr.bf16.mxu0 %v1167_v63  ;;  %1746 = vmatprep.subr.bf16.mxu1 %v1295_v0  ;;  %v4519_v63 = vpack.c.bf16 %v213_v56, %v213_v56  ;;  %v1374_v29 = vmul.bf16 %v4464_v25, %v757_v18  ;;  %v749_v31 = vunpack.c.l.s8.bf16 %v380_v14  ;;  %v614_v34 = vunpack.c.h.s8.bf16 %v309_v26 }
  0x90   :  { %v4521_v0 = vpack.c.bf16 %v215_v60, %v215_v60  ;;  %v1367_v33 = vmul.bf16 %v4461_v23, %v750_v24  ;;  %v613_v40 = vunpack.c.h.s8.bf16 %v308_v36  ;;  %v741_v41 = vunpack.c.h.s8.bf16 %v372_v37  ;;  %v300_v60 = vld [vmem:[#allocation5 + $0x100] sm:$0xff] }
  0x91   :  { %1729 = vmatprep.mubr.bf16.mxu0 %v4519_v63  ;;  %v1231_v42 = vmul.bf16 %v4461_v23, %v614_v34  ;;  %v733_v55 = vunpack.c.l.s8.bf16 %v372_v37  ;;  %v598_v58 = vunpack.c.h.s8.bf16 %v301_v46  ;;  %v589_v14 = vunpack.c.l.s8.bf16 %v300_v60 }
  0x92   :  { %1706 = vmatpush1.bf16.msra.mxu0 %v1166_v10  ;;  %1747 = vmatpush1.bf16.msra.mxu1 %v1294_v11  ;;  %v1383_v10 = vmul.bf16 %v4461_v23, %v766_v59  ;;  %v630_v11 = vunpack.c.h.s8.bf16 %v317_v61  ;;  %v1230_v51 = vmul.bf16 %v4464_v25, %v613_v40  ;;  %v214_v34 = vcombine.low %v4506_v49, %v4510_v52  ;;  %v413_v49 = vld [vmem:[#allocation5 + $0x488] sm:$0xff] }
  0x93   :  { %1707 = vmatprep.subr.bf16.mxu0 %v1159_v15  ;;  %1748 = vmatprep.subr.bf16.mxu1 %v1287_v16  ;;  %v1254_v15 = vmul.bf16 %v4464_v25, %v637_v7  ;;  %v1382_v16 = vmul.bf16 %v4464_v25, %v765_v8  ;;  %v1215_v8 = vmul.bf16 %v4461_v23, %v598_v58  ;;  %v958_v40 = vunpack.c.l.s8.bf16 %v485_v13  ;;  %v477_v52 = vld [vmem:[#allocation5 + $0x688] sm:$0xff]  ;;  %v412_v58 = vld [vmem:[#allocation5 + $0x480] sm:$0xff] }
  0x94   :  { %1770 = vmatprep.mubr.bf16.mxu1 %v4521_v0  ;;  %v1247_v19 = vmul.bf16 %v4461_v23, %v630_v11 }
  0x96   :  { %1708 = vmatpush1.bf16.msra.mxu0 %v1158_v21  ;;  %1749 = vmatpush1.bf16.msra.mxu1 %v1286_v22  ;;  %v1375_v21 = vmul.bf16 %v4461_v23, %v758_v12  ;;  %v622_v22 = vunpack.c.l.s8.bf16 %v317_v61  ;;  %v364_v61 = vld [vmem:[#allocation5 + $0x300] sm:$0xff]  ;;  %v421_v12 = vld [vmem:[#allocation5 + $0x4c8] sm:$0xff] }
  0x97   :  { %1709 = vmatprep.subr.bf16.mxu0 %v1151_v27  ;;  %1750 = vmatprep.subr.bf16.mxu1 %v1279_v28  ;;  %v373_v27 = vld [vmem:[#allocation5 + $0x348] sm:$0xff]  ;;  %v1246_v28 = vmul.bf16 %v4464_v25, %v629_v17  ;;  %v725_v7 = vunpack.c.h.s8.bf16 %v364_v61  ;;  %v838_v18 = vunpack.c.h.s8.bf16 %v421_v12 }
  0x98   :  { %v1239_v32 = vmul.bf16 %v4461_v23, %v622_v22  ;;  %v742_v35 = vunpack.c.h.s8.bf16 %v373_v27  ;;  %v734_v45 = vunpack.c.l.s8.bf16 %v373_v27  ;;  %v484_v22 = vld [vmem:[#allocation5 + $0x6c0] sm:$0xff]  ;;  %v4089_v27 = vld [vmem:[#allocation2 + $0x8] ss:$16 sps:$4 sm:$0xff]  }
  0x99   :  { %v1342_v17 = vmul.bf16 %v4464_v25, %v725_v7 }
  0x9a   :  { %1710 = vmatpush1.bf16.msra.mxu0 %v1150_v38  ;;  %1751 = vmatpush1.bf16.msra.mxu1 %v1278_v39  ;;  %v1238_v38 = vmul.bf16 %v4464_v25, %v621_v30  ;;  %v1366_v39 = vmul.bf16 %v4464_v25, %v749_v31  ;;  %v1206_v30 = vmul.bf16 %v4464_v25, %v589_v14  ;;  %v4094_v31 = vld [vmem:[#allocation2 + $0x2c] ss:$16 sps:$4 sm:$0xff]  }
  0x9b   :  { %1711 = vmatprep.subr.bf16.mxu0 %v1143_v43  ;;  %1752 = vmatprep.subr.bf16.mxu1 %v1271_v44  ;;  %v1359_v43 = vmul.bf16 %v4461_v23, %v742_v35  ;;  %v606_v44 = vunpack.c.l.s8.bf16 %v309_v26 }
  0x9d   :  { %v1223_v56 = vmul.bf16 %v4461_v23, %v606_v44  ;;  %v4575_v44 = vpack.c.bf16 %v214_v34, %v214_v34 }
  0x9e   :  { %1712 = vmatpush1.bf16.msra.mxu0 %v1142_v50  ;;  %1753 = vmatpush1.bf16.msra.mxu1 %v1270_v53  ;;  %v365_v50 = vld [vmem:[#allocation5 + $0x308] sm:$0xff]  ;;  %v1358_v53 = vmul.bf16 %v4464_v25, %v741_v41  ;;  %v4562_v41 = vrot.slane %v4089_v27, %v4489_v20 }
  0x9f   :  { %1713 = vmatprep.subr.bf16.mxu0 %v1263_v54  ;;  %1754 = vmatprep.subr.bf16.mxu1 %v1391_v57  ;;  %v605_v54 = vunpack.c.l.s8.bf16 %v308_v36  ;;  %v1351_v57 = vmul.bf16 %v4461_v23, %v734_v45  ;;  %v726_v59 = vunpack.c.h.s8.bf16 %v365_v50  ;;  %v718_v11 = vunpack.c.l.s8.bf16 %v365_v50 }
  0xa0   :  { %v1455_v36 = vmul.bf16 %v4461_v23, %v838_v18 }
  0xa1   :  { %v1222_v62 = vmul.bf16 %v4464_v25, %v605_v54  ;;  %v1335_v26 = vmul.bf16 %v4461_v23, %v718_v11  ;;  %v942_v11 = vunpack.c.l.s8.bf16 %v477_v52 }
  0xa2   :  { %1714 = vmatpush2.bf16.msra.mxu0 %v1262_v5  ;;  %1755 = vmatpush2.bf16.msra.mxu1 %v1390_v6  ;;  %v1350_v5 = vmul.bf16 %v4464_v25, %v733_v55  ;;  %v597_v6 = vunpack.c.h.s8.bf16 %v300_v60  ;;  %v1575_v55 = vmul.bf16 %v4461_v23, %v958_v40 }
  0xa3   :  { %1715 = vmatprep.subr.bf16.mxu0 %v1255_v9  ;;  %1756 = vmatprep.subr.bf16.mxu1 %v1383_v10  ;;  %v1343_v9 = vmul.bf16 %v4461_v23, %v726_v59  ;;  %v590_v10 = vunpack.c.l.s8.bf16 %v301_v46  ;;  %v476_v59 = vld [vmem:[#allocation5 + $0x680] sm:$0xff] }
  0xa4   :  { %v949_v7 = vunpack.c.h.s8.bf16 %v476_v59 }
  0xa5   :  { %v1207_v24 = vmul.bf16 %v4461_v23, %v590_v10  ;;  %v814_v10 = vunpack.c.l.s8.bf16 %v413_v49 }
  0xa6   :  { %1716 = vmatpush2.bf16.msra.mxu0 %v1254_v15  ;;  %1757 = vmatpush2.bf16.msra.mxu1 %v1382_v16  ;;  %v717_v15 = vunpack.c.l.s8.bf16 %v364_v61  ;;  %v1214_v16 = vmul.bf16 %v4464_v25, %v597_v6  ;;  %v821_v6 = vunpack.c.h.s8.bf16 %v412_v58 }
  0xa7   :  { %1717 = vmatprep.subr.bf16.mxu0 %v1247_v19  ;;  %1758 = vmatprep.subr.bf16.mxu1 %v1375_v21  ;;  %v966_v19 = vunpack.c.h.s8.bf16 %v485_v13  ;;  %v420_v21 = vld [vmem:[#allocation5 + $0x4c0] sm:$0xff]  ;;  %v469_v13 = vld [vmem:[#allocation5 + $0x648] sm:$0xff]  ;;  %v1431_v18 = vmul.bf16 %v4461_v23, %v814_v10 }
  0xa8   :  { %v837_v35 = vunpack.c.h.s8.bf16 %v420_v21  ;;  %v1438_v14 = vmul.bf16 %v4464_v25, %v821_v6  ;;  %v926_v34 = vunpack.c.l.s8.bf16 %v469_v13 }
  0xa9   :  { %v1583_v37 = vmul.bf16 %v4461_v23, %v966_v19  ;;  %v1559_v19 = vmul.bf16 %v4461_v23, %v942_v11 }
  0xaa   :  { %1718 = vmatpush2.bf16.msra.mxu0 %v1246_v28  ;;  %1759 = vmatpush2.bf16.msra.mxu1 %v1374_v29  ;;  %v4091_v28 = vld [vmem:[#allocation2 + $0x28] ss:$16 sps:$4 sm:$0xff]   ;;  %v4093_v29 = vld [vmem:[#allocation2 + $0xc] ss:$16 sps:$4 sm:$0xff]   ;;  %v1454_v45 = vmul.bf16 %v4464_v25, %v837_v35 }
  0xab   :  { %1719 = vmatprep.subr.bf16.mxu0 %v1239_v32  ;;  %1760 = vmatprep.subr.bf16.mxu1 %v1367_v33  ;;  %v1334_v32 = vmul.bf16 %v4464_v25, %v717_v15  ;;  %v212_v33 = vcombine.low %v4500_v47, %v4503_v48  ;;  %v4565_v47 = vrot.slane %v4091_v28, %v4489_v20  ;;  %v397_v35 = vld [vmem:[#allocation5 + $0x408] sm:$0xff] }
  0xac   :  { %v4568_v48 = vrot.slane %v4093_v29, %v4489_v20  ;;  %v1566_v15 = vmul.bf16 %v4464_v25, %v949_v7 }
  0xad   :  { %v249_v46 = vcombine.high %v4562_v41, %v4565_v47 }
  0xae   :  { %1720 = vmatpush2.bf16.msra.mxu0 %v1238_v38  ;;  %1761 = vmatpush2.bf16.msra.mxu1 %v1366_v39  ;;  %v965_v38 = vunpack.c.h.s8.bf16 %v484_v22  ;;  %v830_v39 = vunpack.c.l.s8.bf16 %v421_v12  ;;  %v405_v12 = vld [vmem:[#allocation5 + $0x448] sm:$0xff] }
  0xaf   :  { %1721 = vmatprep.subr.bf16.mxu0 %v1231_v42  ;;  %1762 = vmatprep.subr.bf16.mxu1 %v1359_v43  ;;  %v4571_v42 = vrot.slane %v4094_v31, %v4489_v20  ;;  %v4573_v43 = vpack.c.bf16 %v212_v33, %v212_v33  ;;  %v4585_v60 = vpack.c.bf16 %v249_v46, %v249_v46  ;;  %v798_v33 = vunpack.c.l.s8.bf16 %v405_v12 }
  0xb0   :  { %v1582_v50 = vmul.bf16 %v4464_v25, %v965_v38  ;;  %v1447_v20 = vmul.bf16 %v4461_v23, %v830_v39 }
  0xb1   :  { %v251_v54 = vcombine.high %v4568_v48, %v4571_v42 }
  0xb2   :  { %1722 = vmatpush2.bf16.msra.mxu0 %v1230_v51  ;;  %1763 = vmatpush2.bf16.msra.mxu1 %v1358_v53  ;;  %v829_v51 = vunpack.c.l.s8.bf16 %v420_v21  ;;  %v957_v53 = vunpack.c.l.s8.bf16 %v484_v22  ;;  %v806_v21 = vunpack.c.h.s8.bf16 %v405_v12  ;;  %v934_v22 = vunpack.c.h.s8.bf16 %v469_v13 }
  0xb3   :  { %1723 = vmatprep.subr.bf16.mxu0 %v1223_v56  ;;  %1764 = vmatprep.subr.bf16.mxu1 %v1351_v57  ;;  %v822_v56 = vunpack.c.h.s8.bf16 %v413_v49  ;;  %v950_v57 = vunpack.c.h.s8.bf16 %v477_v52  ;;  %v4587_v61 = vpack.c.bf16 %v251_v54, %v251_v54  ;;  %v1415_v49 = vmul.bf16 %v4461_v23, %v798_v33 }
  0xb4   :  { %v1423_v31 = vmul.bf16 %v4461_v23, %v806_v21  ;;  %v1543_v52 = vmul.bf16 %v4461_v23, %v926_v34 }
  0xb6   :  { %1724 = vmatpush2.bf16.msra.mxu0 %v1222_v62  ;;  %1765 = vmatpush2.bf16.msra.mxu1 %v1350_v5  ;;  %v1446_v62 = vmul.bf16 %v4464_v25, %v829_v51  ;;  %v1574_v5 = vmul.bf16 %v4464_v25, %v957_v53  ;;  %v460_v51 = vld [vmem:[#allocation5 + $0x600] sm:$0xff] }
  0xb7   :  { %1725 = vmatprep.subr.bf16.mxu0 %v1215_v8  ;;  %1766 = vmatprep.subr.bf16.mxu1 %v1343_v9  ;;  %v1439_v8 = vmul.bf16 %v4461_v23, %v822_v56  ;;  %v1567_v9 = vmul.bf16 %v4461_v23, %v950_v57 }
  0xba   :  { %1726 = vmatpush2.bf16.msra.mxu0 %v1214_v16  ;;  %1767 = vmatpush2.bf16.msra.mxu1 %v1342_v17  ;;  %v813_v16 = vunpack.c.l.s8.bf16 %v412_v58  ;;  %v941_v17 = vunpack.c.l.s8.bf16 %v476_v59  ;;  %v782_v58 = vunpack.c.l.s8.bf16 %v397_v35 }
  0xbb   :  { %1727 = vmatprep.subr.bf16.mxu0 %v1207_v24  ;;  %1768 = vmatprep.subr.bf16.mxu1 %v1335_v26  ;;  %v404_v24 = vld [vmem:[#allocation5 + $0x440] sm:$0xff] }
  0xbc   :  { %v468_v26 = vld [vmem:[#allocation5 + $0x640] sm:$0xff]  ;;  %v1430_v27 = vmul.bf16 %v4464_v25, %v813_v16  ;;  %v1558_v28 = vmul.bf16 %v4464_v25, %v941_v17  ;;  %v805_v29 = vunpack.c.h.s8.bf16 %v404_v24  ;;  %v797_v39 = vunpack.c.l.s8.bf16 %v404_v24 }
  0xbd   :  { %v925_v40 = vunpack.c.l.s8.bf16 %v468_v26  ;;  %v1399_v10 = vmul.bf16 %v4461_v23, %v782_v58 }
  0xbe   :  { %1728 = vmatpush2.bf16.msra.mxu0 %v1206_v30  ;;  %1769 = vmatpush2.bf16.msra.mxu1 %v1334_v32  ;;  %v933_v30 = vunpack.c.h.s8.bf16 %v468_v26  ;;  %v1551_v32 = vmul.bf16 %v4461_v23, %v934_v22  ;;  %v1414_v53 = vmul.bf16 %v4464_v25, %v797_v39 }
  0xbf   :  { %1779 = vmatprep.subr.bf16.mxu0 %v1455_v36  ;;  %1820 = vmatprep.subr.bf16.mxu1 %v1583_v37  ;;  %v461_v36 = vld [vmem:[#allocation5 + $0x608] sm:$0xff]  ;;  %v1422_v37 = vmul.bf16 %v4464_v25, %v805_v29  ;;  %v1542_v54 = vmul.bf16 %v4464_v25, %v925_v40 }
  0xc0   :  { %v1550_v38 = vmul.bf16 %v4464_v25, %v933_v30  ;;  %v918_v46 = vunpack.c.h.s8.bf16 %v461_v36  ;;  %v910_v59 = vunpack.c.l.s8.bf16 %v461_v36 }
  0xc1   :  { %1730 = vmatmul.mubr.bf16.vlgmr.msra.gmra.mxu0 %v4573_v43  ;;  %1771 = vmatmul.mubr.bf16.vlgmr.msra.gmra.mxu1 %v4575_v44 }
  0xc2   :  { %1780 = vmatpush1.bf16.msra.mxu0 %v1454_v45  ;;  %1821 = vmatpush1.bf16.msra.mxu1 %v1582_v50  ;;  %v790_v45 = vunpack.c.h.s8.bf16 %v397_v35  ;;  %v396_v50 = vld [vmem:[#allocation5 + $0x400] sm:$0xff]  ;;  %v1535_v57 = vmul.bf16 %v4461_v23, %v918_v46  ;;  %v1527_v11 = vmul.bf16 %v4461_v23, %v910_v59 }
  0xc3   :  { %1781 = vmatprep.subr.bf16.mxu0 %v1447_v20  ;;  %1822 = vmatprep.subr.bf16.mxu1 %v1575_v55  ;;  %v789_v20 = vunpack.c.h.s8.bf16 %v396_v50  ;;  %v917_v55 = vunpack.c.h.s8.bf16 %v460_v51  ;;  %v436_v59 = vld [vmem:[#allocation5 + $0x540] sm:$0xff] }
  0xc4   :  { %1811 = vmatprep.mubr.bf16.mxu0 %v4585_v60  ;;  %1852 = vmatprep.mubr.bf16.mxu1 %v4587_v61  ;;  %v1407_v56 = vmul.bf16 %v4461_v23, %v790_v45 }
  0xc5   :  { %v1406_v6 = vmul.bf16 %v4464_v25, %v789_v20  ;;  %v1534_v7 = vmul.bf16 %v4464_v25, %v917_v55  ;;  %v4630_v20 = vsub.s32 3, %v4446_v1 }
  0xc6   :  { %1782 = vmatpush1.bf16.msra.mxu0 %v1446_v62  ;;  %1823 = vmatpush1.bf16.msra.mxu1 %v1574_v5  ;;  %v453_v62 = vld [vmem:[#allocation5 + $0x5c8] sm:$0xff] }
  0xc7   :  { %1783 = vmatprep.subr.bf16.mxu0 %v1439_v8  ;;  %1824 = vmatprep.subr.bf16.mxu1 %v1567_v9  ;;  %v517_v5 = vld [vmem:[#allocation5 + $0x7c8] sm:$0xff]  ;;  %v781_v8 = vunpack.c.l.s8.bf16 %v396_v50  ;;  %v909_v9 = vunpack.c.l.s8.bf16 %v460_v51  ;;  %v902_v12 = vunpack.c.h.s8.bf16 %v453_v62  ;;  %v894_v24 = vunpack.c.l.s8.bf16 %v453_v62 }
  0xc8   :  { %v1030_v13 = vunpack.c.h.s8.bf16 %v517_v5  ;;  %v1022_v26 = vunpack.c.l.s8.bf16 %v517_v5 }
  0xc9   :  { %v1398_v16 = vmul.bf16 %v4464_v25, %v781_v8  ;;  %v1526_v17 = vmul.bf16 %v4464_v25, %v909_v9  ;;  %v1519_v21 = vmul.bf16 %v4461_v23, %v902_v12  ;;  %v1511_v33 = vmul.bf16 %v4461_v23, %v894_v24  ;;  %v500_v8 = vld [vmem:[#allocation5 + $0x740] sm:$0xff] }
  0xca   :  { %1784 = vmatpush1.bf16.msra.mxu0 %v1438_v14  ;;  %1825 = vmatpush1.bf16.msra.mxu1 %v1566_v15  ;;  %v452_v14 = vld [vmem:[#allocation5 + $0x5c0] sm:$0xff]  ;;  %v1647_v22 = vmul.bf16 %v4461_v23, %v1030_v13  ;;  %v1639_v34 = vmul.bf16 %v4461_v23, %v1022_v26  ;;  %v869_v9 = vunpack.c.h.s8.bf16 %v436_v59  ;;  %v997_v13 = vunpack.c.h.s8.bf16 %v500_v8 }
  0xcb   :  { %1785 = vmatprep.subr.bf16.mxu0 %v1431_v18  ;;  %1826 = vmatprep.subr.bf16.mxu1 %v1559_v19  ;;  %v516_v15 = vld [vmem:[#allocation5 + $0x7c0] sm:$0xff]  ;;  %v901_v18 = vunpack.c.h.s8.bf16 %v452_v14  ;;  %v861_v24 = vunpack.c.l.s8.bf16 %v436_v59 }
  0xcc   :  { %v1029_v19 = vunpack.c.h.s8.bf16 %v516_v15  ;;  %v1614_v26 = vmul.bf16 %v4464_v25, %v997_v13 }
  0xcd   :  { %v1518_v29 = vmul.bf16 %v4464_v25, %v901_v18  ;;  %v1053_v18 = vrot.slane %v4454_v4, %v4630_v20 }
  0xce   :  { %1786 = vmatpush1.bf16.msra.mxu0 %v1430_v27  ;;  %1827 = vmatpush1.bf16.msra.mxu1 %v1558_v28  ;;  %v445_v27 = vld [vmem:[#allocation5 + $0x588] sm:$0xff]  ;;  %v1646_v30 = vmul.bf16 %v4464_v25, %v1029_v19 }
  0xcf   :  { %1787 = vmatprep.subr.bf16.mxu0 %v1423_v31  ;;  %1828 = vmatprep.subr.bf16.mxu1 %v1551_v32  ;;  %v509_v28 = vld [vmem:[#allocation5 + $0x788] sm:$0xff]  ;;  %v893_v31 = vunpack.c.l.s8.bf16 %v452_v14  ;;  %v1021_v32 = vunpack.c.l.s8.bf16 %v516_v15  ;;  %v886_v35 = vunpack.c.h.s8.bf16 %v445_v27  ;;  %v878_v50 = vunpack.c.l.s8.bf16 %v445_v27 }
  0xd0   :  { %v1014_v36 = vunpack.c.h.s8.bf16 %v509_v28  ;;  %v1006_v51 = vunpack.c.l.s8.bf16 %v509_v28  ;;  %v429_v19 = vld [vmem:[#allocation5 + $0x508] sm:$0xff]  ;;  %v989_v28 = vunpack.c.l.s8.bf16 %v500_v8  ;;  %v358_v8 = vld [vmem:[#allocation5 + $0x2d0] sm:$0xff] }
  0xd1   :  { %v1510_v39 = vmul.bf16 %v4464_v25, %v893_v31  ;;  %v1638_v40 = vmul.bf16 %v4464_v25, %v1021_v32  ;;  %v1503_v45 = vmul.bf16 %v4461_v23, %v886_v35  ;;  %v1495_v62 = vmul.bf16 %v4461_v23, %v878_v50  ;;  %v295_v50 = vld [vmem:[#allocation5 + $0xd8] sm:$0xff] }
  0xd2   :  { %1788 = vmatpush1.bf16.msra.mxu0 %v1422_v37  ;;  %1829 = vmatpush1.bf16.msra.mxu1 %v1550_v38  ;;  %v444_v37 = vld [vmem:[#allocation5 + $0x580] sm:$0xff]  ;;  %v1631_v46 = vmul.bf16 %v4461_v23, %v1014_v36  ;;  %v1623_v5 = vmul.bf16 %v4461_v23, %v1006_v51  ;;  %v854_v32 = vunpack.c.h.s8.bf16 %v429_v19  ;;  %v1081_v35 = vpack.c.bf16 %v1053_v18, %v1053_v18  ;;  %v359_v51 = vld [vmem:[#allocation5 + $0x2d8] sm:$0xff] }
  0xd3   :  { %1789 = vmatprep.subr.bf16.mxu0 %v1415_v49  ;;  %1830 = vmatprep.subr.bf16.mxu1 %v1543_v52  ;;  %v508_v38 = vld [vmem:[#allocation5 + $0x780] sm:$0xff]  ;;  %v885_v49 = vunpack.c.h.s8.bf16 %v444_v37  ;;  %v1478_v36 = vmul.bf16 %v4464_v25, %v861_v24  ;;  %v576_v18 = vunpack.c.l.s8.bf16 %v295_v50  ;;  %v703_v24 = vunpack.c.l.s8.bf16 %v358_v8 }
  0xd4   :  { %v1013_v52 = vunpack.c.h.s8.bf16 %v508_v38  ;;  %v1005_v58 = vunpack.c.l.s8.bf16 %v508_v38  ;;  %v1606_v38 = vmul.bf16 %v4464_v25, %v989_v28 }
  0xd5   :  { %v1502_v55 = vmul.bf16 %v4464_v25, %v885_v49 }
  0xd6   :  { %1790 = vmatpush1.bf16.msra.mxu0 %v1414_v53  ;;  %1831 = vmatpush1.bf16.msra.mxu1 %v1542_v54  ;;  %v437_v53 = vld [vmem:[#allocation5 + $0x548] sm:$0xff]  ;;  %v1622_v12 = vmul.bf16 %v4464_v25, %v1005_v58 }
  0xd7   :  { %1791 = vmatprep.subr.bf16.mxu0 %v1407_v56  ;;  %1832 = vmatprep.subr.bf16.mxu1 %v1535_v57  ;;  %v501_v54 = vld [vmem:[#allocation5 + $0x748] sm:$0xff]  ;;  %v1630_v56 = vmul.bf16 %v4464_v25, %v1013_v52  ;;  %v877_v57 = vunpack.c.l.s8.bf16 %v444_v37  ;;  %v862_v14 = vunpack.c.l.s8.bf16 %v437_v53 }
  0xd9   :  { %v1479_v27 = vmul.bf16 %v4461_v23, %v862_v14 }
  0xda   :  { %1792 = vmatpush1.bf16.msra.mxu0 %v1406_v6  ;;  %1833 = vmatpush1.bf16.msra.mxu1 %v1534_v7  ;;  %v870_v6 = vunpack.c.h.s8.bf16 %v437_v53  ;;  %v998_v7 = vunpack.c.h.s8.bf16 %v501_v54 }
  0xdb   :  { %1793 = vmatprep.subr.bf16.mxu0 %v1399_v10  ;;  %1834 = vmatprep.subr.bf16.mxu1 %v1527_v11  ;;  %v4637_v10 = vsub.s32 2, %v4446_v1  ;;  %v1494_v11 = vmul.bf16 %v4464_v25, %v877_v57 }
  0xdc   :  { %v1487_v15 = vmul.bf16 %v4461_v23, %v870_v6  ;;  %v712_v6 = vunpack.c.h.s8.bf16 %v359_v51 }
  0xde   :  { %1794 = vmatpush1.bf16.msra.mxu0 %v1398_v16  ;;  %1835 = vmatpush1.bf16.msra.mxu1 %v1526_v17  ;;  %v1615_v16 = vmul.bf16 %v4461_v23, %v998_v7  ;;  %v990_v17 = vunpack.c.l.s8.bf16 %v501_v54  ;;  %v294_v7 = vld [vmem:[#allocation5 + $0xd0] sm:$0xff] }
  0xdf   :  { %1795 = vmatprep.subr.bf16.mxu0 %v1519_v21  ;;  %1836 = vmatprep.subr.bf16.mxu1 %v1647_v22  ;;  %v493_v21 = vld [vmem:[#allocation5 + $0x708] sm:$0xff]  ;;  %v1486_v22 = vmul.bf16 %v4464_v25, %v869_v9 }
  0xe0   :  { %v1607_v31 = vmul.bf16 %v4461_v23, %v990_v17 }
  0xe2   :  { %1796 = vmatpush2.bf16.msra.mxu0 %v1518_v29  ;;  %1837 = vmatpush2.bf16.msra.mxu1 %v1646_v30  ;;  %v428_v29 = vld [vmem:[#allocation5 + $0x500] sm:$0xff]  ;;  %v1049_v30 = vrot.slane %v4454_v4, %v4637_v10  ;;  %v1471_v4 = vmul.bf16 %v4461_v23, %v854_v32 }
  0xe3   :  { %1797 = vmatprep.subr.bf16.mxu0 %v1511_v33  ;;  %1838 = vmatprep.subr.bf16.mxu1 %v1639_v34  ;;  %v982_v33 = vunpack.c.h.s8.bf16 %v493_v21  ;;  %v492_v34 = vld [vmem:[#allocation5 + $0x700] sm:$0xff]  ;;  %v853_v37 = vunpack.c.h.s8.bf16 %v428_v29  ;;  %v845_v54 = vunpack.c.l.s8.bf16 %v428_v29 }
  0xe4   :  { %v1080_v49 = vpack.c.bf16 %v1049_v30, %v1049_v30  ;;  %v973_v57 = vunpack.c.l.s8.bf16 %v492_v34  ;;  %v286_v30 = vld [vmem:[#allocation5 + $0x90] sm:$0xff] }
  0xe5   :  { %v1599_v52 = vmul.bf16 %v4461_v23, %v982_v33  ;;  %v1470_v53 = vmul.bf16 %v4464_v25, %v853_v37  ;;  %v1462_v9 = vmul.bf16 %v4464_v25, %v845_v54 }
  0xe6   :  { %1798 = vmatpush2.bf16.msra.mxu0 %v1510_v39  ;;  %1839 = vmatpush2.bf16.msra.mxu1 %v1638_v40  ;;  %v981_v39 = vunpack.c.h.s8.bf16 %v492_v34  ;;  %v846_v40 = vunpack.c.l.s8.bf16 %v429_v19  ;;  %v1101_v58 = vpack.i.b16 %v1080_v49, %v1080_v49  ;;  %v1590_v13 = vmul.bf16 %v4464_v25, %v973_v57  ;;  %v351_v19 = vld [vmem:[#allocation5 + $0x298] sm:$0xff] }
  0xe7   :  { %1799 = vmatprep.subr.bf16.mxu0 %v1503_v45  ;;  %1840 = vmatprep.subr.bf16.mxu1 %v1631_v46  ;;  %v974_v45 = vunpack.c.l.s8.bf16 %v493_v21  ;;  %v1108_v46 = vpack.i.b16 %v1081_v35, %v1081_v35  ;;  %v696_v29 = vunpack.c.h.s8.bf16 %v351_v19  ;;  %v567_v34 = vunpack.c.h.s8.bf16 %v286_v30  ;;  %v343_v49 = vld [vmem:[#allocation5 + $0x258] sm:$0xff] }
  0xe8   :  { %v4669_v14 = vrot.slane %v1101_v58, %v4452_v3  ;;  %v680_v54 = vunpack.c.h.s8.bf16 %v343_v49 }
  0xe9   :  { %v1591_v59 = vmul.bf16 %v4461_v23, %v974_v45  ;;  %v559_v45 = vunpack.c.l.s8.bf16 %v286_v30 }
  0xea   :  { %1800 = vmatpush2.bf16.msra.mxu0 %v1502_v55  ;;  %1841 = vmatpush2.bf16.msra.mxu1 %v1630_v56  ;;  %v1598_v55 = vmul.bf16 %v4464_v25, %v981_v39  ;;  %v1463_v56 = vmul.bf16 %v4461_v23, %v846_v40  ;;  %v583_v23 = vunpack.c.h.s8.bf16 %v294_v7  ;;  %v1320_v33 = vmul.bf16 %v4669_v14, %v703_v24  ;;  %v279_v40 = vld [vmem:[#allocation5 + $0x58] sm:$0xff] }
  0xeb   :  { %1801 = vmatprep.subr.bf16.mxu0 %v1495_v62  ;;  %1842 = vmatprep.subr.bf16.mxu1 %v1623_v5  ;;  %v584_v62 = vunpack.c.h.s8.bf16 %v295_v50  ;;  %v4660_v5 = vrot.slane %v1108_v46, %v4452_v3  ;;  %v688_v39 = vunpack.c.l.s8.bf16 %v351_v19  ;;  %v1176_v57 = vmul.bf16 %v4669_v14, %v559_v45  ;;  %v270_v19 = vld [vmem:[#allocation5 + $0x10] sm:$0xff] }
  0xec   :  { %v1200_v25 = vmul.bf16 %v4669_v14, %v583_v23  ;;  %v535_v24 = vunpack.c.h.s8.bf16 %v270_v19 }
  0xed   :  { %v1329_v17 = vmul.bf16 %v4660_v5, %v712_v6  ;;  %v1313_v37 = vmul.bf16 %v4660_v5, %v696_v29 }
  0xee   :  { %1802 = vmatpush2.bf16.msra.mxu0 %v1494_v11  ;;  %1843 = vmatpush2.bf16.msra.mxu1 %v1622_v12  ;;  %v248_v11 = vcombine.low %v4562_v41, %v4565_v47  ;;  %v250_v12 = vcombine.low %v4568_v48, %v4571_v42  ;;  %v704_v41 = vunpack.c.l.s8.bf16 %v359_v51  ;;  %v287_v47 = vld [vmem:[#allocation5 + $0x98] sm:$0xff]  ;;  %v1305_v51 = vmul.bf16 %v4660_v5, %v688_v39 }
  0xef   :  { %1803 = vmatprep.subr.bf16.mxu0 %v1487_v15  ;;  %1844 = vmatprep.subr.bf16.mxu1 %v1615_v16  ;;  %v711_v15 = vunpack.c.h.s8.bf16 %v358_v8  ;;  %v1201_v16 = vmul.bf16 %v4660_v5, %v584_v62  ;;  %v568_v28 = vunpack.c.h.s8.bf16 %v287_v47  ;;  %v544_v8 = vunpack.c.l.s8.bf16 %v279_v40 }
  0xf0   :  { %v4673_v48 = vpack.c.bf16 %v248_v11, %v248_v11  ;;  %v4675_v42 = vpack.c.bf16 %v250_v12, %v250_v12  ;;  %v271_v11 = vld [vmem:[#allocation5 + $0x18] sm:$0xff] }
  0xf1   :  { %v1328_v21 = vmul.bf16 %v4669_v14, %v711_v15  ;;  %v335_v12 = vld [vmem:[#allocation5 + $0x218] sm:$0xff]  ;;  %v528_v29 = vunpack.c.l.s8.bf16 %v271_v11 }
  0xf2   :  { %1804 = vmatpush2.bf16.msra.mxu0 %v1486_v22  ;;  %1845 = vmatpush2.bf16.msra.mxu1 %v1614_v26  ;;  %v575_v22 = vunpack.c.l.s8.bf16 %v294_v7  ;;  %v1193_v26 = vmul.bf16 %v4660_v5, %v576_v18  ;;  %v1297_v7 = vmul.bf16 %v4660_v5, %v680_v54  ;;  %v656_v30 = vunpack.c.l.s8.bf16 %v335_v12 }
  0xf3   :  { %1805 = vmatprep.subr.bf16.mxu0 %v1479_v27  ;;  %1846 = vmatprep.subr.bf16.mxu1 %v1607_v31  ;;  %v1321_v27 = vmul.bf16 %v4660_v5, %v704_v41  ;;  %v350_v31 = vld [vmem:[#allocation5 + $0x290] sm:$0xff]  ;;  %v536_v41 = vunpack.c.h.s8.bf16 %v271_v11 }
  0xf4   :  { %v1192_v32 = vmul.bf16 %v4669_v14, %v575_v22  ;;  %v695_v35 = vunpack.c.h.s8.bf16 %v350_v31  ;;  %v687_v46 = vunpack.c.l.s8.bf16 %v350_v31  ;;  %v327_v31 = vld [vmem:[#allocation5 + $0x1d8] sm:$0xff] }
  0xf5   :  { %v648_v39 = vunpack.c.h.s8.bf16 %v327_v31  ;;  %v640_v54 = vunpack.c.l.s8.bf16 %v327_v31 }
  0xf6   :  { %1806 = vmatpush2.bf16.msra.mxu0 %v1478_v36  ;;  %1847 = vmatpush2.bf16.msra.mxu1 %v1606_v38  ;;  %v1185_v36 = vmul.bf16 %v4660_v5, %v568_v28  ;;  %v560_v38 = vunpack.c.l.s8.bf16 %v287_v47  ;;  %v1304_v58 = vmul.bf16 %v4669_v14, %v687_v46  ;;  %v664_v47 = vunpack.c.h.s8.bf16 %v335_v12  ;;  %v318_v12 = vld [vmem:[#allocation5 + $0x190] sm:$0xff] }
  0xf7   :  { %1807 = vmatprep.subr.bf16.mxu0 %v1471_v4  ;;  %1848 = vmatprep.subr.bf16.mxu1 %v1599_v52  ;;  %v1184_v4 = vmul.bf16 %v4669_v14, %v567_v34  ;;  %v1312_v52 = vmul.bf16 %v4669_v14, %v695_v35  ;;  %v527_v35 = vunpack.c.l.s8.bf16 %v270_v19 }
  0xf8   :  { %v1177_v50 = vmul.bf16 %v4660_v5, %v560_v38  ;;  %v1281_v28 = vmul.bf16 %v4660_v5, %v664_v47  ;;  %v1273_v38 = vmul.bf16 %v4660_v5, %v656_v30 }
  0xfa   :  { %1808 = vmatpush2.bf16.msra.mxu0 %v1470_v53  ;;  %1849 = vmatpush2.bf16.msra.mxu1 %v1598_v55  ;;  %v552_v53 = vunpack.c.h.s8.bf16 %v279_v40  ;;  %v278_v55 = vld [vmem:[#allocation5 + $0x50] sm:$0xff] }
  0xfb   :  { %1809 = vmatprep.subr.bf16.mxu0 %v1463_v56  ;;  %1850 = vmatprep.subr.bf16.mxu1 %v1591_v59  ;;  %v342_v56 = vld [vmem:[#allocation5 + $0x250] sm:$0xff]  ;;  %v551_v59 = vunpack.c.h.s8.bf16 %v278_v55  ;;  %v543_v15 = vunpack.c.l.s8.bf16 %v278_v55 }
  0xfc   :  { %v679_v62 = vunpack.c.h.s8.bf16 %v342_v56  ;;  %v1169_v6 = vmul.bf16 %v4660_v5, %v552_v53 }
  0xfe   :  { %1810 = vmatpush2.bf16.msra.mxu0 %v1462_v9  ;;  %1851 = vmatpush2.bf16.msra.mxu1 %v1590_v13  ;;  %v672_v9 = vunpack.c.l.s8.bf16 %v343_v49  ;;  %v1168_v13 = vmul.bf16 %v4669_v14, %v551_v59  ;;  %v1296_v23 = vmul.bf16 %v4669_v14, %v679_v62  ;;  %v326_v49 = vld [vmem:[#allocation5 + $0x1d0] sm:$0xff] }
  0xff   :  { %1861 = vmatprep.subr.bf16.mxu0 %v1201_v16  ;;  %1902 = vmatprep.subr.bf16.mxu1 %v1329_v17  ;;  %v671_v16 = vunpack.c.l.s8.bf16 %v342_v56  ;;  %v1161_v17 = vmul.bf16 %v4660_v5, %v544_v8  ;;  %v647_v46 = vunpack.c.h.s8.bf16 %v326_v49  ;;  %v319_v56 = vld [vmem:[#allocation5 + $0x198] sm:$0xff]  ;;  %v639_v62 = vunpack.c.l.s8.bf16 %v326_v49 }
 0x100   :  { %v1289_v18 = vmul.bf16 %v4660_v5, %v672_v9  ;;  %v632_v9 = vunpack.c.h.s8.bf16 %v319_v56  ;;  %v624_v47 = vunpack.c.l.s8.bf16 %v319_v56 }
 0x101   :  { %1812 = vmatmul.mubr.bf16.vlgmr.msra.gmra.mxu0 %v4673_v48  ;;  %1853 = vmatmul.mubr.bf16.vlgmr.msra.gmra.mxu1 %v4675_v42  ;;  %v1288_v22 = vmul.bf16 %v4669_v14, %v671_v16  ;;  %v631_v16 = vunpack.c.h.s8.bf16 %v318_v12 }
 0x102   :  { %1862 = vmatpush1.bf16.msra.mxu0 %v1200_v25  ;;  %1903 = vmatpush1.bf16.msra.mxu1 %v1328_v21  ;;  %v334_v25 = vld [vmem:[#allocation5 + $0x210] sm:$0xff]  ;;  %v1160_v21 = vmul.bf16 %v4669_v14, %v543_v15 }
 0x103   :  { %1863 = vmatprep.subr.bf16.mxu0 %v1193_v26  ;;  %1904 = vmatprep.subr.bf16.mxu1 %v1321_v27  ;;  %v663_v26 = vunpack.c.h.s8.bf16 %v334_v25  ;;  %v1153_v27 = vmul.bf16 %v4660_v5, %v536_v41 }
 0x104   :  { %1893 = vmatprep.mubr.bf16.mxu0 %v4519_v63  ;;  %1934 = vmatprep.mubr.bf16.mxu1 %v4521_v0 }
 0x105   :  { %v1280_v34 = vmul.bf16 %v4669_v14, %v663_v26  ;;  %v623_v26 = vunpack.c.l.s8.bf16 %v318_v12 }
 0x106   :  { %1864 = vmatpush1.bf16.msra.mxu0 %v1192_v32  ;;  %1905 = vmatpush1.bf16.msra.mxu1 %v1320_v33  ;;  %v391_v32 = vld [vmem:[#allocation5 + $0x3d8] sm:$0xff]  ;;  %v1152_v33 = vmul.bf16 %v4669_v14, %v535_v24 }
 0x107   :  { %1865 = vmatprep.subr.bf16.mxu0 %v1185_v36  ;;  %1906 = vmatprep.subr.bf16.mxu1 %v1313_v37  ;;  %v655_v36 = vunpack.c.l.s8.bf16 %v334_v25  ;;  %v1145_v37 = vmul.bf16 %v4660_v5, %v528_v29  ;;  %v776_v40 = vunpack.c.h.s8.bf16 %v391_v32  ;;  %v768_v55 = vunpack.c.l.s8.bf16 %v391_v32  ;;  %v311_v25 = vld [vmem:[#allocation5 + $0x158] sm:$0xff]  ;;  %v310_v32 = vld [vmem:[#allocation5 + $0x150] sm:$0xff] }
 0x108   :  { %v616_v30 = vunpack.c.h.s8.bf16 %v311_v25 }
 0x109   :  { %v1272_v45 = vmul.bf16 %v4669_v14, %v655_v36  ;;  %v1393_v53 = vmul.bf16 %v4660_v5, %v776_v40  ;;  %v1385_v8 = vmul.bf16 %v4660_v5, %v768_v55  ;;  %v615_v36 = vunpack.c.h.s8.bf16 %v310_v32 }
 0x10a   :  { %1866 = vmatpush1.bf16.msra.mxu0 %v1184_v4  ;;  %1907 = vmatpush1.bf16.msra.mxu1 %v1312_v52  ;;  %v390_v4 = vld [vmem:[#allocation5 + $0x3d0] sm:$0xff]  ;;  %v1144_v52 = vmul.bf16 %v4669_v14, %v527_v35  ;;  %v608_v40 = vunpack.c.l.s8.bf16 %v311_v25 }
 0x10b   :  { %1867 = vmatprep.subr.bf16.mxu0 %v1177_v50  ;;  %1908 = vmatprep.subr.bf16.mxu1 %v1305_v51  ;;  %v775_v50 = vunpack.c.h.s8.bf16 %v390_v4  ;;  %v1265_v51 = vmul.bf16 %v4660_v5, %v648_v39 }
 0x10d   :  { %v1392_v59 = vmul.bf16 %v4669_v14, %v775_v50  ;;  %v607_v50 = vunpack.c.l.s8.bf16 %v310_v32 }
 0x10e   :  { %1868 = vmatpush1.bf16.msra.mxu0 %v1176_v57  ;;  %1909 = vmatpush1.bf16.msra.mxu1 %v1304_v58  ;;  %v383_v57 = vld [vmem:[#allocation5 + $0x398] sm:$0xff]  ;;  %v1264_v58 = vmul.bf16 %v4669_v14, %v647_v46 }
 0x10f   :  { %1869 = vmatprep.subr.bf16.mxu0 %v1169_v6  ;;  %1910 = vmatprep.subr.bf16.mxu1 %v1297_v7  ;;  %v767_v6 = vunpack.c.l.s8.bf16 %v390_v4  ;;  %v1257_v7 = vmul.bf16 %v4660_v5, %v640_v54  ;;  %v760_v11 = vunpack.c.h.s8.bf16 %v383_v57  ;;  %v752_v19 = vunpack.c.l.s8.bf16 %v383_v57  ;;  %v303_v4 = vld [vmem:[#allocation5 + $0x118] sm:$0xff]  ;;  %v302_v57 = vld [vmem:[#allocation5 + $0x110] sm:$0xff] }
 0x110   :  { %v600_v55 = vunpack.c.h.s8.bf16 %v303_v4 }
 0x111   :  { %v1384_v15 = vmul.bf16 %v4669_v14, %v767_v6  ;;  %v1377_v41 = vmul.bf16 %v4660_v5, %v760_v11  ;;  %v1369_v29 = vmul.bf16 %v4660_v5, %v752_v19  ;;  %v599_v6 = vunpack.c.h.s8.bf16 %v302_v57 }
 0x112   :  { %1870 = vmatpush1.bf16.msra.mxu0 %v1168_v13  ;;  %1911 = vmatpush1.bf16.msra.mxu1 %v1296_v23  ;;  %v382_v13 = vld [vmem:[#allocation5 + $0x390] sm:$0xff]  ;;  %v1256_v23 = vmul.bf16 %v4669_v14, %v639_v62  ;;  %v592_v11 = vunpack.c.l.s8.bf16 %v303_v4 }
 0x113   :  { %1871 = vmatprep.subr.bf16.mxu0 %v1161_v17  ;;  %1912 = vmatprep.subr.bf16.mxu1 %v1289_v18  ;;  %v759_v17 = vunpack.c.h.s8.bf16 %v382_v13  ;;  %v1249_v18 = vmul.bf16 %v4660_v5, %v632_v9 }
 0x115   :  { %v1376_v24 = vmul.bf16 %v4669_v14, %v759_v17  ;;  %v591_v17 = vunpack.c.l.s8.bf16 %v302_v57 }
 0x116   :  { %1872 = vmatpush1.bf16.msra.mxu0 %v1160_v21  ;;  %1913 = vmatpush1.bf16.msra.mxu1 %v1288_v22  ;;  %v375_v21 = vld [vmem:[#allocation5 + $0x358] sm:$0xff]  ;;  %v1248_v22 = vmul.bf16 %v4669_v14, %v631_v16 }
 0x117   :  { %1873 = vmatprep.subr.bf16.mxu0 %v1153_v27  ;;  %1914 = vmatprep.subr.bf16.mxu1 %v1281_v28  ;;  %v751_v27 = vunpack.c.l.s8.bf16 %v382_v13  ;;  %v1241_v28 = vmul.bf16 %v4660_v5, %v624_v47  ;;  %v744_v31 = vunpack.c.h.s8.bf16 %v375_v21  ;;  %v736_v49 = vunpack.c.l.s8.bf16 %v375_v21  ;;  %v423_v13 = vld [vmem:[#allocation5 + $0x4d8] sm:$0xff]  ;;  %v422_v21 = vld [vmem:[#allocation5 + $0x4d0] sm:$0xff] }
 0x118   :  { %v840_v19 = vunpack.c.h.s8.bf16 %v423_v13 }
 0x119   :  { %v1368_v35 = vmul.bf16 %v4669_v14, %v751_v27  ;;  %v1361_v39 = vmul.bf16 %v4660_v5, %v744_v31  ;;  %v1353_v54 = vmul.bf16 %v4660_v5, %v736_v49  ;;  %v839_v27 = vunpack.c.h.s8.bf16 %v422_v21 }
 0x11a   :  { %1874 = vmatpush1.bf16.msra.mxu0 %v1152_v33  ;;  %1915 = vmatpush1.bf16.msra.mxu1 %v1280_v34  ;;  %v374_v33 = vld [vmem:[#allocation5 + $0x350] sm:$0xff]  ;;  %v1240_v34 = vmul.bf16 %v4669_v14, %v623_v26  ;;  %v832_v31 = vunpack.c.l.s8.bf16 %v423_v13 }
 0x11b   :  { %1875 = vmatprep.subr.bf16.mxu0 %v1145_v37  ;;  %1916 = vmatprep.subr.bf16.mxu1 %v1273_v38  ;;  %v743_v37 = vunpack.c.h.s8.bf16 %v374_v33  ;;  %v1233_v38 = vmul.bf16 %v4660_v5, %v616_v30 }
 0x11d   :  { %v1360_v46 = vmul.bf16 %v4669_v14, %v743_v37  ;;  %v831_v37 = vunpack.c.l.s8.bf16 %v422_v21 }
 0x11e   :  { %1876 = vmatpush1.bf16.msra.mxu0 %v1144_v52  ;;  %1917 = vmatpush1.bf16.msra.mxu1 %v1272_v45  ;;  %v367_v52 = vld [vmem:[#allocation5 + $0x318] sm:$0xff]  ;;  %v1232_v45 = vmul.bf16 %v4669_v14, %v615_v36 }
 0x11f   :  { %1877 = vmatprep.subr.bf16.mxu0 %v1265_v51  ;;  %1918 = vmatprep.subr.bf16.mxu1 %v1393_v53  ;;  %v735_v51 = vunpack.c.l.s8.bf16 %v374_v33  ;;  %v1225_v53 = vmul.bf16 %v4660_v5, %v608_v40  ;;  %v728_v56 = vunpack.c.h.s8.bf16 %v367_v52  ;;  %v720_v12 = vunpack.c.l.s8.bf16 %v367_v52  ;;  %v415_v33 = vld [vmem:[#allocation5 + $0x498] sm:$0xff]  ;;  %v414_v52 = vld [vmem:[#allocation5 + $0x490] sm:$0xff] }
 0x120   :  { %v824_v49 = vunpack.c.h.s8.bf16 %v415_v33 }
 0x121   :  { %v1352_v62 = vmul.bf16 %v4669_v14, %v735_v51  ;;  %v1345_v9 = vmul.bf16 %v4660_v5, %v728_v56  ;;  %v1337_v47 = vmul.bf16 %v4660_v5, %v720_v12  ;;  %v823_v51 = vunpack.c.h.s8.bf16 %v414_v52 }
 0x122   :  { %1878 = vmatpush2.bf16.msra.mxu0 %v1264_v58  ;;  %1919 = vmatpush2.bf16.msra.mxu1 %v1392_v59  ;;  %v366_v58 = vld [vmem:[#allocation5 + $0x310] sm:$0xff]  ;;  %v1224_v59 = vmul.bf16 %v4669_v14, %v607_v50  ;;  %v816_v56 = vunpack.c.l.s8.bf16 %v415_v33 }
 0x123   :  { %1879 = vmatprep.subr.bf16.mxu0 %v1257_v7  ;;  %1920 = vmatprep.subr.bf16.mxu1 %v1385_v8  ;;  %v727_v7 = vunpack.c.h.s8.bf16 %v366_v58  ;;  %v1217_v8 = vmul.bf16 %v4660_v5, %v600_v55 }
 0x125   :  { %v1344_v16 = vmul.bf16 %v4669_v14, %v727_v7  ;;  %v815_v7 = vunpack.c.l.s8.bf16 %v414_v52 }
 0x126   :  { %1880 = vmatpush2.bf16.msra.mxu0 %v1256_v23  ;;  %1921 = vmatpush2.bf16.msra.mxu1 %v1384_v15  ;;  %v487_v23 = vld [vmem:[#allocation5 + $0x6d8] sm:$0xff]  ;;  %v1216_v15 = vmul.bf16 %v4669_v14, %v599_v6 }
 0x127   :  { %1881 = vmatprep.subr.bf16.mxu0 %v1249_v18  ;;  %1922 = vmatprep.subr.bf16.mxu1 %v1377_v41  ;;  %v719_v18 = vunpack.c.l.s8.bf16 %v366_v58  ;;  %v1209_v41 = vmul.bf16 %v4660_v5, %v592_v11  ;;  %v968_v25 = vunpack.c.h.s8.bf16 %v487_v23  ;;  %v960_v32 = vunpack.c.l.s8.bf16 %v487_v23  ;;  %v407_v58 = vld [vmem:[#allocation5 + $0x458] sm:$0xff]  ;;  %v406_v23 = vld [vmem:[#allocation5 + $0x450] sm:$0xff] }
 0x128   :  { %v808_v12 = vunpack.c.h.s8.bf16 %v407_v58 }
 0x129   :  { %v1336_v26 = vmul.bf16 %v4669_v14, %v719_v18  ;;  %v1585_v30 = vmul.bf16 %v4660_v5, %v968_v25  ;;  %v1577_v40 = vmul.bf16 %v4660_v5, %v960_v32  ;;  %v807_v18 = vunpack.c.h.s8.bf16 %v406_v23 }
 0x12a   :  { %1882 = vmatpush2.bf16.msra.mxu0 %v1248_v22  ;;  %1923 = vmatpush2.bf16.msra.mxu1 %v1376_v24  ;;  %v486_v22 = vld [vmem:[#allocation5 + $0x6d0] sm:$0xff]  ;;  %v1208_v24 = vmul.bf16 %v4669_v14, %v591_v17  ;;  %v800_v25 = vunpack.c.l.s8.bf16 %v407_v58 }
 0x12b   :  { %1883 = vmatprep.subr.bf16.mxu0 %v1241_v28  ;;  %1924 = vmatprep.subr.bf16.mxu1 %v1369_v29  ;;  %v967_v28 = vunpack.c.h.s8.bf16 %v486_v22  ;;  %v1457_v29 = vmul.bf16 %v4660_v5, %v840_v19 }
 0x12d   :  { %v1584_v36 = vmul.bf16 %v4669_v14, %v967_v28  ;;  %v799_v28 = vunpack.c.l.s8.bf16 %v406_v23 }
 0x12e   :  { %1884 = vmatpush2.bf16.msra.mxu0 %v1240_v34  ;;  %1925 = vmatpush2.bf16.msra.mxu1 %v1368_v35  ;;  %v479_v34 = vld [vmem:[#allocation5 + $0x698] sm:$0xff]  ;;  %v1456_v35 = vmul.bf16 %v4669_v14, %v839_v27 }
 0x12f   :  { %1885 = vmatprep.subr.bf16.mxu0 %v1233_v38  ;;  %1926 = vmatprep.subr.bf16.mxu1 %v1361_v39  ;;  %v959_v38 = vunpack.c.l.s8.bf16 %v486_v22  ;;  %v1449_v39 = vmul.bf16 %v4660_v5, %v832_v31  ;;  %v952_v4 = vunpack.c.h.s8.bf16 %v479_v34  ;;  %v944_v57 = vunpack.c.l.s8.bf16 %v479_v34  ;;  %v399_v22 = vld [vmem:[#allocation5 + $0x418] sm:$0xff]  ;;  %v398_v34 = vld [vmem:[#allocation5 + $0x410] sm:$0xff] }
 0x130   :  { %v792_v32 = vunpack.c.h.s8.bf16 %v399_v22 }
 0x131   :  { %v1576_v50 = vmul.bf16 %v4669_v14, %v959_v38  ;;  %v1569_v55 = vmul.bf16 %v4660_v5, %v952_v4  ;;  %v1561_v11 = vmul.bf16 %v4660_v5, %v944_v57  ;;  %v791_v38 = vunpack.c.h.s8.bf16 %v398_v34 }
 0x132   :  { %1886 = vmatpush2.bf16.msra.mxu0 %v1232_v45  ;;  %1927 = vmatpush2.bf16.msra.mxu1 %v1360_v46  ;;  %v478_v45 = vld [vmem:[#allocation5 + $0x690] sm:$0xff]  ;;  %v1448_v46 = vmul.bf16 %v4669_v14, %v831_v37  ;;  %v784_v4 = vunpack.c.l.s8.bf16 %v399_v22 }
 0x133   :  { %1887 = vmatprep.subr.bf16.mxu0 %v1225_v53  ;;  %1928 = vmatprep.subr.bf16.mxu1 %v1353_v54  ;;  %v951_v53 = vunpack.c.h.s8.bf16 %v478_v45  ;;  %v1441_v54 = vmul.bf16 %v4660_v5, %v824_v49 }
 0x135   :  { %v1568_v6 = vmul.bf16 %v4669_v14, %v951_v53  ;;  %v783_v53 = vunpack.c.l.s8.bf16 %v398_v34 }
 0x136   :  { %1888 = vmatpush2.bf16.msra.mxu0 %v1224_v59  ;;  %1929 = vmatpush2.bf16.msra.mxu1 %v1352_v62  ;;  %v471_v59 = vld [vmem:[#allocation5 + $0x658] sm:$0xff]  ;;  %v1440_v62 = vmul.bf16 %v4669_v14, %v823_v51 }
 0x137   :  { %1889 = vmatprep.subr.bf16.mxu0 %v1217_v8  ;;  %1930 = vmatprep.subr.bf16.mxu1 %v1345_v9  ;;  %v943_v8 = vunpack.c.l.s8.bf16 %v478_v45  ;;  %v1433_v9 = vmul.bf16 %v4660_v5, %v816_v56  ;;  %v936_v13 = vunpack.c.h.s8.bf16 %v471_v59  ;;  %v928_v21 = vunpack.c.l.s8.bf16 %v471_v59  ;;  %v455_v45 = vld [vmem:[#allocation5 + $0x5d8] sm:$0xff]  ;;  %v454_v59 = vld [vmem:[#allocation5 + $0x5d0] sm:$0xff] }
 0x138   :  { %v904_v57 = vunpack.c.h.s8.bf16 %v455_v45 }
 0x139   :  { %v1560_v17 = vmul.bf16 %v4669_v14, %v943_v8  ;;  %v1553_v19 = vmul.bf16 %v4660_v5, %v936_v13  ;;  %v1545_v31 = vmul.bf16 %v4660_v5, %v928_v21  ;;  %v903_v8 = vunpack.c.h.s8.bf16 %v454_v59 }
 0x13a   :  { %1890 = vmatpush2.bf16.msra.mxu0 %v1216_v15  ;;  %1931 = vmatpush2.bf16.msra.mxu1 %v1344_v16  ;;  %v470_v15 = vld [vmem:[#allocation5 + $0x650] sm:$0xff]  ;;  %v1432_v16 = vmul.bf16 %v4669_v14, %v815_v7  ;;  %v896_v13 = vunpack.c.l.s8.bf16 %v455_v45 }
 0x13b   :  { %1891 = vmatprep.subr.bf16.mxu0 %v1209_v41  ;;  %1932 = vmatprep.subr.bf16.mxu1 %v1337_v47  ;;  %v935_v41 = vunpack.c.h.s8.bf16 %v470_v15  ;;  %v1425_v47 = vmul.bf16 %v4660_v5, %v808_v12 }
 0x13d   :  { %v1552_v27 = vmul.bf16 %v4669_v14, %v935_v41  ;;  %v895_v41 = vunpack.c.l.s8.bf16 %v454_v59 }
 0x13e   :  { %1892 = vmatpush2.bf16.msra.mxu0 %v1208_v24  ;;  %1933 = vmatpush2.bf16.msra.mxu1 %v1336_v26  ;;  %v463_v24 = vld [vmem:[#allocation5 + $0x618] sm:$0xff]  ;;  %v1424_v26 = vmul.bf16 %v4669_v14, %v807_v18 }
 0x13f   :  { %1943 = vmatprep.subr.bf16.mxu0 %v1457_v29  ;;  %1984 = vmatprep.subr.bf16.mxu1 %v1585_v30  ;;  %v927_v29 = vunpack.c.l.s8.bf16 %v470_v15  ;;  %v1417_v30 = vmul.bf16 %v4660_v5, %v800_v25  ;;  %v920_v33 = vunpack.c.h.s8.bf16 %v463_v24  ;;  %v912_v52 = vunpack.c.l.s8.bf16 %v463_v24  ;;  %v447_v15 = vld [vmem:[#allocation5 + $0x598] sm:$0xff]  ;;  %v446_v24 = vld [vmem:[#allocation5 + $0x590] sm:$0xff] }
 0x140   :  { %v888_v21 = vunpack.c.h.s8.bf16 %v447_v15 }
 0x141   :  { %1894 = vmatmul.mubr.bf16.vlgmr.msra.gmra.mxu0 %v4573_v43  ;;  %1935 = vmatmul.mubr.bf16.vlgmr.msra.gmra.mxu1 %v4575_v44  ;;  %v1544_v37 = vmul.bf16 %v4669_v14, %v927_v29  ;;  %v1537_v49 = vmul.bf16 %v4660_v5, %v920_v33  ;;  %v1529_v56 = vmul.bf16 %v4660_v5, %v912_v52  ;;  %v887_v29 = vunpack.c.h.s8.bf16 %v446_v24 }
 0x142   :  { %1944 = vmatpush1.bf16.msra.mxu0 %v1456_v35  ;;  %1985 = vmatpush1.bf16.msra.mxu1 %v1584_v36  ;;  %v462_v35 = vld [vmem:[#allocation5 + $0x610] sm:$0xff]  ;;  %v1416_v36 = vmul.bf16 %v4669_v14, %v799_v28  ;;  %v880_v33 = vunpack.c.l.s8.bf16 %v447_v15 }
 0x143   :  { %1945 = vmatprep.subr.bf16.mxu0 %v1449_v39  ;;  %1986 = vmatprep.subr.bf16.mxu1 %v1577_v40  ;;  %v919_v39 = vunpack.c.h.s8.bf16 %v462_v35  ;;  %v1409_v40 = vmul.bf16 %v4660_v5, %v792_v32 }
 0x144   :  { %1975 = vmatprep.mubr.bf16.mxu0 %v4585_v60  ;;  %2016 = vmatprep.mubr.bf16.mxu1 %v4587_v61  ;;  %v1497_v52 = vmul.bf16 %v4660_v5, %v880_v33 }
 0x145   :  { %v1536_v51 = vmul.bf16 %v4669_v14, %v919_v39 }
 0x146   :  { %1946 = vmatpush1.bf16.msra.mxu0 %v1448_v46  ;;  %1987 = vmatpush1.bf16.msra.mxu1 %v1576_v50  ;;  %v519_v46 = vld [vmem:[#allocation5 + $0x7d8] sm:$0xff]  ;;  %v1408_v50 = vmul.bf16 %v4669_v14, %v791_v38  ;;  %v1504_v38 = vmul.bf16 %v4669_v14, %v887_v29 }
 0x147   :  { %1947 = vmatprep.subr.bf16.mxu0 %v1441_v54  ;;  %1988 = vmatprep.subr.bf16.mxu1 %v1569_v55  ;;  %v911_v54 = vunpack.c.l.s8.bf16 %v462_v35  ;;  %v1401_v55 = vmul.bf16 %v4660_v5, %v784_v4  ;;  %v1032_v58 = vunpack.c.h.s8.bf16 %v519_v46  ;;  %v1024_v23 = vunpack.c.l.s8.bf16 %v519_v46  ;;  %v439_v35 = vld [vmem:[#allocation5 + $0x558] sm:$0xff]  ;;  %v438_v4 = vld [vmem:[#allocation5 + $0x550] sm:$0xff] }
 0x149   :  { %v1528_v7 = vmul.bf16 %v4669_v14, %v911_v54  ;;  %v1649_v12 = vmul.bf16 %v4660_v5, %v1032_v58  ;;  %v1641_v25 = vmul.bf16 %v4660_v5, %v1024_v23  ;;  %v871_v54 = vunpack.c.h.s8.bf16 %v438_v4 }
 0x14a   :  { %1948 = vmatpush1.bf16.msra.mxu0 %v1440_v62  ;;  %1989 = vmatpush1.bf16.msra.mxu1 %v1568_v6  ;;  %v518_v62 = vld [vmem:[#allocation5 + $0x7d0] sm:$0xff]  ;;  %v1400_v6 = vmul.bf16 %v4669_v14, %v783_v53  ;;  %v1056_v58 = vsub.s32 4, %v4446_v1 }
 0x14b   :  { %1949 = vmatprep.subr.bf16.mxu0 %v1433_v9  ;;  %1990 = vmatprep.subr.bf16.mxu1 %v1561_v11  ;;  %v1031_v9 = vunpack.c.h.s8.bf16 %v518_v62  ;;  %v1521_v11 = vmul.bf16 %v4660_v5, %v904_v57 }
 0x14d   :  { %v1648_v18 = vmul.bf16 %v4669_v14, %v1031_v9 }
 0x14e   :  { %1950 = vmatpush1.bf16.msra.mxu0 %v1432_v16  ;;  %1991 = vmatpush1.bf16.msra.mxu1 %v1560_v17  ;;  %v511_v16 = vld [vmem:[#allocation5 + $0x798] sm:$0xff]  ;;  %v1520_v17 = vmul.bf16 %v4669_v14, %v903_v8  ;;  %v4799_v8 = vld [vmem:[#allocation7] ss:$2 sm:$0xff] }
 0x14f   :  { %1951 = vmatprep.subr.bf16.mxu0 %v1425_v47  ;;  %1992 = vmatprep.subr.bf16.mxu1 %v1553_v19  ;;  %v1023_v47 = vunpack.c.l.s8.bf16 %v518_v62  ;;  %v1513_v19 = vmul.bf16 %v4660_v5, %v896_v13  ;;  %v1016_v22 = vunpack.c.h.s8.bf16 %v511_v16  ;;  %v1008_v34 = vunpack.c.l.s8.bf16 %v511_v16 }
 0x150   :  { %v864_v62 = vunpack.c.l.s8.bf16 %v439_v35  ;;  %v863_v13 = vunpack.c.l.s8.bf16 %v438_v4 }
 0x151   :  { %v1640_v28 = vmul.bf16 %v4669_v14, %v1023_v47  ;;  %v1633_v32 = vmul.bf16 %v4660_v5, %v1016_v22  ;;  %v1625_v45 = vmul.bf16 %v4660_v5, %v1008_v34  ;;  %v297_v34 = vld [vmem:[#allocation5 + $0xe8] sm:$0xff] }
 0x152   :  { %1952 = vmatpush1.bf16.msra.mxu0 %v1424_v26  ;;  %1993 = vmatpush1.bf16.msra.mxu1 %v1552_v27  ;;  %v510_v26 = vld [vmem:[#allocation5 + $0x790] sm:$0xff]  ;;  %v1512_v27 = vmul.bf16 %v4669_v14, %v895_v41  ;;  %v1481_v41 = vmul.bf16 %v4660_v5, %v864_v62  ;;  %v1480_v22 = vmul.bf16 %v4669_v14, %v863_v13 }
 0x153   :  { %1953 = vmatprep.subr.bf16.mxu0 %v1417_v30  ;;  %1994 = vmatprep.subr.bf16.mxu1 %v1545_v31  ;;  %v1015_v30 = vunpack.c.h.s8.bf16 %v510_v26  ;;  %v1505_v31 = vmul.bf16 %v4660_v5, %v888_v21 }
 0x155   :  { %v1632_v39 = vmul.bf16 %v4669_v14, %v1015_v30 }
 0x156   :  { %1954 = vmatpush1.bf16.msra.mxu0 %v1416_v36  ;;  %1995 = vmatpush1.bf16.msra.mxu1 %v1544_v37  ;;  %v503_v36 = vld [vmem:[#allocation5 + $0x758] sm:$0xff]  ;;  %v879_v37 = vunpack.c.l.s8.bf16 %v446_v24 }
 0x157   :  { %1955 = vmatprep.subr.bf16.mxu0 %v1409_v40  ;;  %1996 = vmatprep.subr.bf16.mxu1 %v1537_v49  ;;  %v1007_v40 = vunpack.c.l.s8.bf16 %v510_v26  ;;  %v872_v49 = vunpack.c.h.s8.bf16 %v439_v35  ;;  %v1000_v46 = vunpack.c.h.s8.bf16 %v503_v36  ;;  %v361_v35 = vld [vmem:[#allocation5 + $0x2e8] sm:$0xff] }
 0x158   :  { %v1496_v53 = vmul.bf16 %v4669_v14, %v879_v37 }
 0x159   :  { %v1617_v59 = vmul.bf16 %v4660_v5, %v1000_v46  ;;  %v714_v46 = vunpack.c.h.s8.bf16 %v361_v35 }
 0x15a   :  { %1956 = vmatpush1.bf16.msra.mxu0 %v1408_v50  ;;  %1997 = vmatpush1.bf16.msra.mxu1 %v1536_v51  ;;  %v502_v50 = vld [vmem:[#allocation5 + $0x750] sm:$0xff]  ;;  %v1060_v51 = vsub.s32 5, %v4446_v1 }
 0x15b   :  { %1957 = vmatprep.subr.bf16.mxu0 %v1401_v55  ;;  %1998 = vmatprep.subr.bf16.mxu1 %v1529_v56  ;;  %v1624_v55 = vmul.bf16 %v4669_v14, %v1007_v40  ;;  %v1489_v56 = vmul.bf16 %v4660_v5, %v872_v49  ;;  %v999_v57 = vunpack.c.h.s8.bf16 %v502_v50  ;;  %v991_v15 = vunpack.c.l.s8.bf16 %v502_v50  ;;  %v296_v50 = vld [vmem:[#allocation5 + $0xe0] sm:$0xff] }
 0x15c   :  { %v1061_v9 = vrot.slane %v4799_v8, %v1060_v51 }
 0x15d   :  { %v1616_v23 = vmul.bf16 %v4669_v14, %v999_v57  ;;  %v1608_v26 = vmul.bf16 %v4669_v14, %v991_v15  ;;  %v585_v57 = vunpack.c.h.s8.bf16 %v296_v50  ;;  %v577_v15 = vunpack.c.l.s8.bf16 %v296_v50 }
 0x15e   :  { %1958 = vmatpush1.bf16.msra.mxu0 %v1400_v6  ;;  %1999 = vmatpush1.bf16.msra.mxu1 %v1528_v7  ;;  %v992_v6 = vunpack.c.l.s8.bf16 %v503_v36  ;;  %v431_v7 = vld [vmem:[#allocation5 + $0x518] sm:$0xff]  ;;  %v1083_v21 = vpack.c.bf16 %v1061_v9, %v1061_v9  ;;  %v706_v9 = vunpack.c.l.s8.bf16 %v361_v35 }
 0x15f   :  { %1959 = vmatprep.subr.bf16.mxu0 %v1521_v11  ;;  %2000 = vmatprep.subr.bf16.mxu1 %v1649_v12  ;;  %v495_v11 = vld [vmem:[#allocation5 + $0x718] sm:$0xff]  ;;  %v1488_v12 = vmul.bf16 %v4669_v14, %v871_v54  ;;  %v856_v16 = vunpack.c.h.s8.bf16 %v431_v7 }
 0x160   :  { %v1609_v47 = vmul.bf16 %v4660_v5, %v992_v6  ;;  %v1122_v33 = vpack.i.b16 %v1083_v21, %v1083_v21 }
 0x161   :  { %v1473_v30 = vmul.bf16 %v4660_v5, %v856_v16 }
 0x162   :  { %1960 = vmatpush2.bf16.msra.mxu0 %v1520_v17  ;;  %2001 = vmatpush2.bf16.msra.mxu1 %v1648_v18  ;;  %v430_v17 = vld [vmem:[#allocation5 + $0x510] sm:$0xff]  ;;  %v1057_v18 = vrot.slane %v4799_v8, %v1056_v58 }
 0x163   :  { %1961 = vmatprep.subr.bf16.mxu0 %v1513_v19  ;;  %2002 = vmatprep.subr.bf16.mxu1 %v1641_v25  ;;  %v984_v19 = vunpack.c.h.s8.bf16 %v495_v11  ;;  %v494_v25 = vld [vmem:[#allocation5 + $0x710] sm:$0xff]  ;;  %v855_v24 = vunpack.c.h.s8.bf16 %v430_v17  ;;  %v847_v37 = vunpack.c.l.s8.bf16 %v430_v17  ;;  %v288_v17 = vld [vmem:[#allocation5 + $0xa0] sm:$0xff] }
 0x164   :  { %v1082_v29 = vpack.c.bf16 %v1057_v18, %v1057_v18  ;;  %v975_v40 = vunpack.c.l.s8.bf16 %v494_v25 }
 0x165   :  { %v1472_v36 = vmul.bf16 %v4669_v14, %v855_v24  ;;  %v1464_v54 = vmul.bf16 %v4669_v14, %v847_v37 }
 0x166   :  { %1962 = vmatpush2.bf16.msra.mxu0 %v1512_v27  ;;  %2003 = vmatpush2.bf16.msra.mxu1 %v1640_v28  ;;  %v983_v27 = vunpack.c.h.s8.bf16 %v494_v25  ;;  %v848_v28 = vunpack.c.l.s8.bf16 %v431_v7  ;;  %v1115_v49 = vpack.i.b16 %v1082_v29, %v1082_v29  ;;  %v578_v7 = vunpack.c.l.s8.bf16 %v297_v34  ;;  %v352_v25 = vld [vmem:[#allocation5 + $0x2a0] sm:$0xff] }
 0x167   :  { %1963 = vmatprep.subr.bf16.mxu0 %v1505_v31  ;;  %2004 = vmatprep.subr.bf16.mxu1 %v1633_v32  ;;  %v1601_v31 = vmul.bf16 %v4660_v5, %v984_v19  ;;  %v976_v32 = vunpack.c.l.s8.bf16 %v495_v11  ;;  %v289_v11 = vld [vmem:[#allocation5 + $0xa8] sm:$0xff] }
 0x168   :  { %v562_v35 = vunpack.c.l.s8.bf16 %v289_v11 }
 0x169   :  { %v1593_v4 = vmul.bf16 %v4660_v5, %v976_v32 }
 0x16a   :  { %1964 = vmatpush2.bf16.msra.mxu0 %v1504_v38  ;;  %2005 = vmatpush2.bf16.msra.mxu1 %v1632_v39  ;;  %v1600_v38 = vmul.bf16 %v4669_v14, %v983_v27  ;;  %v1465_v39 = vmul.bf16 %v4660_v5, %v848_v28 }
 0x16b   :  { %1965 = vmatprep.subr.bf16.mxu0 %v1497_v52  ;;  %2006 = vmatprep.subr.bf16.mxu1 %v1625_v45  ;;  %v586_v52 = vunpack.c.h.s8.bf16 %v297_v34  ;;  %v4820_v45 = vrot.slane %v1122_v33, %v4452_v3 }
 0x16d   :  { %v1203_v62 = vmul.bf16 %v4820_v45, %v586_v52  ;;  %v1331_v6 = vmul.bf16 %v4820_v45, %v714_v46  ;;  %v1195_v18 = vmul.bf16 %v4820_v45, %v578_v7  ;;  %v561_v52 = vunpack.c.l.s8.bf16 %v288_v17 }
 0x16e   :  { %1966 = vmatpush2.bf16.msra.mxu0 %v1496_v53  ;;  %2007 = vmatpush2.bf16.msra.mxu1 %v1624_v55  ;;  %v360_v53 = vld [vmem:[#allocation5 + $0x2e0] sm:$0xff]  ;;  %v1592_v55 = vmul.bf16 %v4669_v14, %v975_v40  ;;  %v345_v40 = vld [vmem:[#allocation5 + $0x268] sm:$0xff] }
 0x16f   :  { %1967 = vmatprep.subr.bf16.mxu0 %v1489_v56  ;;  %2008 = vmatprep.subr.bf16.mxu1 %v1617_v59  ;;  %v4824_v56 = vld [vmem:[#allocation7 + $0x1] ss:$2 sm:$0xff]  ;;  %v4827_v59 = vrot.slane %v1115_v49, %v4452_v3  ;;  %v713_v5 = vunpack.c.h.s8.bf16 %v360_v53  ;;  %v705_v16 = vunpack.c.l.s8.bf16 %v360_v53  ;;  %v682_v7 = vunpack.c.h.s8.bf16 %v345_v40 }
 0x170   :  { %v1660_v14 = vrot.slane %v4824_v56, %v4452_v3  ;;  %v1664_v21 = vrot.slane %v4824_v56, %v4449_v2 }
 0x171   :  { %v1202_v13 = vmul.bf16 %v4827_v59, %v585_v57  ;;  %v1194_v28 = vmul.bf16 %v4827_v59, %v577_v15  ;;  %v1322_v29 = vmul.bf16 %v4827_v59, %v705_v16  ;;  %v1299_v16 = vmul.bf16 %v4820_v45, %v682_v7 }
 0x172   :  { %1968 = vmatpush2.bf16.msra.mxu0 %v1488_v12  ;;  %2009 = vmatpush2.bf16.msra.mxu1 %v1616_v23  ;;  %v353_v12 = vld [vmem:[#allocation5 + $0x2a8] sm:$0xff]  ;;  %v1330_v23 = vmul.bf16 %v4827_v59, %v713_v5  ;;  %v1179_v5 = vmul.bf16 %v4820_v45, %v562_v35 }
 0x173   :  { %1969 = vmatprep.subr.bf16.mxu0 %v1481_v41  ;;  %2010 = vmatprep.subr.bf16.mxu1 %v1609_v47  ;;  %v1323_v41 = vmul.bf16 %v4820_v45, %v706_v9  ;;  %v570_v47 = vunpack.c.h.s8.bf16 %v289_v11  ;;  %v698_v19 = vunpack.c.h.s8.bf16 %v353_v12  ;;  %v280_v9 = vld [vmem:[#allocation5 + $0x60] sm:$0xff] }
 0x174   :  { %v344_v11 = vld [vmem:[#allocation5 + $0x260] sm:$0xff] }
 0x175   :  { %v1187_v33 = vmul.bf16 %v4820_v45, %v570_v47  ;;  %v1315_v34 = vmul.bf16 %v4820_v45, %v698_v19  ;;  %v337_v47 = vld [vmem:[#allocation5 + $0x228] sm:$0xff] }
 0x176   :  { %1970 = vmatpush2.bf16.msra.mxu0 %v1480_v22  ;;  %2011 = vmatpush2.bf16.msra.mxu1 %v1608_v26  ;;  %v569_v26 = vunpack.c.h.s8.bf16 %v288_v17 }
 0x177   :  { %1971 = vmatprep.subr.bf16.mxu0 %v1473_v30  ;;  %2012 = vmatprep.subr.bf16.mxu1 %v1601_v31  ;;  %v697_v30 = vunpack.c.h.s8.bf16 %v352_v25 }
 0x178   :  { %v1186_v50 = vmul.bf16 %v4827_v59, %v569_v26 }
 0x179   :  { %v1314_v53 = vmul.bf16 %v4827_v59, %v697_v30  ;;  %v336_v30 = vld [vmem:[#allocation5 + $0x220] sm:$0xff] }
 0x17a   :  { %1972 = vmatpush2.bf16.msra.mxu0 %v1472_v36  ;;  %2013 = vmatpush2.bf16.msra.mxu1 %v1600_v38  ;;  %v690_v36 = vunpack.c.l.s8.bf16 %v353_v12  ;;  %v1178_v12 = vmul.bf16 %v4827_v59, %v561_v52 }
 0x17b   :  { %1973 = vmatprep.subr.bf16.mxu0 %v1465_v39  ;;  %2014 = vmatprep.subr.bf16.mxu1 %v1593_v4  ;;  %v281_v39 = vld [vmem:[#allocation5 + $0x68] sm:$0xff] }
 0x17c   :  { %v546_v17 = vunpack.c.l.s8.bf16 %v281_v39 }
 0x17e   :  { %1974 = vmatpush2.bf16.msra.mxu0 %v1464_v54  ;;  %2015 = vmatpush2.bf16.msra.mxu1 %v1592_v55  ;;  %v689_v54 = vunpack.c.l.s8.bf16 %v352_v25 }
 0x17f   :  { %2025 = vmatprep.subr.bf16.mxu0 %v1203_v62  ;;  %2066 = vmatprep.subr.bf16.mxu1 %v1331_v6  ;;  %v1307_v62 = vmul.bf16 %v4820_v45, %v690_v36  ;;  %v554_v6 = vunpack.c.h.s8.bf16 %v281_v39  ;;  %v658_v39 = vunpack.c.l.s8.bf16 %v337_v47 }
 0x181   :  { %v1731_v22 = vpop.f32.mrf.mxu0  ;;  %v1772_v24 = vpop.f32.mrf.mxu1  ;;  %1976 = vmatmul.mubr.bf16.vlgmr.msra.gmra.mxu0 %v4673_v48  ;;  %2017 = vmatmul.mubr.bf16.vlgmr.msra.gmra.mxu1 %v4675_v42  ;;  %v1171_v15 = vmul.bf16 %v4820_v45, %v554_v6  ;;  %v392_v6 = vld [vmem:[#allocation5 + $0x3e0] sm:$0xff] }
 0x182   :  { %v1732_v27 = vadd.f32 %v1731_v22, %v1660_v14  ;;  %2026 = vmatpush1.bf16.msra.mxu0 %v1202_v13  ;;  %2067 = vmatpush1.bf16.msra.mxu1 %v1330_v23  ;;  %v1306_v14 = vmul.bf16 %v4827_v59, %v689_v54  ;;  %v553_v13 = vunpack.c.h.s8.bf16 %v280_v9  ;;  %v681_v23 = vunpack.c.h.s8.bf16 %v344_v11 }
 0x183   :  { %v1733_v31 = vpop.f32.mrf.mxu0  ;;  %v1774_v32 = vpop.f32.mrf.mxu1  ;;  %2027 = vmatprep.subr.bf16.mxu0 %v1195_v18  ;;  %2068 = vmatprep.subr.bf16.mxu1 %v1323_v41  ;;  %v674_v18 = vunpack.c.l.s8.bf16 %v345_v40  ;;  %v273_v41 = vld [vmem:[#allocation5 + $0x28] sm:$0xff]  ;;  %v673_v22 = vunpack.c.l.s8.bf16 %v344_v11 }
 0x184   :  { %v4845_v37 = vadd.f32 %v1772_v24, %v1732_v27  ;;  %v1734_v38 = vadd.f32 %v1733_v31, %v1664_v21  ;;  %2057 = vmatprep.mubr.bf16.mxu0 %v4519_v63  ;;  %2098 = vmatprep.mubr.bf16.mxu1 %v4521_v0  ;;  %v1170_v19 = vmul.bf16 %v4827_v59, %v553_v13  ;;  %v545_v21 = vunpack.c.l.s8.bf16 %v280_v9  ;;  %v329_v40 = vld [vmem:[#allocation5 + $0x1e8] sm:$0xff] }
 0x185   :  { %v1735_v49 = vpop.f32.mrf.mxu0  ;;  %v1776_v4 = vpop.f32.mrf.mxu1  ;;  %v1298_v25 = vmul.bf16 %v4827_v59, %v681_v23  ;;  %v1163_v24 = vmul.bf16 %v4820_v45, %v546_v17  ;;  %v1291_v26 = vmul.bf16 %v4820_v45, %v674_v18  ;;  %v538_v27 = vunpack.c.h.s8.bf16 %v273_v41  ;;  %v385_v17 = vld [vmem:[#allocation5 + $0x3a8] sm:$0xff] }
 0x186   :  { %v4849_v46 = vadd.f32 %v1774_v32, %v1734_v38  ;;  %2028 = vmatpush1.bf16.msra.mxu0 %v1194_v28  ;;  %2069 = vmatpush1.bf16.msra.mxu1 %v1322_v29  ;;  %v666_v28 = vunpack.c.h.s8.bf16 %v337_v47  ;;  %v272_v29 = vld [vmem:[#allocation5 + $0x20] sm:$0xff]  ;;  %v1162_v31 = vmul.bf16 %v4827_v59, %v545_v21  ;;  %v1290_v32 = vmul.bf16 %v4827_v59, %v673_v22  ;;  %v393_v49 = vld [vmem:[#allocation5 + $0x3e8] sm:$0xff] }
 0x187   :  { %v1736_v55 = vpop.f32.mrf.mxu0  ;;  %v1777_v57 = vpop.f32.mrf.mxu1  ;;  %2029 = vmatprep.subr.bf16.mxu0 %v1187_v33  ;;  %2070 = vmatprep.subr.bf16.mxu1 %v1315_v34  ;;  %v537_v33 = vunpack.c.h.s8.bf16 %v272_v29  ;;  %v665_v34 = vunpack.c.h.s8.bf16 %v336_v30  ;;  %v1155_v35 = vmul.bf16 %v4820_v45, %v538_v27  ;;  %v530_v38 = vunpack.c.l.s8.bf16 %v273_v41  ;;  %v384_v27 = vld [vmem:[#allocation5 + $0x3a0] sm:$0xff] }
 0x188   :  { %v1283_v36 = vmul.bf16 %v4820_v45, %v666_v28  ;;  %v1275_v55 = vmul.bf16 %v4820_v45, %v658_v39  ;;  %v650_v57 = vunpack.c.h.s8.bf16 %v329_v40  ;;  %v642_v23 = vunpack.c.l.s8.bf16 %v329_v40 }
 0x189   :  { %v1154_v4 = vmul.bf16 %v4827_v59, %v537_v33  ;;  %v1282_v52 = vmul.bf16 %v4827_v59, %v665_v34  ;;  %v1147_v54 = vmul.bf16 %v4820_v45, %v530_v38  ;;  %v377_v38 = vld [vmem:[#allocation5 + $0x368] sm:$0xff] }
 0x18a   :  { %2030 = vmatpush1.bf16.msra.mxu0 %v1186_v50  ;;  %2071 = vmatpush1.bf16.msra.mxu1 %v1314_v53  ;;  %v529_v50 = vunpack.c.l.s8.bf16 %v272_v29  ;;  %v657_v53 = vunpack.c.l.s8.bf16 %v336_v30 }
 0x18b   :  { %2031 = vmatprep.subr.bf16.mxu0 %v1179_v5  ;;  %2072 = vmatprep.subr.bf16.mxu1 %v1307_v62  ;;  %v778_v5 = vunpack.c.h.s8.bf16 %v393_v49  ;;  %v328_v62 = vld [vmem:[#allocation5 + $0x1e0] sm:$0xff] }
 0x18c   :  { %v1146_v7 = vmul.bf16 %v4827_v59, %v529_v50  ;;  %v1274_v9 = vmul.bf16 %v4827_v59, %v657_v53  ;;  %v649_v11 = vunpack.c.h.s8.bf16 %v328_v62  ;;  %v641_v47 = vunpack.c.l.s8.bf16 %v328_v62 }
 0x18d   :  { %v1395_v13 = vmul.bf16 %v4820_v45, %v778_v5 }
 0x18e   :  { %2032 = vmatpush1.bf16.msra.mxu0 %v1178_v12  ;;  %2073 = vmatpush1.bf16.msra.mxu1 %v1306_v14  ;;  %v777_v12 = vunpack.c.h.s8.bf16 %v392_v6  ;;  %v1267_v14 = vmul.bf16 %v4820_v45, %v650_v57  ;;  %v1266_v18 = vmul.bf16 %v4827_v59, %v649_v11  ;;  %v1258_v28 = vmul.bf16 %v4827_v59, %v641_v47  ;;  %v376_v57 = vld [vmem:[#allocation5 + $0x360] sm:$0xff] }
 0x18f   :  { %2033 = vmatprep.subr.bf16.mxu0 %v1171_v15  ;;  %2074 = vmatprep.subr.bf16.mxu1 %v1299_v16  ;;  %v770_v15 = vunpack.c.l.s8.bf16 %v393_v49  ;;  %v321_v16 = vld [vmem:[#allocation5 + $0x1a8] sm:$0xff] }
 0x190   :  { %v1394_v41 = vmul.bf16 %v4827_v59, %v777_v12  ;;  %v634_v22 = vunpack.c.h.s8.bf16 %v321_v16  ;;  %v626_v34 = vunpack.c.l.s8.bf16 %v321_v16 }
 0x191   :  { %v1387_v21 = vmul.bf16 %v4820_v45, %v770_v15 }
 0x192   :  { %2034 = vmatpush1.bf16.msra.mxu0 %v1170_v19  ;;  %2075 = vmatpush1.bf16.msra.mxu1 %v1298_v25  ;;  %v769_v19 = vunpack.c.l.s8.bf16 %v392_v6  ;;  %v1259_v25 = vmul.bf16 %v4820_v45, %v642_v23  ;;  %v369_v23 = vld [vmem:[#allocation5 + $0x328] sm:$0xff] }
 0x193   :  { %2035 = vmatprep.subr.bf16.mxu0 %v1163_v24  ;;  %2076 = vmatprep.subr.bf16.mxu1 %v1291_v26  ;;  %v762_v24 = vunpack.c.h.s8.bf16 %v385_v17  ;;  %v320_v26 = vld [vmem:[#allocation5 + $0x1a0] sm:$0xff] }
 0x194   :  { %v1386_v29 = vmul.bf16 %v4827_v59, %v769_v19  ;;  %v633_v30 = vunpack.c.h.s8.bf16 %v320_v26  ;;  %v625_v49 = vunpack.c.l.s8.bf16 %v320_v26 }
 0x195   :  { %v1379_v33 = vmul.bf16 %v4820_v45, %v762_v24 }
 0x196   :  { %2036 = vmatpush1.bf16.msra.mxu0 %v1162_v31  ;;  %2077 = vmatpush1.bf16.msra.mxu1 %v1290_v32  ;;  %v761_v31 = vunpack.c.h.s8.bf16 %v384_v27  ;;  %v1251_v32 = vmul.bf16 %v4820_v45, %v634_v22  ;;  %v1250_v39 = vmul.bf16 %v4827_v59, %v633_v30  ;;  %v1242_v5 = vmul.bf16 %v4827_v59, %v625_v49  ;;  %v368_v22 = vld [vmem:[#allocation5 + $0x320] sm:$0xff] }
 0x197   :  { %2037 = vmatprep.subr.bf16.mxu0 %v1155_v35  ;;  %2078 = vmatprep.subr.bf16.mxu1 %v1283_v36  ;;  %v754_v35 = vunpack.c.l.s8.bf16 %v385_v17  ;;  %v313_v36 = vld [vmem:[#allocation5 + $0x168] sm:$0xff] }
 0x198   :  { %v1378_v40 = vmul.bf16 %v4827_v59, %v761_v31  ;;  %v618_v53 = vunpack.c.h.s8.bf16 %v313_v36  ;;  %v610_v12 = vunpack.c.l.s8.bf16 %v313_v36 }
 0x199   :  { %v1371_v50 = vmul.bf16 %v4820_v45, %v754_v35 }
 0x19a   :  { %2038 = vmatpush1.bf16.msra.mxu0 %v1154_v4  ;;  %2079 = vmatpush1.bf16.msra.mxu1 %v1282_v52  ;;  %v753_v4 = vunpack.c.l.s8.bf16 %v384_v27  ;;  %v1243_v52 = vmul.bf16 %v4820_v45, %v626_v34  ;;  %v489_v34 = vld [vmem:[#allocation5 + $0x6e8] sm:$0xff] }
 0x19b   :  { %2039 = vmatprep.subr.bf16.mxu0 %v1147_v54  ;;  %2080 = vmatprep.subr.bf16.mxu1 %v1275_v55  ;;  %v746_v54 = vunpack.c.h.s8.bf16 %v377_v38  ;;  %v312_v55 = vld [vmem:[#allocation5 + $0x160] sm:$0xff] }
 0x19c   :  { %v1370_v62 = vmul.bf16 %v4827_v59, %v753_v4  ;;  %v617_v6 = vunpack.c.h.s8.bf16 %v312_v55  ;;  %v609_v17 = vunpack.c.l.s8.bf16 %v312_v55 }
 0x19d   :  { %v1363_v11 = vmul.bf16 %v4820_v45, %v746_v54 }
 0x19e   :  { %2040 = vmatpush1.bf16.msra.mxu0 %v1146_v7  ;;  %2081 = vmatpush1.bf16.msra.mxu1 %v1274_v9  ;;  %v745_v7 = vunpack.c.h.s8.bf16 %v376_v57  ;;  %v1235_v9 = vmul.bf16 %v4820_v45, %v618_v53  ;;  %v1234_v15 = vmul.bf16 %v4827_v59, %v617_v6  ;;  %v1226_v24 = vmul.bf16 %v4827_v59, %v609_v17  ;;  %v488_v53 = vld [vmem:[#allocation5 + $0x6e0] sm:$0xff] }
 0x19f   :  { %2041 = vmatprep.subr.bf16.mxu0 %v1267_v14  ;;  %2082 = vmatprep.subr.bf16.mxu1 %v1395_v13  ;;  %v738_v14 = vunpack.c.l.s8.bf16 %v377_v38  ;;  %v305_v13 = vld [vmem:[#allocation5 + $0x128] sm:$0xff] }
 0x1a0   :  { %v1362_v16 = vmul.bf16 %v4827_v59, %v745_v7  ;;  %v602_v19 = vunpack.c.h.s8.bf16 %v305_v13  ;;  %v594_v31 = vunpack.c.l.s8.bf16 %v305_v13 }
 0x1a1   :  { %v1355_v47 = vmul.bf16 %v4820_v45, %v738_v14 }
 0x1a2   :  { %2042 = vmatpush2.bf16.msra.mxu0 %v1266_v18  ;;  %2083 = vmatpush2.bf16.msra.mxu1 %v1394_v41  ;;  %v737_v18 = vunpack.c.l.s8.bf16 %v376_v57  ;;  %v1227_v41 = vmul.bf16 %v4820_v45, %v610_v12  ;;  %v481_v12 = vld [vmem:[#allocation5 + $0x6a8] sm:$0xff] }
 0x1a3   :  { %2043 = vmatprep.subr.bf16.mxu0 %v1259_v25  ;;  %2084 = vmatprep.subr.bf16.mxu1 %v1387_v21  ;;  %v730_v25 = vunpack.c.h.s8.bf16 %v369_v23  ;;  %v304_v21 = vld [vmem:[#allocation5 + $0x120] sm:$0xff] }
 0x1a4   :  { %v1354_v26 = vmul.bf16 %v4827_v59, %v737_v18  ;;  %v601_v27 = vunpack.c.h.s8.bf16 %v304_v21  ;;  %v593_v38 = vunpack.c.l.s8.bf16 %v304_v21 }
 0x1a5   :  { %v1347_v30 = vmul.bf16 %v4820_v45, %v730_v25 }
 0x1a6   :  { %2044 = vmatpush2.bf16.msra.mxu0 %v1258_v28  ;;  %2085 = vmatpush2.bf16.msra.mxu1 %v1386_v29  ;;  %v729_v28 = vunpack.c.h.s8.bf16 %v368_v22  ;;  %v1219_v29 = vmul.bf16 %v4820_v45, %v602_v19  ;;  %v1218_v35 = vmul.bf16 %v4827_v59, %v601_v27  ;;  %v1210_v54 = vmul.bf16 %v4827_v59, %v593_v38  ;;  %v480_v19 = vld [vmem:[#allocation5 + $0x6a0] sm:$0xff]  ;;  %v473_v38 = vld [vmem:[#allocation5 + $0x668] sm:$0xff] }
 0x1a7   :  { %2045 = vmatprep.subr.bf16.mxu0 %v1251_v32  ;;  %2086 = vmatprep.subr.bf16.mxu1 %v1379_v33  ;;  %v722_v32 = vunpack.c.l.s8.bf16 %v369_v23  ;;  %v425_v33 = vld [vmem:[#allocation5 + $0x4e8] sm:$0xff] }
 0x1a8   :  { %v1346_v36 = vmul.bf16 %v4827_v59, %v729_v28  ;;  %v842_v4 = vunpack.c.h.s8.bf16 %v425_v33  ;;  %v834_v7 = vunpack.c.l.s8.bf16 %v425_v33  ;;  %v953_v28 = vunpack.c.h.s8.bf16 %v480_v19 }
 0x1a9   :  { %v1339_v49 = vmul.bf16 %v4820_v45, %v722_v32 }
 0x1aa   :  { %2046 = vmatpush2.bf16.msra.mxu0 %v1250_v39  ;;  %2087 = vmatpush2.bf16.msra.mxu1 %v1378_v40  ;;  %v721_v39 = vunpack.c.l.s8.bf16 %v368_v22  ;;  %v1211_v40 = vmul.bf16 %v4820_v45, %v594_v31  ;;  %v1451_v17 = vmul.bf16 %v4820_v45, %v834_v7  ;;  %v472_v7 = vld [vmem:[#allocation5 + $0x660] sm:$0xff] }
 0x1ab   :  { %2047 = vmatprep.subr.bf16.mxu0 %v1243_v52  ;;  %2088 = vmatprep.subr.bf16.mxu1 %v1371_v50  ;;  %v970_v52 = vunpack.c.h.s8.bf16 %v489_v34  ;;  %v424_v50 = vld [vmem:[#allocation5 + $0x4e0] sm:$0xff] }
 0x1ac   :  { %v1338_v55 = vmul.bf16 %v4827_v59, %v721_v39  ;;  %v841_v57 = vunpack.c.h.s8.bf16 %v424_v50  ;;  %v833_v23 = vunpack.c.l.s8.bf16 %v424_v50 }
 0x1ad   :  { %v1587_v6 = vmul.bf16 %v4820_v45, %v970_v52  ;;  %v1570_v52 = vmul.bf16 %v4827_v59, %v953_v28  ;;  %v464_v28 = vld [vmem:[#allocation5 + $0x620] sm:$0xff] }
 0x1ae   :  { %2048 = vmatpush2.bf16.msra.mxu0 %v1242_v5  ;;  %2089 = vmatpush2.bf16.msra.mxu1 %v1370_v62  ;;  %v969_v5 = vunpack.c.h.s8.bf16 %v488_v53  ;;  %v1459_v62 = vmul.bf16 %v4820_v45, %v842_v4  ;;  %v1458_v14 = vmul.bf16 %v4827_v59, %v841_v57 }
 0x1af   :  { %2049 = vmatprep.subr.bf16.mxu0 %v1235_v9  ;;  %2090 = vmatprep.subr.bf16.mxu1 %v1363_v11  ;;  %v962_v9 = vunpack.c.l.s8.bf16 %v489_v34  ;;  %v417_v11 = vld [vmem:[#allocation5 + $0x4a8] sm:$0xff]  ;;  %v946_v34 = vunpack.c.l.s8.bf16 %v481_v12 }
 0x1b0   :  { %v1586_v13 = vmul.bf16 %v4827_v59, %v969_v5  ;;  %v818_v33 = vunpack.c.l.s8.bf16 %v417_v11 }
 0x1b1   :  { %v1579_v18 = vmul.bf16 %v4820_v45, %v962_v9  ;;  %v1563_v57 = vmul.bf16 %v4820_v45, %v946_v34 }
 0x1b2   :  { %2050 = vmatpush2.bf16.msra.mxu0 %v1234_v15  ;;  %2091 = vmatpush2.bf16.msra.mxu1 %v1362_v16  ;;  %v961_v15 = vunpack.c.l.s8.bf16 %v488_v53  ;;  %v416_v16 = vld [vmem:[#allocation5 + $0x4a0] sm:$0xff]  ;;  %v945_v53 = vunpack.c.l.s8.bf16 %v480_v19 }
 0x1b3   :  { %2051 = vmatprep.subr.bf16.mxu0 %v1227_v41  ;;  %2092 = vmatprep.subr.bf16.mxu1 %v1355_v47  ;;  %v826_v41 = vunpack.c.h.s8.bf16 %v417_v11  ;;  %v954_v47 = vunpack.c.h.s8.bf16 %v481_v12  ;;  %v825_v22 = vunpack.c.h.s8.bf16 %v416_v16  ;;  %v817_v50 = vunpack.c.l.s8.bf16 %v416_v16 }
 0x1b4   :  { %v1578_v27 = vmul.bf16 %v4827_v59, %v961_v15  ;;  %v1562_v11 = vmul.bf16 %v4827_v59, %v945_v53  ;;  %v930_v16 = vunpack.c.l.s8.bf16 %v473_v38 }
 0x1b5   :  { %v1443_v31 = vmul.bf16 %v4820_v45, %v826_v41  ;;  %v1571_v32 = vmul.bf16 %v4820_v45, %v954_v47  ;;  %v1434_v9 = vmul.bf16 %v4827_v59, %v817_v50  ;;  %v913_v50 = vunpack.c.l.s8.bf16 %v464_v28 }
 0x1b6   :  { %2052 = vmatpush2.bf16.msra.mxu0 %v1226_v24  ;;  %2093 = vmatpush2.bf16.msra.mxu1 %v1354_v26  ;;  %v1450_v26 = vmul.bf16 %v4827_v59, %v833_v23 }
 0x1b7   :  { %2053 = vmatprep.subr.bf16.mxu0 %v1219_v29  ;;  %2094 = vmatprep.subr.bf16.mxu1 %v1347_v30 }
 0x1ba   :  { %2054 = vmatpush2.bf16.msra.mxu0 %v1218_v35  ;;  %2095 = vmatpush2.bf16.msra.mxu1 %v1346_v36  ;;  %v409_v36 = vld [vmem:[#allocation5 + $0x468] sm:$0xff] }
 0x1bb   :  { %2055 = vmatprep.subr.bf16.mxu0 %v1211_v40  ;;  %2096 = vmatprep.subr.bf16.mxu1 %v1339_v49  ;;  %v1442_v49 = vmul.bf16 %v4827_v59, %v825_v22  ;;  %v810_v5 = vunpack.c.h.s8.bf16 %v409_v36  ;;  %v802_v15 = vunpack.c.l.s8.bf16 %v409_v36  ;;  %v1547_v22 = vmul.bf16 %v4820_v45, %v930_v16 }
 0x1be   :  { %2056 = vmatpush2.bf16.msra.mxu0 %v1210_v54  ;;  %2097 = vmatpush2.bf16.msra.mxu1 %v1338_v55  ;;  %v1435_v55 = vmul.bf16 %v4820_v45, %v818_v33 }
 0x1bf   :  { %2107 = vmatprep.subr.bf16.mxu0 %v1459_v62  ;;  %2148 = vmatprep.subr.bf16.mxu1 %v1587_v6  ;;  %v938_v62 = vunpack.c.h.s8.bf16 %v473_v38  ;;  %v408_v6 = vld [vmem:[#allocation5 + $0x460] sm:$0xff]  ;;  %v457_v38 = vld [vmem:[#allocation5 + $0x5e8] sm:$0xff] }
 0x1c0   :  { %v809_v12 = vunpack.c.h.s8.bf16 %v408_v6  ;;  %v801_v19 = vunpack.c.l.s8.bf16 %v408_v6  ;;  %v1530_v6 = vmul.bf16 %v4827_v59, %v913_v50 }
 0x1c1   :  { %v1813_v25 = vpop.f32.mrf.mxu0  ;;  %v1854_v21 = vpop.f32.mrf.mxu1  ;;  %2058 = vmatmul.mubr.bf16.vlgmr.msra.gmra.mxu0 %v4573_v43  ;;  %2099 = vmatmul.mubr.bf16.vlgmr.msra.gmra.mxu1 %v4575_v44  ;;  %v1555_v23 = vmul.bf16 %v4820_v45, %v938_v62 }
 0x1c2   :  { %v1814_v24 = vadd.f32 %v1813_v25, %v4845_v37  ;;  %2108 = vmatpush1.bf16.msra.mxu0 %v1458_v14  ;;  %2149 = vmatpush1.bf16.msra.mxu1 %v1586_v13  ;;  %v937_v14 = vunpack.c.h.s8.bf16 %v472_v7  ;;  %v1427_v13 = vmul.bf16 %v4820_v45, %v810_v5  ;;  %v1426_v41 = vmul.bf16 %v4827_v59, %v809_v12  ;;  %v520_v5 = vld [vmem:[#allocation5 + $0x7e0] sm:$0xff] }
 0x1c3   :  { %v1815_v29 = vpop.f32.mrf.mxu0  ;;  %v1856_v30 = vpop.f32.mrf.mxu1  ;;  %2109 = vmatprep.subr.bf16.mxu0 %v1451_v17  ;;  %2150 = vmatprep.subr.bf16.mxu1 %v1579_v18  ;;  %v401_v17 = vld [vmem:[#allocation5 + $0x428] sm:$0xff]  ;;  %v929_v25 = vunpack.c.l.s8.bf16 %v472_v7 }
 0x1c4   :  { %v4918_v35 = vadd.f32 %v1854_v21, %v1814_v24  ;;  %v1816_v37 = vadd.f32 %v1815_v29, %v4849_v46  ;;  %2139 = vmatprep.mubr.bf16.mxu0 %v4585_v60  ;;  %2180 = vmatprep.mubr.bf16.mxu1 %v4587_v61  ;;  %v465_v18 = vld [vmem:[#allocation5 + $0x628] sm:$0xff]  ;;  %v1554_v47 = vmul.bf16 %v4827_v59, %v937_v14  ;;  %v794_v24 = vunpack.c.h.s8.bf16 %v401_v17 }
 0x1c5   :  { %v1817_v39 = vpop.f32.mrf.mxu0  ;;  %v1858_v40 = vpop.f32.mrf.mxu1  ;;  %v1419_v21 = vmul.bf16 %v4820_v45, %v802_v15  ;;  %v1418_v29 = vmul.bf16 %v4827_v59, %v801_v19  ;;  %v914_v36 = vunpack.c.l.s8.bf16 %v465_v18  ;;  %v898_v14 = vunpack.c.l.s8.bf16 %v457_v38  ;;  %v513_v15 = vld [vmem:[#allocation5 + $0x7a8] sm:$0xff] }
 0x1c6   :  { %v4924_v4 = vadd.f32 %v1856_v30, %v1816_v37  ;;  %2110 = vmatpush1.bf16.msra.mxu0 %v1450_v26  ;;  %2151 = vmatpush1.bf16.msra.mxu1 %v1578_v27  ;;  %v922_v26 = vunpack.c.h.s8.bf16 %v465_v18  ;;  %v400_v27 = vld [vmem:[#allocation5 + $0x420] sm:$0xff]  ;;  %v1546_v30 = vmul.bf16 %v4827_v59, %v929_v25  ;;  %v1411_v33 = vmul.bf16 %v4820_v45, %v794_v24  ;;  %v521_v39 = vld [vmem:[#allocation5 + $0x7e8] sm:$0xff] }
 0x1c7   :  { %v1818_v54 = vpop.f32.mrf.mxu0  ;;  %v1859_v46 = vpop.f32.mrf.mxu1  ;;  %2111 = vmatprep.subr.bf16.mxu0 %v1443_v31  ;;  %2152 = vmatprep.subr.bf16.mxu1 %v1571_v32  ;;  %v793_v31 = vunpack.c.h.s8.bf16 %v400_v27  ;;  %v921_v32 = vunpack.c.h.s8.bf16 %v464_v28  ;;  %v786_v37 = vunpack.c.l.s8.bf16 %v401_v17  ;;  %v512_v24 = vld [vmem:[#allocation5 + $0x7a0] sm:$0xff] }
 0x1c8   :  { %v1539_v34 = vmul.bf16 %v4820_v45, %v922_v26  ;;  %v1531_v54 = vmul.bf16 %v4820_v45, %v914_v36  ;;  %v906_v46 = vunpack.c.h.s8.bf16 %v457_v38 }
 0x1c9   :  { %v1410_v40 = vmul.bf16 %v4827_v59, %v793_v31  ;;  %v1403_v53 = vmul.bf16 %v4820_v45, %v786_v37  ;;  %v505_v37 = vld [vmem:[#allocation5 + $0x768] sm:$0xff] }
 0x1ca   :  { %2112 = vmatpush1.bf16.msra.mxu0 %v1442_v49  ;;  %2153 = vmatpush1.bf16.msra.mxu1 %v1570_v52  ;;  %v1538_v49 = vmul.bf16 %v4827_v59, %v921_v32  ;;  %v785_v52 = vunpack.c.l.s8.bf16 %v400_v27 }
 0x1cb   :  { %2113 = vmatprep.subr.bf16.mxu0 %v1435_v55  ;;  %2154 = vmatprep.subr.bf16.mxu1 %v1563_v57  ;;  %v1034_v55 = vunpack.c.h.s8.bf16 %v521_v39  ;;  %v456_v57 = vld [vmem:[#allocation5 + $0x5e0] sm:$0xff] }
 0x1cc   :  { %v1402_v62 = vmul.bf16 %v4827_v59, %v785_v52  ;;  %v905_v7 = vunpack.c.h.s8.bf16 %v456_v57  ;;  %v897_v16 = vunpack.c.l.s8.bf16 %v456_v57  ;;  %v440_v52 = vld [vmem:[#allocation5 + $0x560] sm:$0xff] }
 0x1cd   :  { %v1651_v12 = vmul.bf16 %v4820_v45, %v1034_v55  ;;  %v1068_v55 = vsub.s32 7, %v4446_v1 }
 0x1ce   :  { %2114 = vmatpush1.bf16.msra.mxu0 %v1434_v9  ;;  %2155 = vmatpush1.bf16.msra.mxu1 %v1562_v11  ;;  %v1033_v9 = vunpack.c.h.s8.bf16 %v520_v5  ;;  %v1523_v11 = vmul.bf16 %v4820_v45, %v906_v46  ;;  %v1522_v17 = vmul.bf16 %v4827_v59, %v905_v7  ;;  %v1514_v26 = vmul.bf16 %v4827_v59, %v897_v16  ;;  %v504_v46 = vld [vmem:[#allocation5 + $0x760] sm:$0xff] }
 0x1cf   :  { %2115 = vmatprep.subr.bf16.mxu0 %v1427_v13  ;;  %2156 = vmatprep.subr.bf16.mxu1 %v1555_v23  ;;  %v1026_v13 = vunpack.c.l.s8.bf16 %v521_v39  ;;  %v449_v23 = vld [vmem:[#allocation5 + $0x5a8] sm:$0xff] }
 0x1d0   :  { %v1650_v18 = vmul.bf16 %v4827_v59, %v1033_v9  ;;  %v890_v25 = vunpack.c.h.s8.bf16 %v449_v23  ;;  %v1064_v9 = vsub.s32 6, %v4446_v1 }
 0x1d1   :  { %v1643_v19 = vmul.bf16 %v4820_v45, %v1026_v13  ;;  %v1069_v13 = vrot.slane %v4799_v8, %v1068_v55 }
 0x1d2   :  { %2116 = vmatpush1.bf16.msra.mxu0 %v1426_v41  ;;  %2157 = vmatpush1.bf16.msra.mxu1 %v1554_v47  ;;  %v1025_v41 = vunpack.c.l.s8.bf16 %v520_v5  ;;  %v1515_v47 = vmul.bf16 %v4820_v45, %v898_v14  ;;  %v1507_v31 = vmul.bf16 %v4820_v45, %v890_v25  ;;  %v873_v5 = vunpack.c.h.s8.bf16 %v440_v52 }
 0x1d3   :  { %2117 = vmatprep.subr.bf16.mxu0 %v1419_v21  ;;  %2158 = vmatprep.subr.bf16.mxu1 %v1547_v22  ;;  %v1018_v21 = vunpack.c.h.s8.bf16 %v513_v15  ;;  %v448_v22 = vld [vmem:[#allocation5 + $0x5a0] sm:$0xff]  ;;  %v994_v14 = vunpack.c.l.s8.bf16 %v505_v37  ;;  %v1065_v25 = vrot.slane %v4799_v8, %v1064_v9 }
 0x1d4   :  { %v1642_v27 = vmul.bf16 %v4827_v59, %v1025_v41  ;;  %v889_v28 = vunpack.c.h.s8.bf16 %v448_v22  ;;  %v881_v36 = vunpack.c.l.s8.bf16 %v448_v22  ;;  %v1490_v16 = vmul.bf16 %v4827_v59, %v873_v5 }
 0x1d5   :  { %v1635_v32 = vmul.bf16 %v4820_v45, %v1018_v21  ;;  %v1611_v21 = vmul.bf16 %v4820_v45, %v994_v14 }
 0x1d6   :  { %2118 = vmatpush1.bf16.msra.mxu0 %v1418_v29  ;;  %2159 = vmatpush1.bf16.msra.mxu1 %v1546_v30  ;;  %v1017_v29 = vunpack.c.h.s8.bf16 %v512_v24  ;;  %v882_v30 = vunpack.c.l.s8.bf16 %v449_v23  ;;  %v1506_v38 = vmul.bf16 %v4827_v59, %v889_v28  ;;  %v1498_v57 = vmul.bf16 %v4827_v59, %v881_v36  ;;  %v433_v23 = vld [vmem:[#allocation5 + $0x528] sm:$0xff] }
 0x1d7   :  { %2119 = vmatprep.subr.bf16.mxu0 %v1411_v33  ;;  %2160 = vmatprep.subr.bf16.mxu1 %v1539_v34  ;;  %v1010_v33 = vunpack.c.l.s8.bf16 %v513_v15  ;;  %v441_v34 = vld [vmem:[#allocation5 + $0x568] sm:$0xff]  ;;  %v858_v22 = vunpack.c.h.s8.bf16 %v433_v23 }
 0x1d8   :  { %v1634_v39 = vmul.bf16 %v4827_v59, %v1017_v29  ;;  %v866_v7 = vunpack.c.l.s8.bf16 %v441_v34  ;;  %v497_v15 = vld [vmem:[#allocation5 + $0x728] sm:$0xff] }
 0x1d9   :  { %v1627_v50 = vmul.bf16 %v4820_v45, %v1010_v33  ;;  %v1084_v33 = vpack.c.bf16 %v1065_v25, %v1065_v25  ;;  %v1475_v8 = vmul.bf16 %v4820_v45, %v858_v22  ;;  %v290_v22 = vld [vmem:[#allocation5 + $0xb0] sm:$0xff] }
 0x1da   :  { %2120 = vmatpush1.bf16.msra.mxu0 %v1410_v40  ;;  %2161 = vmatpush1.bf16.msra.mxu1 %v1538_v49  ;;  %v1499_v40 = vmul.bf16 %v4820_v45, %v882_v30  ;;  %v1009_v49 = vunpack.c.l.s8.bf16 %v512_v24  ;;  %v1483_v41 = vmul.bf16 %v4820_v45, %v866_v7  ;;  %v986_v24 = vunpack.c.h.s8.bf16 %v497_v15  ;;  %v362_v7 = vld [vmem:[#allocation5 + $0x2f0] sm:$0xff] }
 0x1db   :  { %2121 = vmatprep.subr.bf16.mxu0 %v1403_v53  ;;  %2162 = vmatprep.subr.bf16.mxu1 %v1531_v54  ;;  %v874_v53 = vunpack.c.h.s8.bf16 %v441_v34  ;;  %v1002_v54 = vunpack.c.h.s8.bf16 %v505_v37  ;;  %v978_v37 = vunpack.c.l.s8.bf16 %v497_v15 }
 0x1dc   :  { %v1603_v34 = vmul.bf16 %v4820_v45, %v986_v24 }
 0x1de   :  { %2122 = vmatpush1.bf16.msra.mxu0 %v1402_v62  ;;  %2163 = vmatpush1.bf16.msra.mxu1 %v1530_v6  ;;  %v1626_v62 = vmul.bf16 %v4827_v59, %v1009_v49  ;;  %v1001_v6 = vunpack.c.h.s8.bf16 %v504_v46 }
 0x1df   :  { %2123 = vmatprep.subr.bf16.mxu0 %v1523_v11  ;;  %2164 = vmatprep.subr.bf16.mxu1 %v1651_v12  ;;  %v1491_v11 = vmul.bf16 %v4820_v45, %v874_v53  ;;  %v1619_v12 = vmul.bf16 %v4820_v45, %v1002_v54  ;;  %v1129_v54 = vpack.i.b16 %v1084_v33, %v1084_v33  ;;  %v571_v33 = vunpack.c.h.s8.bf16 %v290_v22 }
 0x1e2   :  { %2124 = vmatpush2.bf16.msra.mxu0 %v1522_v17  ;;  %2165 = vmatpush2.bf16.msra.mxu1 %v1650_v18  ;;  %v865_v17 = vunpack.c.l.s8.bf16 %v440_v52  ;;  %v1618_v18 = vmul.bf16 %v4827_v59, %v1001_v6  ;;  %v298_v6 = vld [vmem:[#allocation5 + $0xf0] sm:$0xff] }
 0x1e3   :  { %2125 = vmatprep.subr.bf16.mxu0 %v1515_v47  ;;  %2166 = vmatprep.subr.bf16.mxu1 %v1643_v19  ;;  %v993_v47 = vunpack.c.l.s8.bf16 %v504_v46  ;;  %v432_v19 = vld [vmem:[#allocation5 + $0x520] sm:$0xff]  ;;  %v1595_v46 = vmul.bf16 %v4820_v45, %v978_v37  ;;  %v587_v14 = vunpack.c.h.s8.bf16 %v298_v6  ;;  %v579_v25 = vunpack.c.l.s8.bf16 %v298_v6 }
 0x1e4   :  { %v1482_v28 = vmul.bf16 %v4827_v59, %v865_v17  ;;  %v857_v29 = vunpack.c.h.s8.bf16 %v432_v19  ;;  %v849_v49 = vunpack.c.l.s8.bf16 %v432_v19 }
 0x1e5   :  { %v1610_v30 = vmul.bf16 %v4827_v59, %v993_v47  ;;  %v1668_v47 = vrot.slane %v4824_v56, %v4637_v10 }
 0x1e6   :  { %2126 = vmatpush2.bf16.msra.mxu0 %v1514_v26  ;;  %2167 = vmatpush2.bf16.msra.mxu1 %v1642_v27  ;;  %v496_v26 = vld [vmem:[#allocation5 + $0x720] sm:$0xff]  ;;  %v1085_v27 = vpack.c.bf16 %v1069_v13, %v1069_v13  ;;  %v4991_v13 = vrot.slane %v1129_v54, %v4452_v3 }
 0x1e7   :  { %2127 = vmatprep.subr.bf16.mxu0 %v1507_v31  ;;  %2168 = vmatprep.subr.bf16.mxu1 %v1635_v32  ;;  %v985_v31 = vunpack.c.h.s8.bf16 %v496_v26  ;;  %v850_v32 = vunpack.c.l.s8.bf16 %v433_v23  ;;  %v977_v53 = vunpack.c.l.s8.bf16 %v496_v26  ;;  %v715_v23 = vunpack.c.h.s8.bf16 %v362_v7 }
 0x1e8   :  { %v1136_v36 = vpack.i.b16 %v1085_v27, %v1085_v27 }
 0x1e9   :  { %v1602_v52 = vmul.bf16 %v4827_v59, %v985_v31  ;;  %v1332_v19 = vmul.bf16 %v4991_v13, %v715_v23 }
 0x1ea   :  { %2128 = vmatpush2.bf16.msra.mxu0 %v1506_v38  ;;  %2169 = vmatpush2.bf16.msra.mxu1 %v1634_v39  ;;  %v299_v38 = vld [vmem:[#allocation5 + $0xf8] sm:$0xff]  ;;  %v4986_v5 = vrot.slane %v1136_v36, %v4452_v3 }
 0x1eb   :  { %2129 = vmatprep.subr.bf16.mxu0 %v1499_v40  ;;  %2170 = vmatprep.subr.bf16.mxu1 %v1627_v50  ;;  %v363_v39 = vld [vmem:[#allocation5 + $0x2f8] sm:$0xff]  ;;  %v1474_v40 = vmul.bf16 %v4827_v59, %v857_v29  ;;  %v1467_v50 = vmul.bf16 %v4820_v45, %v850_v32  ;;  %v354_v29 = vld [vmem:[#allocation5 + $0x2b0] sm:$0xff] }
 0x1ec   :  { %v708_v17 = vunpack.c.l.s8.bf16 %v363_v39  ;;  %v699_v36 = vunpack.c.h.s8.bf16 %v354_v29  ;;  %v691_v23 = vunpack.c.l.s8.bf16 %v354_v29 }
 0x1ee   :  { %2130 = vmatpush2.bf16.msra.mxu0 %v1498_v57  ;;  %2171 = vmatpush2.bf16.msra.mxu1 %v1626_v62  ;;  %v588_v57 = vunpack.c.h.s8.bf16 %v299_v38  ;;  %v716_v62 = vunpack.c.h.s8.bf16 %v363_v39  ;;  %v1325_v26 = vmul.bf16 %v4986_v5, %v708_v17 }
 0x1ef   :  { %2131 = vmatprep.subr.bf16.mxu0 %v1491_v11  ;;  %2172 = vmatprep.subr.bf16.mxu1 %v1619_v12  ;;  %v1466_v11 = vmul.bf16 %v4827_v59, %v849_v49  ;;  %v1594_v12 = vmul.bf16 %v4827_v59, %v977_v53  ;;  %v1204_v59 = vmul.bf16 %v4991_v13, %v587_v14  ;;  %v563_v14 = vunpack.c.l.s8.bf16 %v290_v22 }
 0x1f0   :  { %v1205_v45 = vmul.bf16 %v4986_v5, %v588_v57  ;;  %v1333_v15 = vmul.bf16 %v4986_v5, %v716_v62  ;;  %v347_v57 = vld [vmem:[#allocation5 + $0x278] sm:$0xff] }
 0x1f1   :  { %v684_v17 = vunpack.c.h.s8.bf16 %v347_v57 }
 0x1f2   :  { %2132 = vmatpush2.bf16.msra.mxu0 %v1490_v16  ;;  %2173 = vmatpush2.bf16.msra.mxu1 %v1618_v18  ;;  %v580_v16 = vunpack.c.l.s8.bf16 %v299_v38  ;;  %v291_v18 = vld [vmem:[#allocation5 + $0xb8] sm:$0xff] }
 0x1f3   :  { %2133 = vmatprep.subr.bf16.mxu0 %v1483_v41  ;;  %2174 = vmatprep.subr.bf16.mxu1 %v1611_v21  ;;  %v355_v41 = vld [vmem:[#allocation5 + $0x2b8] sm:$0xff]  ;;  %v707_v21 = vunpack.c.l.s8.bf16 %v362_v7  ;;  %v572_v27 = vunpack.c.h.s8.bf16 %v291_v18  ;;  %v1188_v7 = vmul.bf16 %v4991_v13, %v571_v33  ;;  %v1301_v22 = vmul.bf16 %v4986_v5, %v684_v17  ;;  %v394_v17 = vld [vmem:[#allocation5 + $0x3f0] sm:$0xff] }
 0x1f4   :  { %v1197_v24 = vmul.bf16 %v4986_v5, %v580_v16 }
 0x1f5   :  { %v1324_v37 = vmul.bf16 %v4991_v13, %v707_v21 }
 0x1f6   :  { %2134 = vmatpush2.bf16.msra.mxu0 %v1482_v28  ;;  %2175 = vmatpush2.bf16.msra.mxu1 %v1610_v30  ;;  %v700_v28 = vunpack.c.h.s8.bf16 %v355_v41  ;;  %v5001_v30 = vld [vmem:[#allocation7 + $0x1] ss:$2 sm:$0xff] }
 0x1f7   :  { %2135 = vmatprep.subr.bf16.mxu0 %v1475_v8  ;;  %2176 = vmatprep.subr.bf16.mxu1 %v1603_v34  ;;  %v1672_v56 = vrot.slane %v5001_v30, %v4630_v20  ;;  %v1196_v34 = vmul.bf16 %v4991_v13, %v579_v25 }
 0x1f8   :  { %v1317_v49 = vmul.bf16 %v4986_v5, %v700_v28  ;;  %v339_v28 = vld [vmem:[#allocation5 + $0x238] sm:$0xff] }
 0x1fa   :  { %2136 = vmatpush2.bf16.msra.mxu0 %v1474_v40  ;;  %2177 = vmatpush2.bf16.msra.mxu1 %v1602_v52  ;;  %v1189_v40 = vmul.bf16 %v4986_v5, %v572_v27  ;;  %v564_v52 = vunpack.c.l.s8.bf16 %v291_v18  ;;  %v282_v18 = vld [vmem:[#allocation5 + $0x70] sm:$0xff]  ;;  %v275_v27 = vld [vmem:[#allocation5 + $0x38] sm:$0xff] }
 0x1fb   :  { %2137 = vmatprep.subr.bf16.mxu0 %v1467_v50  ;;  %2178 = vmatprep.subr.bf16.mxu1 %v1595_v46  ;;  %v692_v50 = vunpack.c.l.s8.bf16 %v355_v41  ;;  %v283_v46 = vld [vmem:[#allocation5 + $0x78] sm:$0xff]  ;;  %v346_v41 = vld [vmem:[#allocation5 + $0x270] sm:$0xff] }
 0x1fc   :  { %v556_v16 = vunpack.c.h.s8.bf16 %v283_v46  ;;  %v683_v25 = vunpack.c.h.s8.bf16 %v346_v41 }
 0x1fe   :  { %2138 = vmatpush2.bf16.msra.mxu0 %v1466_v11  ;;  %2179 = vmatpush2.bf16.msra.mxu1 %v1594_v12  ;;  %v1316_v12 = vmul.bf16 %v4991_v13, %v699_v36  ;;  %v1173_v21 = vmul.bf16 %v4986_v5, %v556_v16  ;;  %v274_v36 = vld [vmem:[#allocation5 + $0x30] sm:$0xff] }
 0x1ff   :  { %2189 = vmatprep.subr.bf16.mxu0 %v1205_v45  ;;  %2230 = vmatprep.subr.bf16.mxu1 %v1333_v15  ;;  %v330_v16 = vld [vmem:[#allocation5 + $0x1f0] sm:$0xff] }
 0x201   :  { %v1895_v31 = vpop.f32.mrf.mxu0  ;;  %v1936_v32 = vpop.f32.mrf.mxu1  ;;  %2140 = vmatmul.mubr.bf16.vlgmr.msra.gmra.mxu0 %v4673_v48  ;;  %2181 = vmatmul.mubr.bf16.vlgmr.msra.gmra.mxu1 %v4675_v42 }
 0x202   :  { %v1896_v8 = vadd.f32 %v1895_v31, %v1668_v47  ;;  %2190 = vmatpush1.bf16.msra.mxu0 %v1204_v59  ;;  %2231 = vmatpush1.bf16.msra.mxu1 %v1332_v19  ;;  %v1180_v47 = vmul.bf16 %v4991_v13, %v563_v14  ;;  %v1308_v59 = vmul.bf16 %v4991_v13, %v691_v23  ;;  %v555_v19 = vunpack.c.h.s8.bf16 %v282_v18 }
 0x203   :  { %v1897_v38 = vpop.f32.mrf.mxu0  ;;  %v1938_v39 = vpop.f32.mrf.mxu1  ;;  %2191 = vmatprep.subr.bf16.mxu0 %v1197_v24  ;;  %2232 = vmatprep.subr.bf16.mxu1 %v1325_v26  ;;  %v548_v24 = vunpack.c.l.s8.bf16 %v283_v46  ;;  %v676_v26 = vunpack.c.l.s8.bf16 %v347_v57  ;;  %v547_v31 = vunpack.c.l.s8.bf16 %v282_v18  ;;  %v532_v46 = vunpack.c.l.s8.bf16 %v275_v27 }
 0x204   :  { %v5011_v53 = vadd.f32 %v1936_v32, %v1896_v8  ;;  %v1898_v54 = vadd.f32 %v1897_v38, %v1672_v56  ;;  %2221 = vmatprep.mubr.bf16.mxu0 %v4519_v63  ;;  %2262 = vmatprep.mubr.bf16.mxu1 %v4521_v0  ;;  %v1181_v63 = vmul.bf16 %v4986_v5, %v564_v52  ;;  %v675_v32 = vunpack.c.l.s8.bf16 %v346_v41  ;;  %v338_v38 = vld [vmem:[#allocation5 + $0x230] sm:$0xff] }
 0x205   :  { %v1899_v62 = vpop.f32.mrf.mxu0  ;;  %v1940_v6 = vpop.f32.mrf.mxu1  ;;  %v1309_v0 = vmul.bf16 %v4986_v5, %v692_v50  ;;  %v1172_v29 = vmul.bf16 %v4991_v13, %v555_v19  ;;  %v1300_v56 = vmul.bf16 %v4991_v13, %v683_v25  ;;  %v1165_v33 = vmul.bf16 %v4986_v5, %v548_v24  ;;  %v323_v24 = vld [vmem:[#allocation5 + $0x1b8] sm:$0xff] }
 0x206   :  { %v5016_v11 = vadd.f32 %v1938_v39, %v1898_v54  ;;  %2192 = vmatpush1.bf16.msra.mxu0 %v1196_v34  ;;  %2233 = vmatpush1.bf16.msra.mxu1 %v1324_v37  ;;  %v1293_v8 = vmul.bf16 %v4986_v5, %v676_v26  ;;  %v540_v34 = vunpack.c.h.s8.bf16 %v275_v27  ;;  %v668_v37 = vunpack.c.h.s8.bf16 %v339_v28  ;;  %v331_v62 = vld [vmem:[#allocation5 + $0x1f8] sm:$0xff] }
 0x207   :  { %v1900_v45 = vpop.f32.mrf.mxu0  ;;  %v1941_v15 = vpop.f32.mrf.mxu1  ;;  %2193 = vmatprep.subr.bf16.mxu0 %v1189_v40  ;;  %2234 = vmatprep.subr.bf16.mxu1 %v1317_v49  ;;  %v1164_v39 = vmul.bf16 %v4991_v13, %v547_v31  ;;  %v1292_v40 = vmul.bf16 %v4991_v13, %v675_v32  ;;  %v539_v49 = vunpack.c.h.s8.bf16 %v274_v36  ;;  %v667_v52 = vunpack.c.h.s8.bf16 %v338_v38  ;;  %v395_v6 = vld [vmem:[#allocation5 + $0x3f8] sm:$0xff] }
 0x208   :  { %v1157_v50 = vmul.bf16 %v4986_v5, %v540_v34  ;;  %v1285_v54 = vmul.bf16 %v4986_v5, %v668_v37  ;;  %v660_v57 = vunpack.c.l.s8.bf16 %v339_v28  ;;  %v531_v14 = vunpack.c.l.s8.bf16 %v274_v36  ;;  %v387_v26 = vld [vmem:[#allocation5 + $0x3b8] sm:$0xff]  ;;  %v322_v34 = vld [vmem:[#allocation5 + $0x1b0] sm:$0xff] }
 0x209   :  { %v659_v23 = vunpack.c.l.s8.bf16 %v338_v38  ;;  %v1149_v45 = vmul.bf16 %v4986_v5, %v532_v46  ;;  %v386_v37 = vld [vmem:[#allocation5 + $0x3b0] sm:$0xff]  ;;  %v315_v46 = vld [vmem:[#allocation5 + $0x178] sm:$0xff] }
 0x20a   :  { %2194 = vmatpush1.bf16.msra.mxu0 %v1188_v7  ;;  %2235 = vmatpush1.bf16.msra.mxu1 %v1316_v12  ;;  %v1156_v7 = vmul.bf16 %v4991_v13, %v539_v49  ;;  %v1284_v12 = vmul.bf16 %v4991_v13, %v667_v52  ;;  %v1277_v15 = vmul.bf16 %v4986_v5, %v660_v57  ;;  %v379_v57 = vld [vmem:[#allocation5 + $0x378] sm:$0xff] }
 0x20b   :  { %2195 = vmatprep.subr.bf16.mxu0 %v1181_v63  ;;  %2236 = vmatprep.subr.bf16.mxu1 %v1309_v0  ;;  %v652_v63 = vunpack.c.h.s8.bf16 %v331_v62  ;;  %v780_v0 = vunpack.c.h.s8.bf16 %v395_v6  ;;  %v1148_v18 = vmul.bf16 %v4991_v13, %v531_v14  ;;  %v1276_v41 = vmul.bf16 %v4991_v13, %v659_v23 }
 0x20d   :  { %v1269_v19 = vmul.bf16 %v4986_v5, %v652_v63  ;;  %v1397_v25 = vmul.bf16 %v4986_v5, %v780_v0  ;;  %v314_v63 = vld [vmem:[#allocation5 + $0x170] sm:$0xff] }
 0x20e   :  { %2196 = vmatpush1.bf16.msra.mxu0 %v1180_v47  ;;  %2237 = vmatpush1.bf16.msra.mxu1 %v1308_v59  ;;  %v651_v47 = vunpack.c.h.s8.bf16 %v330_v16  ;;  %v779_v59 = vunpack.c.h.s8.bf16 %v394_v17  ;;  %v378_v0 = vld [vmem:[#allocation5 + $0x370] sm:$0xff] }
 0x20f   :  { %2197 = vmatprep.subr.bf16.mxu0 %v1173_v21  ;;  %2238 = vmatprep.subr.bf16.mxu1 %v1301_v22  ;;  %v644_v21 = vunpack.c.l.s8.bf16 %v331_v62  ;;  %v772_v22 = vunpack.c.l.s8.bf16 %v395_v6 }
 0x210   :  { %v1268_v27 = vmul.bf16 %v4991_v13, %v651_v47  ;;  %v1396_v28 = vmul.bf16 %v4991_v13, %v779_v59 }
 0x211   :  { %v1261_v31 = vmul.bf16 %v4986_v5, %v644_v21  ;;  %v1389_v32 = vmul.bf16 %v4986_v5, %v772_v22  ;;  %v307_v21 = vld [vmem:[#allocation5 + $0x138] sm:$0xff] }
 0x212   :  { %2198 = vmatpush1.bf16.msra.mxu0 %v1172_v29  ;;  %2239 = vmatpush1.bf16.msra.mxu1 %v1300_v56  ;;  %v643_v29 = vunpack.c.l.s8.bf16 %v330_v16  ;;  %v771_v56 = vunpack.c.l.s8.bf16 %v394_v17  ;;  %v371_v22 = vld [vmem:[#allocation5 + $0x338] sm:$0xff] }
 0x213   :  { %2199 = vmatprep.subr.bf16.mxu0 %v1165_v33  ;;  %2240 = vmatprep.subr.bf16.mxu1 %v1293_v8  ;;  %v636_v33 = vunpack.c.h.s8.bf16 %v323_v24  ;;  %v764_v8 = vunpack.c.h.s8.bf16 %v387_v26 }
 0x214   :  { %v1260_v36 = vmul.bf16 %v4991_v13, %v643_v29  ;;  %v1388_v38 = vmul.bf16 %v4991_v13, %v771_v56 }
 0x215   :  { %v1253_v49 = vmul.bf16 %v4986_v5, %v636_v33  ;;  %v1381_v52 = vmul.bf16 %v4986_v5, %v764_v8  ;;  %v306_v33 = vld [vmem:[#allocation5 + $0x130] sm:$0xff] }
 0x216   :  { %2200 = vmatpush1.bf16.msra.mxu0 %v1164_v39  ;;  %2241 = vmatpush1.bf16.msra.mxu1 %v1292_v40  ;;  %v635_v39 = vunpack.c.h.s8.bf16 %v322_v34  ;;  %v763_v40 = vunpack.c.h.s8.bf16 %v386_v37  ;;  %v370_v8 = vld [vmem:[#allocation5 + $0x330] sm:$0xff] }
 0x217   :  { %2201 = vmatprep.subr.bf16.mxu0 %v1157_v50  ;;  %2242 = vmatprep.subr.bf16.mxu1 %v1285_v54  ;;  %v628_v50 = vunpack.c.l.s8.bf16 %v323_v24  ;;  %v756_v54 = vunpack.c.l.s8.bf16 %v387_v26 }
 0x218   :  { %v1252_v62 = vmul.bf16 %v4991_v13, %v635_v39  ;;  %v1380_v6 = vmul.bf16 %v4991_v13, %v763_v40 }
 0x219   :  { %v1245_v14 = vmul.bf16 %v4986_v5, %v628_v50  ;;  %v1373_v23 = vmul.bf16 %v4986_v5, %v756_v54  ;;  %v427_v50 = vld [vmem:[#allocation5 + $0x4f8] sm:$0xff] }
 0x21a   :  { %2202 = vmatpush1.bf16.msra.mxu0 %v1156_v7  ;;  %2243 = vmatpush1.bf16.msra.mxu1 %v1284_v12  ;;  %v627_v7 = vunpack.c.l.s8.bf16 %v322_v34  ;;  %v755_v12 = vunpack.c.l.s8.bf16 %v386_v37  ;;  %v491_v54 = vld [vmem:[#allocation5 + $0x6f8] sm:$0xff] }
 0x21b   :  { %2203 = vmatprep.subr.bf16.mxu0 %v1149_v45  ;;  %2244 = vmatprep.subr.bf16.mxu1 %v1277_v15  ;;  %v620_v45 = vunpack.c.h.s8.bf16 %v315_v46  ;;  %v748_v15 = vunpack.c.h.s8.bf16 %v379_v57 }
 0x21c   :  { %v1244_v16 = vmul.bf16 %v4991_v13, %v627_v7  ;;  %v1372_v17 = vmul.bf16 %v4991_v13, %v755_v12 }
 0x21d   :  { %v1237_v47 = vmul.bf16 %v4986_v5, %v620_v45  ;;  %v1365_v59 = vmul.bf16 %v4986_v5, %v748_v15  ;;  %v426_v45 = vld [vmem:[#allocation5 + $0x4f0] sm:$0xff] }
 0x21e   :  { %2204 = vmatpush1.bf16.msra.mxu0 %v1148_v18  ;;  %2245 = vmatpush1.bf16.msra.mxu1 %v1276_v41  ;;  %v619_v18 = vunpack.c.h.s8.bf16 %v314_v63  ;;  %v747_v41 = vunpack.c.h.s8.bf16 %v378_v0  ;;  %v490_v15 = vld [vmem:[#allocation5 + $0x6f0] sm:$0xff] }
 0x21f   :  { %2205 = vmatprep.subr.bf16.mxu0 %v1269_v19  ;;  %2246 = vmatprep.subr.bf16.mxu1 %v1397_v25  ;;  %v612_v19 = vunpack.c.l.s8.bf16 %v315_v46  ;;  %v740_v25 = vunpack.c.l.s8.bf16 %v379_v57 }
 0x220   :  { %v1236_v24 = vmul.bf16 %v4991_v13, %v619_v18  ;;  %v1364_v26 = vmul.bf16 %v4991_v13, %v747_v41 }
 0x221   :  { %v1229_v29 = vmul.bf16 %v4986_v5, %v612_v19  ;;  %v1357_v56 = vmul.bf16 %v4986_v5, %v740_v25  ;;  %v419_v19 = vld [vmem:[#allocation5 + $0x4b8] sm:$0xff] }
 0x222   :  { %2206 = vmatpush2.bf16.msra.mxu0 %v1268_v27  ;;  %2247 = vmatpush2.bf16.msra.mxu1 %v1396_v28  ;;  %v611_v27 = vunpack.c.l.s8.bf16 %v314_v63  ;;  %v739_v28 = vunpack.c.l.s8.bf16 %v378_v0  ;;  %v483_v25 = vld [vmem:[#allocation5 + $0x6b8] sm:$0xff] }
 0x223   :  { %2207 = vmatprep.subr.bf16.mxu0 %v1261_v31  ;;  %2248 = vmatprep.subr.bf16.mxu1 %v1389_v32  ;;  %v604_v31 = vunpack.c.h.s8.bf16 %v307_v21  ;;  %v732_v32 = vunpack.c.h.s8.bf16 %v371_v22 }
 0x224   :  { %v1228_v34 = vmul.bf16 %v4991_v13, %v611_v27  ;;  %v1356_v37 = vmul.bf16 %v4991_v13, %v739_v28 }
 0x225   :  { %v1221_v39 = vmul.bf16 %v4986_v5, %v604_v31  ;;  %v1349_v40 = vmul.bf16 %v4986_v5, %v732_v32  ;;  %v418_v31 = vld [vmem:[#allocation5 + $0x4b0] sm:$0xff] }
 0x226   :  { %2208 = vmatpush2.bf16.msra.mxu0 %v1260_v36  ;;  %2249 = vmatpush2.bf16.msra.mxu1 %v1388_v38  ;;  %v603_v36 = vunpack.c.h.s8.bf16 %v306_v33  ;;  %v731_v38 = vunpack.c.h.s8.bf16 %v370_v8  ;;  %v482_v32 = vld [vmem:[#allocation5 + $0x6b0] sm:$0xff] }
 0x227   :  { %2209 = vmatprep.subr.bf16.mxu0 %v1253_v49  ;;  %2250 = vmatprep.subr.bf16.mxu1 %v1381_v52  ;;  %v596_v49 = vunpack.c.l.s8.bf16 %v307_v21  ;;  %v724_v52 = vunpack.c.l.s8.bf16 %v371_v22  ;;  %v835_v21 = vunpack.c.l.s8.bf16 %v426_v45 }
 0x228   :  { %v1220_v46 = vmul.bf16 %v4991_v13, %v603_v36  ;;  %v1348_v57 = vmul.bf16 %v4991_v13, %v731_v38  ;;  %v827_v38 = vunpack.c.h.s8.bf16 %v418_v31 }
 0x229   :  { %v1213_v7 = vmul.bf16 %v4986_v5, %v596_v49  ;;  %v1341_v12 = vmul.bf16 %v4986_v5, %v724_v52  ;;  %v820_v52 = vunpack.c.l.s8.bf16 %v419_v19 }
 0x22a   :  { %2210 = vmatpush2.bf16.msra.mxu0 %v1252_v62  ;;  %2251 = vmatpush2.bf16.msra.mxu1 %v1380_v6  ;;  %v595_v62 = vunpack.c.l.s8.bf16 %v306_v33  ;;  %v723_v6 = vunpack.c.l.s8.bf16 %v370_v8 }
 0x22b   :  { %2211 = vmatprep.subr.bf16.mxu0 %v1245_v14  ;;  %2252 = vmatprep.subr.bf16.mxu1 %v1373_v23  ;;  %v844_v14 = vunpack.c.h.s8.bf16 %v427_v50  ;;  %v972_v23 = vunpack.c.h.s8.bf16 %v491_v54 }
 0x22c   :  { %v1212_v63 = vmul.bf16 %v4991_v13, %v595_v62  ;;  %v1340_v0 = vmul.bf16 %v4991_v13, %v723_v6  ;;  %v1444_v6 = vmul.bf16 %v4991_v13, %v827_v38 }
 0x22d   :  { %v1461_v18 = vmul.bf16 %v4986_v5, %v844_v14  ;;  %v1589_v41 = vmul.bf16 %v4986_v5, %v972_v23  ;;  %v947_v14 = vunpack.c.l.s8.bf16 %v482_v32 }
 0x22e   :  { %2212 = vmatpush2.bf16.msra.mxu0 %v1244_v16  ;;  %2253 = vmatpush2.bf16.msra.mxu1 %v1372_v17  ;;  %v843_v16 = vunpack.c.h.s8.bf16 %v426_v45  ;;  %v971_v17 = vunpack.c.h.s8.bf16 %v490_v15 }
 0x22f   :  { %2213 = vmatprep.subr.bf16.mxu0 %v1237_v47  ;;  %2254 = vmatprep.subr.bf16.mxu1 %v1365_v59  ;;  %v836_v47 = vunpack.c.l.s8.bf16 %v427_v50  ;;  %v964_v59 = vunpack.c.l.s8.bf16 %v491_v54  ;;  %v948_v50 = vunpack.c.l.s8.bf16 %v483_v25 }
 0x230   :  { %v1460_v22 = vmul.bf16 %v4991_v13, %v843_v16  ;;  %v474_v16 = vld [vmem:[#allocation5 + $0x670] sm:$0xff] }
 0x231   :  { %v1453_v27 = vmul.bf16 %v4986_v5, %v836_v47  ;;  %v1581_v28 = vmul.bf16 %v4986_v5, %v964_v59  ;;  %v939_v47 = vunpack.c.h.s8.bf16 %v474_v16 }
 0x232   :  { %2214 = vmatpush2.bf16.msra.mxu0 %v1236_v24  ;;  %2255 = vmatpush2.bf16.msra.mxu1 %v1364_v26  ;;  %v1588_v24 = vmul.bf16 %v4991_v13, %v971_v17  ;;  %v963_v26 = vunpack.c.l.s8.bf16 %v490_v15  ;;  %v1437_v15 = vmul.bf16 %v4986_v5, %v820_v52 }
 0x233   :  { %2215 = vmatprep.subr.bf16.mxu0 %v1229_v29  ;;  %2256 = vmatprep.subr.bf16.mxu1 %v1357_v56  ;;  %v828_v29 = vunpack.c.h.s8.bf16 %v419_v19  ;;  %v956_v56 = vunpack.c.h.s8.bf16 %v483_v25 }
 0x234   :  { %v1580_v36 = vmul.bf16 %v4991_v13, %v963_v26 }
 0x236   :  { %2216 = vmatpush2.bf16.msra.mxu0 %v1228_v34  ;;  %2257 = vmatpush2.bf16.msra.mxu1 %v1356_v37  ;;  %v1452_v34 = vmul.bf16 %v4991_v13, %v835_v21 }
 0x237   :  { %2217 = vmatprep.subr.bf16.mxu0 %v1221_v39  ;;  %2258 = vmatprep.subr.bf16.mxu1 %v1349_v40  ;;  %v955_v39 = vunpack.c.h.s8.bf16 %v482_v32 }
 0x23a   :  { %2218 = vmatpush2.bf16.msra.mxu0 %v1220_v46  ;;  %2259 = vmatpush2.bf16.msra.mxu1 %v1348_v57  ;;  %v475_v46 = vld [vmem:[#allocation5 + $0x678] sm:$0xff] }
 0x23b   :  { %2219 = vmatprep.subr.bf16.mxu0 %v1213_v7  ;;  %2260 = vmatprep.subr.bf16.mxu1 %v1341_v12  ;;  %v1572_v7 = vmul.bf16 %v4991_v13, %v955_v39  ;;  %v819_v12 = vunpack.c.l.s8.bf16 %v418_v31  ;;  %v932_v21 = vunpack.c.l.s8.bf16 %v475_v46 }
 0x23d   :  { %v1436_v17 = vmul.bf16 %v4991_v13, %v819_v12  ;;  %v1549_v31 = vmul.bf16 %v4986_v5, %v932_v21 }
 0x23e   :  { %2220 = vmatpush2.bf16.msra.mxu0 %v1212_v63  ;;  %2261 = vmatpush2.bf16.msra.mxu1 %v1340_v0  ;;  %v410_v0 = vld [vmem:[#allocation5 + $0x470] sm:$0xff] }
 0x23f   :  { %2271 = vmatprep.subr.bf16.mxu0 %v1461_v18  ;;  %2312 = vmatprep.subr.bf16.mxu1 %v1589_v41  ;;  %v1564_v18 = vmul.bf16 %v4991_v13, %v947_v14  ;;  %v811_v41 = vunpack.c.h.s8.bf16 %v410_v0 }
 0x241   :  { %v1977_v33 = vpop.f32.mrf.mxu0  ;;  %v2018_v8 = vpop.f32.mrf.mxu1  ;;  %2222 = vmatmul.mubr.bf16.vlgmr.msra.gmra.mxu0 %v4573_v43  ;;  %2263 = vmatmul.mubr.bf16.vlgmr.msra.gmra.mxu1 %v4575_v44  ;;  %v1445_v43 = vmul.bf16 %v4986_v5, %v828_v29  ;;  %v1573_v44 = vmul.bf16 %v4986_v5, %v956_v56  ;;  %v1428_v26 = vmul.bf16 %v4991_v13, %v811_v41  ;;  %v931_v29 = vunpack.c.l.s8.bf16 %v474_v16 }
 0x242   :  { %v1978_v37 = vadd.f32 %v1977_v33, %v5011_v53  ;;  %2272 = vmatpush1.bf16.msra.mxu0 %v1460_v22  ;;  %2313 = vmatpush1.bf16.msra.mxu1 %v1588_v24  ;;  %v411_v53 = vld [vmem:[#allocation5 + $0x478] sm:$0xff] }
 0x243   :  { %v5082_v40 = vpop.f32.mrf.mxu0  ;;  %v5084_v49 = vpop.f32.mrf.mxu1  ;;  %2273 = vmatprep.subr.bf16.mxu0 %v1453_v27  ;;  %2314 = vmatprep.subr.bf16.mxu1 %v1581_v28  ;;  %v812_v63 = vunpack.c.h.s8.bf16 %v411_v53  ;;  %v804_v25 = vunpack.c.l.s8.bf16 %v411_v53  ;;  %v403_v22 = vld [vmem:[#allocation5 + $0x438] sm:$0xff]  ;;  %v1556_v27 = vmul.bf16 %v4991_v13, %v939_v47  ;;  %v803_v28 = vunpack.c.l.s8.bf16 %v410_v0 }
 0x244   :  { %v5088_v54 = vadd.f32 %v2018_v8, %v1978_v37  ;;  %2303 = vmatprep.mubr.bf16.mxu0 %v4585_v60  ;;  %2344 = vmatprep.mubr.bf16.mxu1 %v4587_v61  ;;  %v1565_v60 = vmul.bf16 %v4986_v5, %v948_v50  ;;  %v940_v61 = vunpack.c.h.s8.bf16 %v475_v46  ;;  %v467_v24 = vld [vmem:[#allocation5 + $0x638] sm:$0xff]  ;;  %v796_v32 = vunpack.c.h.s8.bf16 %v403_v22  ;;  %v402_v8 = vld [vmem:[#allocation5 + $0x430] sm:$0xff] }
 0x245   :  { %v1981_v57 = vpop.f32.mrf.mxu0  ;;  %v2022_v62 = vpop.f32.mrf.mxu1  ;;  %v1429_v59 = vmul.bf16 %v4986_v5, %v812_v63  ;;  %v1421_v56 = vmul.bf16 %v4986_v5, %v804_v25  ;;  %v924_v33 = vunpack.c.h.s8.bf16 %v467_v24  ;;  %v1420_v37 = vmul.bf16 %v4991_v13, %v803_v28  ;;  %v459_v53 = vld [vmem:[#allocation5 + $0x5f8] sm:$0xff] }
 0x246   :  { %2274 = vmatpush1.bf16.msra.mxu0 %v1452_v34  ;;  %2315 = vmatpush1.bf16.msra.mxu1 %v1580_v36  ;;  %v1557_v19 = vmul.bf16 %v4986_v5, %v940_v61  ;;  %v466_v34 = vld [vmem:[#allocation5 + $0x630] sm:$0xff]  ;;  %v1548_v36 = vmul.bf16 %v4991_v13, %v931_v29  ;;  %v795_v38 = vunpack.c.h.s8.bf16 %v402_v8  ;;  %v788_v52 = vunpack.c.l.s8.bf16 %v403_v22  ;;  %v523_v46 = vld [vmem:[#allocation5 + $0x7f8] sm:$0xff] }
 0x247   :  { %v1982_v23 = vpop.f32.mrf.mxu0  ;;  %v2023_v45 = vpop.f32.mrf.mxu1  ;;  %2275 = vmatprep.subr.bf16.mxu0 %v1445_v43  ;;  %2316 = vmatprep.subr.bf16.mxu1 %v1573_v44  ;;  %v923_v39 = vunpack.c.h.s8.bf16 %v466_v34  ;;  %v1413_v43 = vmul.bf16 %v4986_v5, %v796_v32  ;;  %v1541_v44 = vmul.bf16 %v4986_v5, %v924_v33  ;;  %v916_v50 = vunpack.c.l.s8.bf16 %v467_v24 }
 0x248   :  { %v1412_v57 = vmul.bf16 %v4991_v13, %v795_v38  ;;  %v1405_v12 = vmul.bf16 %v4986_v5, %v788_v52  ;;  %v908_v23 = vunpack.c.h.s8.bf16 %v459_v53  ;;  %v1036_v45 = vunpack.c.h.s8.bf16 %v523_v46 }
 0x249   :  { %v1540_v62 = vmul.bf16 %v4991_v13, %v923_v39  ;;  %v1533_v14 = vmul.bf16 %v4986_v5, %v916_v50  ;;  %v900_v41 = vunpack.c.l.s8.bf16 %v459_v53  ;;  %v1028_v47 = vunpack.c.l.s8.bf16 %v523_v46 }
 0x24a   :  { %2276 = vmatpush1.bf16.msra.mxu0 %v1444_v6  ;;  %2317 = vmatpush1.bf16.msra.mxu1 %v1572_v7  ;;  %v787_v6 = vunpack.c.l.s8.bf16 %v402_v8  ;;  %v915_v7 = vunpack.c.l.s8.bf16 %v466_v34 }
 0x24b   :  { %2277 = vmatprep.subr.bf16.mxu0 %v1437_v15  ;;  %2318 = vmatprep.subr.bf16.mxu1 %v1565_v60  ;;  %v458_v15 = vld [vmem:[#allocation5 + $0x5f0] sm:$0xff] }
 0x24c   :  { %v522_v60 = vld [vmem:[#allocation5 + $0x7f0] sm:$0xff]  ;;  %v1404_v63 = vmul.bf16 %v4991_v13, %v787_v6  ;;  %v1532_v61 = vmul.bf16 %v4991_v13, %v915_v7  ;;  %v907_v0 = vunpack.c.h.s8.bf16 %v458_v15  ;;  %v899_v22 = vunpack.c.l.s8.bf16 %v458_v15 }
 0x24d   :  { %v1035_v16 = vunpack.c.h.s8.bf16 %v522_v60  ;;  %v1027_v24 = vunpack.c.l.s8.bf16 %v522_v60 }
 0x24e   :  { %2278 = vmatpush1.bf16.msra.mxu0 %v1436_v17  ;;  %2319 = vmatpush1.bf16.msra.mxu1 %v1564_v18  ;;  %v1525_v17 = vmul.bf16 %v4986_v5, %v908_v23  ;;  %v1653_v18 = vmul.bf16 %v4986_v5, %v1036_v45  ;;  %v1524_v25 = vmul.bf16 %v4991_v13, %v907_v0  ;;  %v5128_v23 = vld [vmem:[#allocation10] ss:$2 sm:$0xf] }
 0x24f   :  { %2279 = vmatprep.subr.bf16.mxu0 %v1429_v59  ;;  %2320 = vmatprep.subr.bf16.mxu1 %v1557_v19  ;;  %v451_v59 = vld [vmem:[#allocation5 + $0x5b8] sm:$0xff]  ;;  %v1652_v21 = vmul.bf16 %v4991_v13, %v1035_v16  ;;  %v1516_v32 = vmul.bf16 %v4991_v13, %v899_v22  ;;  %v1644_v33 = vmul.bf16 %v4991_v13, %v1027_v24  ;;  %v434_v24 = vld [vmem:[#allocation5 + $0x530] sm:$0xff] }
 0x250   :  { %v515_v19 = vld [vmem:[#allocation5 + $0x7b8] sm:$0xff]  ;;  %v892_v28 = vunpack.c.h.s8.bf16 %v451_v59  ;;  %v884_v38 = vunpack.c.l.s8.bf16 %v451_v59 }
 0x251   :  { %v1020_v29 = vunpack.c.h.s8.bf16 %v515_v19  ;;  %v1012_v39 = vunpack.c.l.s8.bf16 %v515_v19 }
 0x252   :  { %2280 = vmatpush1.bf16.msra.mxu0 %v1428_v26  ;;  %2321 = vmatpush1.bf16.msra.mxu1 %v1556_v27  ;;  %v1517_v26 = vmul.bf16 %v4986_v5, %v900_v41  ;;  %v1645_v27 = vmul.bf16 %v4986_v5, %v1028_v47  ;;  %v1501_v6 = vmul.bf16 %v4986_v5, %v884_v38  ;;  %v435_v41 = vld [vmem:[#allocation5 + $0x538] sm:$0xff] }
 0x253   :  { %2281 = vmatprep.subr.bf16.mxu0 %v1421_v56  ;;  %2322 = vmatprep.subr.bf16.mxu1 %v1549_v31  ;;  %v450_v56 = vld [vmem:[#allocation5 + $0x5b0] sm:$0xff]  ;;  %v1629_v7 = vmul.bf16 %v4986_v5, %v1012_v39  ;;  %v499_v47 = vld [vmem:[#allocation5 + $0x738] sm:$0xff] }
 0x254   :  { %v514_v31 = vld [vmem:[#allocation5 + $0x7b0] sm:$0xff]  ;;  %v891_v8 = vunpack.c.h.s8.bf16 %v450_v56  ;;  %v883_v53 = vunpack.c.l.s8.bf16 %v450_v56  ;;  %v988_v56 = vunpack.c.h.s8.bf16 %v499_v47 }
 0x255   :  { %v1019_v34 = vunpack.c.h.s8.bf16 %v514_v31  ;;  %v1011_v46 = vunpack.c.l.s8.bf16 %v514_v31 }
 0x256   :  { %2282 = vmatpush1.bf16.msra.mxu0 %v1420_v37  ;;  %2323 = vmatpush1.bf16.msra.mxu1 %v1548_v36  ;;  %v1509_v37 = vmul.bf16 %v4986_v5, %v892_v28  ;;  %v1637_v36 = vmul.bf16 %v4986_v5, %v1020_v29  ;;  %v1508_v52 = vmul.bf16 %v4991_v13, %v891_v8  ;;  %v860_v29 = vunpack.c.h.s8.bf16 %v435_v41 }
 0x257   :  { %2283 = vmatprep.subr.bf16.mxu0 %v1413_v43  ;;  %2324 = vmatprep.subr.bf16.mxu1 %v1541_v44  ;;  %v443_v43 = vld [vmem:[#allocation5 + $0x578] sm:$0xff]  ;;  %v1636_v50 = vmul.bf16 %v4991_v13, %v1019_v34  ;;  %v1500_v60 = vmul.bf16 %v4991_v13, %v883_v53  ;;  %v1605_v39 = vmul.bf16 %v4986_v5, %v988_v56 }
 0x258   :  { %v507_v44 = vld [vmem:[#allocation5 + $0x778] sm:$0xff]  ;;  %v1477_v38 = vmul.bf16 %v4986_v5, %v860_v29  ;;  %v1980_v53 = vadd.f32 %v5082_v40, %v5016_v11  ;;  %v2381_v40 = vld [vmem:[#allocation8 + $0x60] sm:$0xff] }
 0x25a   :  { %2284 = vmatpush1.bf16.msra.mxu0 %v1412_v57  ;;  %2325 = vmatpush1.bf16.msra.mxu1 %v1540_v62  ;;  %v442_v57 = vld [vmem:[#allocation5 + $0x570] sm:$0xff] }
 0x25b   :  { %2285 = vmatprep.subr.bf16.mxu0 %v1405_v12  ;;  %2326 = vmatprep.subr.bf16.mxu1 %v1533_v14  ;;  %v506_v62 = vld [vmem:[#allocation5 + $0x770] sm:$0xff]  ;;  %v876_v12 = vunpack.c.h.s8.bf16 %v443_v43  ;;  %v1004_v14 = vunpack.c.h.s8.bf16 %v507_v44  ;;  %v875_v45 = vunpack.c.h.s8.bf16 %v442_v57 }
 0x25c   :  { %v1003_v15 = vunpack.c.h.s8.bf16 %v506_v62  ;;  %v995_v22 = vunpack.c.l.s8.bf16 %v506_v62 }
 0x25d   :  { %v1493_v0 = vmul.bf16 %v4986_v5, %v876_v12  ;;  %v1621_v16 = vmul.bf16 %v4986_v5, %v1004_v14  ;;  %v1492_v59 = vmul.bf16 %v4991_v13, %v875_v45 }
 0x25e   :  { %2286 = vmatpush1.bf16.msra.mxu0 %v1404_v63  ;;  %2327 = vmatpush1.bf16.msra.mxu1 %v1532_v61  ;;  %v1628_v63 = vmul.bf16 %v4991_v13, %v1011_v46  ;;  %v868_v61 = vunpack.c.l.s8.bf16 %v443_v43  ;;  %v1620_v19 = vmul.bf16 %v4991_v13, %v1003_v15  ;;  %v1612_v34 = vmul.bf16 %v4991_v13, %v995_v22 }
 0x25f   :  { %2287 = vmatprep.subr.bf16.mxu0 %v1525_v17  ;;  %2328 = vmatprep.subr.bf16.mxu1 %v1653_v18  ;;  %v996_v17 = vunpack.c.l.s8.bf16 %v507_v44  ;;  %v2762_v18 = vrot.slane %v5128_v23, %v4449_v2  ;;  %v980_v43 = vunpack.c.l.s8.bf16 %v499_v47  ;;  %v2354_v47 = vmax.f32 %v4924_v4, 0.0 }
 0x261   :  { %v1613_v28 = vmul.bf16 %v4986_v5, %v996_v17  ;;  %v2776_v31 = vpack.c.bf16 %v2762_v18, %v2762_v18  ;;  %v1597_v14 = vmul.bf16 %v4986_v5, %v980_v43  ;;  %v5169_v29 = vpack.c.bf16 %v2354_v47, %v2354_v47 }
 0x262   :  { %2288 = vmatpush2.bf16.msra.mxu0 %v1524_v25  ;;  %2329 = vmatpush2.bf16.msra.mxu1 %v1652_v21  ;;  %v1485_v25 = vmul.bf16 %v4986_v5, %v868_v61  ;;  %v867_v21 = vunpack.c.l.s8.bf16 %v442_v57 }
 0x263   :  { %2289 = vmatprep.subr.bf16.mxu0 %v1517_v26  ;;  %2330 = vmatprep.subr.bf16.mxu1 %v1645_v27  ;;  %v498_v26 = vld [vmem:[#allocation5 + $0x730] sm:$0xff]  ;;  %v2758_v27 = vrot.slane %v5128_v23, %v4452_v3  ;;  %v2787_v44 = vpack.i.b16 %v2776_v31, %v2776_v31 }
 0x264   :  { %v1484_v8 = vmul.bf16 %v4991_v13, %v867_v21  ;;  %v2410_v21 = vld [vmem:[#allocation8 + $0x148] sm:$0xff] }
 0x265   :  { %v5153_v15 = vrot.slane %v2787_v44, %v4452_v3 }
 0x266   :  { %2290 = vmatpush2.bf16.msra.mxu0 %v1516_v32  ;;  %2331 = vmatpush2.bf16.msra.mxu1 %v1644_v33  ;;  %v859_v32 = vunpack.c.h.s8.bf16 %v434_v24  ;;  %v987_v33 = vunpack.c.h.s8.bf16 %v498_v26 }
 0x267   :  { %2291 = vmatprep.subr.bf16.mxu0 %v1509_v37  ;;  %2332 = vmatprep.subr.bf16.mxu1 %v1637_v36  ;;  %v852_v37 = vunpack.c.l.s8.bf16 %v435_v41  ;;  %v2775_v36 = vpack.c.bf16 %v2758_v27, %v2758_v27 }
 0x268   :  { %v1476_v46 = vmul.bf16 %v4991_v13, %v859_v32  ;;  %v1604_v57 = vmul.bf16 %v4991_v13, %v987_v33  ;;  %v2583_v32 = vunpack.c.h.s8.bf16 %v2410_v21  ;;  %v2409_v33 = vld [vmem:[#allocation8 + $0x140] sm:$0xff] }
 0x269   :  { %v1469_v62 = vmul.bf16 %v4986_v5, %v852_v37  ;;  %v2780_v12 = vpack.i.b16 %v2775_v36, %v2775_v36  ;;  %v2582_v44 = vunpack.c.h.s8.bf16 %v2409_v33 }
 0x26a   :  { %2292 = vmatpush2.bf16.msra.mxu0 %v1508_v52  ;;  %2333 = vmatpush2.bf16.msra.mxu1 %v1636_v50  ;;  %v2382_v52 = vld [vmem:[#allocation8 + $0x68] sm:$0xff] }
 0x26b   :  { %2293 = vmatprep.subr.bf16.mxu0 %v1501_v6  ;;  %2334 = vmatprep.subr.bf16.mxu1 %v1629_v7  ;;  %v2414_v50 = vld [vmem:[#allocation8 + $0x168] sm:$0xff]  ;;  %v851_v6 = vunpack.c.l.s8.bf16 %v434_v24  ;;  %v979_v7 = vunpack.c.l.s8.bf16 %v498_v26  ;;  %v2527_v45 = vunpack.c.h.s8.bf16 %v2382_v52  ;;  %v5159_v17 = vrot.slane %v2780_v12, %v4452_v3 }
 0x26c   :  { %v2591_v11 = vunpack.c.h.s8.bf16 %v2414_v50  ;;  %v2522_v24 = vunpack.c.l.s8.bf16 %v2381_v40 }
 0x26d   :  { %v1468_v61 = vmul.bf16 %v4991_v13, %v851_v6  ;;  %v2836_v5 = vmul.bf16 %v5153_v15, %v2527_v45  ;;  %v2406_v6 = vld [vmem:[#allocation8 + $0x128] sm:$0xff] }
 0x26e   :  { %2294 = vmatpush2.bf16.msra.mxu0 %v1500_v60  ;;  %2335 = vmatpush2.bf16.msra.mxu1 %v1628_v63  ;;  %v2413_v60 = vld [vmem:[#allocation8 + $0x160] sm:$0xff]  ;;  %v2021_v63 = vadd.f32 %v5084_v49, %v1980_v53  ;;  %v2900_v18 = vmul.bf16 %v5153_v15, %v2591_v11  ;;  %v2523_v49 = vunpack.c.l.s8.bf16 %v2382_v52  ;;  %v2831_v37 = vmul.bf16 %v5159_v17, %v2522_v24 }
 0x26f   :  { %2295 = vmatprep.subr.bf16.mxu0 %v1493_v0  ;;  %2336 = vmatprep.subr.bf16.mxu1 %v1621_v16  ;;  %v1596_v0 = vmul.bf16 %v4991_v13, %v979_v7  ;;  %v2526_v16 = vunpack.c.h.s8.bf16 %v2381_v40  ;;  %v2590_v41 = vunpack.c.h.s8.bf16 %v2413_v60  ;;  %v1676_v13 = vrot.slane %v5001_v30, %v1056_v58 }
 0x270   :  { %v2586_v27 = vunpack.c.l.s8.bf16 %v2413_v60  ;;  %v2832_v56 = vmul.bf16 %v5153_v15, %v2523_v49  ;;  %v2579_v53 = vunpack.c.l.s8.bf16 %v2410_v21  ;;  %v2891_v11 = vmul.bf16 %v5159_v17, %v2582_v44 }
 0x271   :  { %v2835_v22 = vmul.bf16 %v5159_v17, %v2526_v16  ;;  %v2899_v26 = vmul.bf16 %v5159_v17, %v2590_v41  ;;  %v2578_v60 = vunpack.c.l.s8.bf16 %v2409_v33  ;;  %v2575_v16 = vunpack.c.h.s8.bf16 %v2406_v6 }
 0x272   :  { %2296 = vmatpush2.bf16.msra.mxu0 %v1492_v59  ;;  %2337 = vmatpush2.bf16.msra.mxu1 %v1620_v19  ;;  %v2587_v59 = vunpack.c.l.s8.bf16 %v2414_v50  ;;  %v2378_v19 = vld [vmem:[#allocation8 + $0x48] sm:$0xff]  ;;  %v2895_v43 = vmul.bf16 %v5159_v17, %v2586_v27  ;;  %v2892_v50 = vmul.bf16 %v5153_v15, %v2583_v32  ;;  %v2571_v21 = vunpack.c.l.s8.bf16 %v2406_v6 }
 0x273   :  { %2297 = vmatprep.subr.bf16.mxu0 %v1485_v25  ;;  %2338 = vmatprep.subr.bf16.mxu1 %v1613_v28  ;;  %v2356_v25 = vmax.f32 %v2021_v63, 0.0  ;;  %v2519_v4 = vunpack.c.h.s8.bf16 %v2378_v19  ;;  %v2377_v28 = vld [vmem:[#allocation8 + $0x40] sm:$0xff]  ;;  %v2887_v47 = vmul.bf16 %v5159_v17, %v2578_v60 }
 0x274   :  { %v2896_v31 = vmul.bf16 %v5153_v15, %v2587_v59  ;;  %v2518_v36 = vunpack.c.h.s8.bf16 %v2377_v28  ;;  %v2514_v12 = vunpack.c.l.s8.bf16 %v2377_v28  ;;  %v2880_v32 = vmul.bf16 %v5153_v15, %v2571_v21 }
 0x276   :  { %2298 = vmatpush2.bf16.msra.mxu0 %v1484_v8  ;;  %2339 = vmatpush2.bf16.msra.mxu1 %v1612_v34  ;;  %v5173_v8 = vpack.c.bf16 %v2356_v25, %v2356_v25  ;;  %v2827_v7 = vmul.bf16 %v5159_v17, %v2518_v36  ;;  %v2884_v25 = vmul.bf16 %v5153_v15, %v2575_v16 }
 0x277   :  { %2299 = vmatprep.subr.bf16.mxu0 %v1477_v38  ;;  %2340 = vmatprep.subr.bf16.mxu1 %v1605_v39 }
 0x27a   :  { %2300 = vmatpush2.bf16.msra.mxu0 %v1476_v46  ;;  %2341 = vmatpush2.bf16.msra.mxu1 %v1604_v57  ;;  %v2374_v46 = vld [vmem:[#allocation8 + $0x28] sm:$0xff] }
 0x27b   :  { %2301 = vmatprep.subr.bf16.mxu0 %v1469_v62  ;;  %2342 = vmatprep.subr.bf16.mxu1 %v1597_v14  ;;  %v2511_v63 = vunpack.c.h.s8.bf16 %v2374_v46 }
 0x27d   :  { %v2820_v49 = vmul.bf16 %v5153_v15, %v2511_v63 }
 0x27e   :  { %2302 = vmatpush2.bf16.msra.mxu0 %v1468_v61  ;;  %2343 = vmatpush2.bf16.msra.mxu1 %v1596_v0  ;;  %v2373_v61 = vld [vmem:[#allocation8 + $0x20] sm:$0xff]  ;;  %v2888_v0 = vmul.bf16 %v5153_v15, %v2579_v53  ;;  %v2430_v53 = vld [vmem:[#allocation8 + $0x1e8] sm:$0xff] }
 0x27f   :  { %3086 = vmatprep.subr.bf16.mxu0 %v2836_v5  ;;  %3127 = vmatprep.subr.bf16.mxu1 %v2900_v18  ;;  %v2405_v5 = vld [vmem:[#allocation8 + $0x120] sm:$0xff]  ;;  %v2823_v18 = vmul.bf16 %v5159_v17, %v2514_v12  ;;  %v2510_v41 = vunpack.c.h.s8.bf16 %v2373_v61 }
 0x280   :  { %v2574_v59 = vunpack.c.h.s8.bf16 %v2405_v5  ;;  %v2570_v28 = vunpack.c.l.s8.bf16 %v2405_v5 }
 0x281   :  { %v2059_v58 = vpop.f32.mrf.mxu0  ;;  %v2100_v30 = vpop.f32.mrf.mxu1  ;;  %2304 = vmatmul.mubr.bf16.vlgmr.msra.gmra.mxu0 %v4673_v48  ;;  %2345 = vmatmul.mubr.bf16.vlgmr.msra.gmra.mxu1 %v4675_v42  ;;  %v2828_v48 = vmul.bf16 %v5153_v15, %v2519_v4  ;;  %v2515_v42 = vunpack.c.l.s8.bf16 %v2378_v19  ;;  %v2507_v19 = vunpack.c.l.s8.bf16 %v2374_v46  ;;  %v2819_v24 = vmul.bf16 %v5159_v17, %v2510_v41 }
 0x282   :  { %v2060_v34 = vadd.f32 %v2059_v58, %v1676_v13  ;;  %3087 = vmatpush1.bf16.msra.mxu0 %v2835_v22  ;;  %3118 = vmatprep.mubr.bf16.mxu0 %v5169_v29  ;;  %v2370_v13 = vld [vmem:[#allocation8 + $0x8] sm:$0xff]  ;;  %v2883_v27 = vmul.bf16 %v5159_v17, %v2574_v59  ;;  %v2401_v58 = vld [vmem:[#allocation8 + $0x100] sm:$0xff]  ;;  %v2619_v41 = vunpack.c.l.s8.bf16 %v2430_v53 }
 0x283   :  { %3128 = vmatpush1.bf16.msra.mxu1 %v2899_v26  ;;  %3159 = vmatprep.mubr.bf16.mxu1 %v5173_v8  ;;  %v5180_v38 = vpop.f32.mrf.mxu0  ;;  %v5182_v39 = vpop.f32.mrf.mxu1  ;;  %v2824_v40 = vmul.bf16 %v5153_v15, %v2515_v42  ;;  %v2402_v22 = vld [vmem:[#allocation8 + $0x108] sm:$0xff]  ;;  %v2506_v26 = vunpack.c.l.s8.bf16 %v2373_v61  ;;  %v2816_v4 = vmul.bf16 %v5153_v15, %v2507_v19 }
 0x284   :  { %v5186_v52 = vadd.f32 %v2100_v30, %v2060_v34  ;;  %3088 = vmatprep.subr.bf16.mxu0 %v2832_v56  ;;  %3129 = vmatprep.subr.bf16.mxu1 %v2896_v31  ;;  %v2503_v56 = vunpack.c.h.s8.bf16 %v2370_v13  ;;  %v2369_v31 = vld [vmem:[#allocation8] sm:$0xff]  ;;  %v2567_v33 = vunpack.c.h.s8.bf16 %v2402_v22  ;;  %v2563_v42 = vunpack.c.l.s8.bf16 %v2402_v22 }
 0x285   :  { %v2063_v57 = vpop.f32.mrf.mxu0  ;;  %v2104_v62 = vpop.f32.mrf.mxu1  ;;  %v2815_v30 = vmul.bf16 %v5159_v17, %v2506_v26  ;;  %v2502_v34 = vunpack.c.h.s8.bf16 %v2369_v31  ;;  %v2928_v26 = vmul.bf16 %v5153_v15, %v2619_v41 }
 0x286   :  { %3089 = vmatpush1.bf16.msra.mxu0 %v2831_v37  ;;  %v2879_v37 = vmul.bf16 %v5159_v17, %v2570_v28  ;;  %v2812_v36 = vmul.bf16 %v5153_v15, %v2503_v56  ;;  %v2876_v44 = vmul.bf16 %v5153_v15, %v2567_v33  ;;  %v2498_v57 = vunpack.c.l.s8.bf16 %v2369_v31 }
 0x287   :  { %3130 = vmatpush1.bf16.msra.mxu1 %v2895_v43  ;;  %v2064_v14 = vpop.f32.mrf.mxu0  ;;  %v2105_v45 = vpop.f32.mrf.mxu1  ;;  %3090 = vmatprep.subr.bf16.mxu0 %v2828_v48  ;;  %v2566_v43 = vunpack.c.h.s8.bf16 %v2401_v58  ;;  %v2499_v48 = vunpack.c.l.s8.bf16 %v2370_v13  ;;  %v2811_v46 = vmul.bf16 %v5159_v17, %v2502_v34 }
 0x288   :  { %3131 = vmatprep.subr.bf16.mxu1 %v2892_v50  ;;  %v2398_v50 = vld [vmem:[#allocation8 + $0xe8] sm:$0xff]  ;;  %v2397_v14 = vld [vmem:[#allocation8 + $0xe0] sm:$0xff]  ;;  %v2872_v45 = vmul.bf16 %v5153_v15, %v2563_v42  ;;  %v2807_v60 = vmul.bf16 %v5159_v17, %v2498_v57 }
 0x289   :  { %v2875_v62 = vmul.bf16 %v5159_v17, %v2566_v43  ;;  %v2808_v6 = vmul.bf16 %v5153_v15, %v2499_v48  ;;  %v2559_v12 = vunpack.c.h.s8.bf16 %v2398_v50  ;;  %v2558_v63 = vunpack.c.h.s8.bf16 %v2397_v14 }
 0x28a   :  { %3091 = vmatpush1.bf16.msra.mxu0 %v2827_v7  ;;  %v2562_v7 = vunpack.c.l.s8.bf16 %v2401_v58  ;;  %v2555_v5 = vunpack.c.l.s8.bf16 %v2398_v50  ;;  %v2554_v19 = vunpack.c.l.s8.bf16 %v2397_v14 }
 0x28b   :  { %3132 = vmatpush1.bf16.msra.mxu1 %v2891_v11  ;;  %3092 = vmatprep.subr.bf16.mxu0 %v2824_v40  ;;  %v2623_v11 = vunpack.c.h.s8.bf16 %v2430_v53  ;;  %v2429_v40 = vld [vmem:[#allocation8 + $0x1e0] sm:$0xff]  ;;  %v2867_v59 = vmul.bf16 %v5159_v17, %v2558_v63 }
 0x28c   :  { %3133 = vmatprep.subr.bf16.mxu1 %v2888_v0  ;;  %v2871_v61 = vmul.bf16 %v5159_v17, %v2562_v7  ;;  %v2868_v0 = vmul.bf16 %v5153_v15, %v2559_v12  ;;  %v2622_v16 = vunpack.c.h.s8.bf16 %v2429_v40  ;;  %v2864_v21 = vmul.bf16 %v5153_v15, %v2555_v5 }
 0x28d   :  { %v2618_v13 = vunpack.c.l.s8.bf16 %v2429_v40  ;;  %v2863_v28 = vmul.bf16 %v5159_v17, %v2554_v19 }
 0x28e   :  { %3093 = vmatpush1.bf16.msra.mxu0 %v2823_v18  ;;  %v2932_v18 = vmul.bf16 %v5153_v15, %v2623_v11 }
 0x28f   :  { %3134 = vmatpush1.bf16.msra.mxu1 %v2887_v47  ;;  %3094 = vmatprep.subr.bf16.mxu0 %v2820_v49  ;;  %v2394_v47 = vld [vmem:[#allocation8 + $0xc8] sm:$0xff]  ;;  %v2927_v31 = vmul.bf16 %v5159_v17, %v2618_v13 }
 0x290   :  { %3135 = vmatprep.subr.bf16.mxu1 %v2884_v25  ;;  %v2426_v49 = vld [vmem:[#allocation8 + $0x1c8] sm:$0xff]  ;;  %v2931_v25 = vmul.bf16 %v5159_v17, %v2622_v16  ;;  %v2551_v22 = vunpack.c.h.s8.bf16 %v2394_v47  ;;  %v2547_v58 = vunpack.c.l.s8.bf16 %v2394_v47 }
 0x291   :  { %v2611_v34 = vunpack.c.l.s8.bf16 %v2426_v49 }
 0x292   :  { %3095 = vmatpush1.bf16.msra.mxu0 %v2819_v24  ;;  %v2393_v24 = vld [vmem:[#allocation8 + $0xc0] sm:$0xff]  ;;  %v2856_v42 = vmul.bf16 %v5153_v15, %v2547_v58 }
 0x293   :  { %3136 = vmatpush1.bf16.msra.mxu1 %v2883_v27  ;;  %3096 = vmatprep.subr.bf16.mxu0 %v2816_v4  ;;  %v2615_v27 = vunpack.c.h.s8.bf16 %v2426_v49  ;;  %v2425_v4 = vld [vmem:[#allocation8 + $0x1c0] sm:$0xff]  ;;  %v2550_v56 = vunpack.c.h.s8.bf16 %v2393_v24  ;;  %v2546_v48 = vunpack.c.l.s8.bf16 %v2393_v24  ;;  %v2920_v57 = vmul.bf16 %v5153_v15, %v2611_v34 }
 0x294   :  { %3137 = vmatprep.subr.bf16.mxu1 %v2880_v32  ;;  %v2860_v32 = vmul.bf16 %v5153_v15, %v2551_v22  ;;  %v2614_v33 = vunpack.c.h.s8.bf16 %v2425_v4  ;;  %v2610_v50 = vunpack.c.l.s8.bf16 %v2425_v4 }
 0x295   :  { %v2859_v43 = vmul.bf16 %v5159_v17, %v2550_v56  ;;  %v2855_v7 = vmul.bf16 %v5159_v17, %v2546_v48 }
 0x296   :  { %3097 = vmatpush1.bf16.msra.mxu0 %v2815_v30  ;;  %v2924_v30 = vmul.bf16 %v5153_v15, %v2615_v27  ;;  %v2919_v14 = vmul.bf16 %v5159_v17, %v2610_v50  ;;  %v2353_v50 = vmax.f32 %v4918_v35, 0.0  ;;  %v2355_v35 = vmax.f32 %v5088_v54, 0.0  ;;  %v2441_v54 = vld [vmem:[#allocation8 + $0x240] sm:$0xff] }
 0x297   :  { %3138 = vmatpush1.bf16.msra.mxu1 %v2879_v37  ;;  %3098 = vmatprep.subr.bf16.mxu0 %v2812_v36  ;;  %v2390_v37 = vld [vmem:[#allocation8 + $0xa8] sm:$0xff] }
 0x298   :  { %3139 = vmatprep.subr.bf16.mxu1 %v2876_v44  ;;  %v2422_v36 = vld [vmem:[#allocation8 + $0x1a8] sm:$0xff]  ;;  %v2923_v44 = vmul.bf16 %v5159_v17, %v2614_v33  ;;  %v2543_v53 = vunpack.c.h.s8.bf16 %v2390_v37  ;;  %v2539_v40 = vunpack.c.l.s8.bf16 %v2390_v37 }
 0x299   :  { %v2603_v63 = vunpack.c.l.s8.bf16 %v2422_v36 }
 0x29a   :  { %3099 = vmatpush1.bf16.msra.mxu0 %v2811_v46  ;;  %v2389_v46 = vld [vmem:[#allocation8 + $0xa0] sm:$0xff]  ;;  %v2848_v41 = vmul.bf16 %v5153_v15, %v2539_v40 }
 0x29b   :  { %3140 = vmatpush1.bf16.msra.mxu1 %v2875_v62  ;;  %3100 = vmatprep.subr.bf16.mxu0 %v2808_v6  ;;  %v2607_v62 = vunpack.c.h.s8.bf16 %v2422_v36  ;;  %v2421_v6 = vld [vmem:[#allocation8 + $0x1a0] sm:$0xff]  ;;  %v2542_v12 = vunpack.c.h.s8.bf16 %v2389_v46  ;;  %v2538_v5 = vunpack.c.l.s8.bf16 %v2389_v46  ;;  %v2912_v19 = vmul.bf16 %v5153_v15, %v2603_v63 }
 0x29c   :  { %3141 = vmatprep.subr.bf16.mxu1 %v2872_v45  ;;  %v2852_v45 = vmul.bf16 %v5153_v15, %v2543_v53  ;;  %v2606_v11 = vunpack.c.h.s8.bf16 %v2421_v6  ;;  %v2602_v47 = vunpack.c.l.s8.bf16 %v2421_v6  ;;  %v5242_v53 = vld [vmem:[#allocation7 + $0x1] ss:$2 sm:$0xff] }
 0x29d   :  { %v2851_v16 = vmul.bf16 %v5159_v17, %v2542_v12  ;;  %v2847_v13 = vmul.bf16 %v5159_v17, %v2538_v5  ;;  %v1680_v46 = vrot.slane %v5242_v53, %v1060_v51  ;;  %v2474_v51 = vld [vmem:[#allocation8 + $0x348] sm:$0xff] }
 0x29e   :  { %3101 = vmatpush1.bf16.msra.mxu0 %v2807_v60  ;;  %v2916_v60 = vmul.bf16 %v5153_v15, %v2607_v62  ;;  %v2911_v24 = vmul.bf16 %v5159_v17, %v2602_v47  ;;  %v5258_v47 = vpack.c.bf16 %v2355_v35, %v2355_v35 }
 0x29f   :  { %3142 = vmatpush1.bf16.msra.mxu1 %v2871_v61  ;;  %3102 = vmatprep.subr.bf16.mxu0 %v2868_v0  ;;  %v2386_v61 = vld [vmem:[#allocation8 + $0x88] sm:$0xff]  ;;  %v2062_v63 = vadd.f32 %v5180_v38, %v1680_v46  ;;  %v2473_v38 = vld [vmem:[#allocation8 + $0x340] sm:$0xff] }
 0x2a0   :  { %3143 = vmatprep.subr.bf16.mxu1 %v2932_v18  ;;  %v2418_v0 = vld [vmem:[#allocation8 + $0x188] sm:$0xff]  ;;  %v2915_v18 = vmul.bf16 %v5159_v17, %v2606_v11  ;;  %v2535_v49 = vunpack.c.h.s8.bf16 %v2386_v61  ;;  %v2531_v4 = vunpack.c.l.s8.bf16 %v2386_v61  ;;  %v2437_v46 = vld [vmem:[#allocation8 + $0x220] sm:$0xff] }
 0x2a1   :  { %v2595_v56 = vunpack.c.l.s8.bf16 %v2418_v0 }
 0x2a2   :  { %3103 = vmatpush2.bf16.msra.mxu0 %v2867_v59  ;;  %v2385_v59 = vld [vmem:[#allocation8 + $0x80] sm:$0xff]  ;;  %v2840_v34 = vmul.bf16 %v5153_v15, %v2531_v4 }
 0x2a3   :  { %3144 = vmatpush2.bf16.msra.mxu1 %v2931_v25  ;;  %3104 = vmatprep.subr.bf16.mxu0 %v2864_v21  ;;  %v2599_v25 = vunpack.c.h.s8.bf16 %v2418_v0  ;;  %v2417_v21 = vld [vmem:[#allocation8 + $0x180] sm:$0xff]  ;;  %v2534_v22 = vunpack.c.h.s8.bf16 %v2385_v59  ;;  %v2530_v58 = vunpack.c.l.s8.bf16 %v2385_v59  ;;  %v2904_v48 = vmul.bf16 %v5153_v15, %v2595_v56 }
 0x2a4   :  { %3145 = vmatprep.subr.bf16.mxu1 %v2928_v26  ;;  %v2844_v26 = vmul.bf16 %v5153_v15, %v2535_v49  ;;  %v2598_v27 = vunpack.c.h.s8.bf16 %v2417_v21  ;;  %v2594_v37 = vunpack.c.l.s8.bf16 %v2417_v21  ;;  %v2711_v59 = vunpack.c.h.s8.bf16 %v2474_v51 }
 0x2a5   :  { %v2843_v33 = vmul.bf16 %v5159_v17, %v2534_v22  ;;  %v2103_v21 = vadd.f32 %v5182_v39, %v2062_v63  ;;  %v2646_v22 = vunpack.c.h.s8.bf16 %v2441_v54  ;;  %v2710_v56 = vunpack.c.h.s8.bf16 %v2473_v38 }
 0x2a6   :  { %3105 = vmatpush2.bf16.msra.mxu0 %v2863_v28  ;;  %v2908_v28 = vmul.bf16 %v5153_v15, %v2599_v25  ;;  %v2903_v6 = vmul.bf16 %v5159_v17, %v2594_v37  ;;  %v3020_v39 = vmul.bf16 %v5153_v15, %v2711_v59 }
 0x2a7   :  { %3146 = vmatpush2.bf16.msra.mxu1 %v2927_v31  ;;  %3106 = vmatprep.subr.bf16.mxu0 %v2860_v32  ;;  %v2446_v31 = vld [vmem:[#allocation8 + $0x268] sm:$0xff] }
 0x2a8   :  { %3147 = vmatprep.subr.bf16.mxu1 %v2924_v30  ;;  %v2478_v32 = vld [vmem:[#allocation8 + $0x368] sm:$0xff]  ;;  %v2907_v30 = vmul.bf16 %v5159_v17, %v2598_v27  ;;  %v2655_v36 = vunpack.c.h.s8.bf16 %v2446_v31  ;;  %v2651_v12 = vunpack.c.l.s8.bf16 %v2446_v31 }
 0x2a9   :  { %v2715_v40 = vunpack.c.l.s8.bf16 %v2478_v32 }
 0x2aa   :  { %3107 = vmatpush2.bf16.msra.mxu0 %v2859_v43  ;;  %v2445_v43 = vld [vmem:[#allocation8 + $0x260] sm:$0xff] }
 0x2ab   :  { %3148 = vmatpush2.bf16.msra.mxu1 %v2923_v44  ;;  %3108 = vmatprep.subr.bf16.mxu0 %v2856_v42  ;;  %v2719_v44 = vunpack.c.h.s8.bf16 %v2478_v32  ;;  %v2477_v42 = vld [vmem:[#allocation8 + $0x360] sm:$0xff]  ;;  %v2654_v62 = vunpack.c.h.s8.bf16 %v2445_v43  ;;  %v2650_v0 = vunpack.c.l.s8.bf16 %v2445_v43  ;;  %v3024_v49 = vmul.bf16 %v5153_v15, %v2715_v40  ;;  %v2438_v32 = vld [vmem:[#allocation8 + $0x228] sm:$0xff] }
 0x2ac   :  { %3149 = vmatprep.subr.bf16.mxu1 %v2920_v57  ;;  %v2839_v57 = vmul.bf16 %v5159_v17, %v2530_v58  ;;  %v2642_v43 = vunpack.c.l.s8.bf16 %v2441_v54  ;;  %v2466_v54 = vld [vmem:[#allocation8 + $0x308] sm:$0xff] }
 0x2ad   :  { %v3028_v11 = vmul.bf16 %v5153_v15, %v2719_v44  ;;  %v2963_v61 = vmul.bf16 %v5159_v17, %v2654_v62  ;;  %v2706_v62 = vunpack.c.l.s8.bf16 %v2473_v38  ;;  %v2433_v38 = vld [vmem:[#allocation8 + $0x200] sm:$0xff] }
 0x2ae   :  { %3109 = vmatpush2.bf16.msra.mxu0 %v2855_v7  ;;  %v2964_v7 = vmul.bf16 %v5153_v15, %v2655_v36  ;;  %v2955_v36 = vmul.bf16 %v5159_v17, %v2646_v22 }
 0x2af   :  { %3150 = vmatpush2.bf16.msra.mxu1 %v2919_v14  ;;  %3110 = vmatprep.subr.bf16.mxu0 %v2852_v45  ;;  %v2718_v14 = vunpack.c.h.s8.bf16 %v2477_v42  ;;  %v2442_v45 = vld [vmem:[#allocation8 + $0x248] sm:$0xff]  ;;  %v3015_v63 = vmul.bf16 %v5159_v17, %v2706_v62 }
 0x2b0   :  { %3151 = vmatprep.subr.bf16.mxu1 %v2916_v60  ;;  %v5252_v60 = vpack.c.bf16 %v2353_v50, %v2353_v50  ;;  %v2647_v5 = vunpack.c.h.s8.bf16 %v2442_v45  ;;  %v2643_v4 = vunpack.c.l.s8.bf16 %v2442_v45  ;;  %v2639_v50 = vunpack.c.h.s8.bf16 %v2438_v32 }
 0x2b1   :  { %v2951_v45 = vmul.bf16 %v5159_v17, %v2642_v43 }
 0x2b2   :  { %3111 = vmatpush2.bf16.msra.mxu0 %v2851_v16  ;;  %v2960_v16 = vmul.bf16 %v5153_v15, %v2651_v12  ;;  %v2956_v27 = vmul.bf16 %v5153_v15, %v2647_v5  ;;  %v2948_v40 = vmul.bf16 %v5153_v15, %v2639_v50 }
 0x2b3   :  { %3152 = vmatpush2.bf16.msra.mxu1 %v2915_v18  ;;  %3112 = vmatprep.subr.bf16.mxu0 %v2848_v41  ;;  %v3027_v18 = vmul.bf16 %v5159_v17, %v2718_v14  ;;  %v2714_v41 = vunpack.c.l.s8.bf16 %v2477_v42  ;;  %v2952_v42 = vmul.bf16 %v5153_v15, %v2643_v4  ;;  %v2469_v14 = vld [vmem:[#allocation8 + $0x320] sm:$0xff]  ;;  %v2630_v4 = vunpack.c.h.s8.bf16 %v2433_v38 }
 0x2b4   :  { %3153 = vmatprep.subr.bf16.mxu1 %v2912_v19 }
 0x2b6   :  { %3113 = vmatpush2.bf16.msra.mxu0 %v2847_v13  ;;  %v2959_v13 = vmul.bf16 %v5159_v17, %v2650_v0  ;;  %v2434_v0 = vld [vmem:[#allocation8 + $0x208] sm:$0xff] }
 0x2b7   :  { %3154 = vmatpush2.bf16.msra.mxu1 %v2911_v24  ;;  %3114 = vmatprep.subr.bf16.mxu0 %v2844_v26  ;;  %v2631_v59 = vunpack.c.h.s8.bf16 %v2434_v0 }
 0x2b8   :  { %3155 = vmatprep.subr.bf16.mxu1 %v2908_v28  ;;  %v3023_v28 = vmul.bf16 %v5159_v17, %v2714_v41  ;;  %v2634_v41 = vunpack.c.l.s8.bf16 %v2437_v46 }
 0x2ba   :  { %3115 = vmatpush2.bf16.msra.mxu0 %v2843_v33  ;;  %v2707_v33 = vunpack.c.l.s8.bf16 %v2474_v51  ;;  %v2635_v51 = vunpack.c.l.s8.bf16 %v2438_v32 }
 0x2bb   :  { %3156 = vmatpush2.bf16.msra.mxu1 %v2907_v30  ;;  %3116 = vmatprep.subr.bf16.mxu0 %v2840_v34  ;;  %v2470_v34 = vld [vmem:[#allocation8 + $0x328] sm:$0xff] }
 0x2bc   :  { %3157 = vmatprep.subr.bf16.mxu1 %v2904_v48  ;;  %v2703_v12 = vunpack.c.h.s8.bf16 %v2470_v34  ;;  %v2699_v5 = vunpack.c.l.s8.bf16 %v2470_v34  ;;  %v2939_v34 = vmul.bf16 %v5159_v17, %v2630_v4 }
 0x2be   :  { %3117 = vmatpush2.bf16.msra.mxu0 %v2839_v57  ;;  %v3019_v57 = vmul.bf16 %v5159_v17, %v2710_v56  ;;  %v3008_v22 = vmul.bf16 %v5153_v15, %v2699_v5  ;;  %v2627_v56 = vunpack.c.l.s8.bf16 %v2434_v0 }
 0x2bf   :  { %3158 = vmatpush2.bf16.msra.mxu1 %v2903_v6  ;;  %3168 = vmatprep.subr.bf16.mxu0 %v2964_v7  ;;  %v3016_v7 = vmul.bf16 %v5153_v15, %v2707_v33 }
 0x2c0   :  { %3209 = vmatprep.subr.bf16.mxu1 %v3028_v11  ;;  %v2638_v11 = vunpack.c.h.s8.bf16 %v2437_v46 }
 0x2c1   :  { %v5261_v19 = vpop.f32.mrf.mxu0  ;;  %v5263_v25 = vpop.f32.mrf.mxu1  ;;  %3119 = vmatmul.mubr.bf16.vlgmr.msra.gmra.mxu0 %v5252_v60 }
 0x2c2   :  { %3160 = vmatmul.mubr.bf16.vlgmr.msra.gmra.mxu1 %v5258_v47  ;;  %3169 = vmatpush1.bf16.msra.mxu0 %v2963_v61  ;;  %v2702_v61 = vunpack.c.h.s8.bf16 %v2469_v14 }
 0x2c3   :  { %v2143_v24 = vpop.f32.mrf.mxu0  ;;  %v2184_v26 = vpop.f32.mrf.mxu1  ;;  %3170 = vmatprep.subr.bf16.mxu0 %v2960_v16  ;;  %3210 = vmatpush1.bf16.msra.mxu1 %v3027_v18  ;;  %v3012_v16 = vmul.bf16 %v5153_v15, %v2703_v12  ;;  %v2947_v18 = vmul.bf16 %v5159_v17, %v2638_v11  ;;  %v2458_v11 = vld [vmem:[#allocation8 + $0x2c8] sm:$0xff] }
 0x2c4   :  { %v2144_v31 = vadd.f32 %v2143_v24, %v2103_v21  ;;  %3211 = vmatprep.subr.bf16.mxu1 %v3024_v49  ;;  %v2944_v49 = vmul.bf16 %v5153_v15, %v2635_v51  ;;  %v3011_v21 = vmul.bf16 %v5159_v17, %v2702_v61  ;;  %v2695_v24 = vunpack.c.h.s8.bf16 %v2466_v54 }
 0x2c5   :  { %v2145_v58 = vpop.f32.mrf.mxu0  ;;  %v2186_v30 = vpop.f32.mrf.mxu1  ;;  %v2679_v5 = vunpack.c.h.s8.bf16 %v2458_v11 }
 0x2c6   :  { %v2185_v37 = vadd.f32 %v2184_v26, %v2144_v31  ;;  %3171 = vmatpush1.bf16.msra.mxu0 %v2959_v13  ;;  %v2698_v13 = vunpack.c.l.s8.bf16 %v2469_v14  ;;  %v2465_v26 = vld [vmem:[#allocation8 + $0x300] sm:$0xff]  ;;  %v3004_v33 = vmul.bf16 %v5153_v15, %v2695_v24  ;;  %v2691_v58 = vunpack.c.l.s8.bf16 %v2466_v54  ;;  %v2494_v30 = vld [vmem:[#allocation8 + $0x3e8] sm:$0xff] }
 0x2c7   :  { %v2146_v48 = vpop.f32.mrf.mxu0  ;;  %v2187_v44 = vpop.f32.mrf.mxu1  ;;  %3172 = vmatprep.subr.bf16.mxu0 %v2956_v27  ;;  %3212 = vmatpush1.bf16.msra.mxu1 %v3023_v28  ;;  %v2943_v27 = vmul.bf16 %v5159_v17, %v2634_v41  ;;  %v2940_v28 = vmul.bf16 %v5153_v15, %v2631_v59  ;;  %v2694_v32 = vunpack.c.h.s8.bf16 %v2465_v26  ;;  %v2751_v46 = vunpack.c.h.s8.bf16 %v2494_v30  ;;  %v2457_v54 = vld [vmem:[#allocation8 + $0x2c0] sm:$0xff] }
 0x2c8   :  { %v2358_v6 = vmax.f32 %v2185_v37, 0.0  ;;  %3213 = vmatprep.subr.bf16.mxu1 %v3020_v39  ;;  %v3007_v31 = vmul.bf16 %v5159_v17, %v2698_v13  ;;  %v2462_v39 = vld [vmem:[#allocation8 + $0x2e8] sm:$0xff]  ;;  %v2626_v37 = vunpack.c.l.s8.bf16 %v2433_v38  ;;  %v2461_v48 = vld [vmem:[#allocation8 + $0x2e0] sm:$0xff]  ;;  %v3000_v50 = vmul.bf16 %v5153_v15, %v2691_v58 }
 0x2c9   :  { %v2687_v43 = vunpack.c.h.s8.bf16 %v2462_v39  ;;  %v3003_v44 = vmul.bf16 %v5159_v17, %v2694_v32  ;;  %v2683_v12 = vunpack.c.l.s8.bf16 %v2462_v39  ;;  %v2747_v51 = vunpack.c.l.s8.bf16 %v2494_v30  ;;  %v2489_v38 = vld [vmem:[#allocation8 + $0x3c0] sm:$0xff] }
 0x2ca   :  { %v5276_v35 = vpack.c.bf16 %v2358_v6, %v2358_v6  ;;  %3173 = vmatpush1.bf16.msra.mxu0 %v2955_v36  ;;  %v2936_v36 = vmul.bf16 %v5153_v15, %v2627_v56  ;;  %v2935_v62 = vmul.bf16 %v5159_v17, %v2626_v37  ;;  %v2686_v6 = vunpack.c.h.s8.bf16 %v2461_v48  ;;  %v2453_v30 = vld [vmem:[#allocation8 + $0x2a0] sm:$0xff] }
 0x2cb   :  { %3174 = vmatprep.subr.bf16.mxu0 %v2952_v42  ;;  %3214 = vmatpush1.bf16.msra.mxu1 %v3019_v57  ;;  %v2690_v42 = vunpack.c.l.s8.bf16 %v2465_v26  ;;  %v2493_v57 = vld [vmem:[#allocation8 + $0x3e0] sm:$0xff]  ;;  %v2682_v0 = vunpack.c.l.s8.bf16 %v2461_v48  ;;  %v2678_v13 = vunpack.c.h.s8.bf16 %v2457_v54  ;;  %v2675_v24 = vunpack.c.l.s8.bf16 %v2458_v11  ;;  %v2454_v26 = vld [vmem:[#allocation8 + $0x2a8] sm:$0xff] }
 0x2cc   :  { %3200 = vmatprep.mubr.bf16.mxu0 %v5276_v35  ;;  %3215 = vmatprep.subr.bf16.mxu1 %v3016_v7  ;;  %v2996_v7 = vmul.bf16 %v5153_v15, %v2687_v43  ;;  %v2995_v61 = vmul.bf16 %v5159_v17, %v2686_v6  ;;  %v2746_v41 = vunpack.c.l.s8.bf16 %v2493_v57  ;;  %v2742_v4 = vunpack.c.h.s8.bf16 %v2489_v38  ;;  %v2485_v48 = vld [vmem:[#allocation8 + $0x3a0] sm:$0xff] }
 0x2cd   :  { %v2999_v14 = vmul.bf16 %v5159_v17, %v2690_v42  ;;  %v2987_v32 = vmul.bf16 %v5159_v17, %v2678_v13  ;;  %v2674_v39 = vunpack.c.l.s8.bf16 %v2457_v54  ;;  %v2984_v58 = vmul.bf16 %v5153_v15, %v2675_v24 }
 0x2ce   :  { %3175 = vmatpush1.bf16.msra.mxu0 %v2951_v45  ;;  %v2750_v45 = vunpack.c.h.s8.bf16 %v2493_v57  ;;  %v2738_v37 = vunpack.c.l.s8.bf16 %v2489_v38  ;;  %v2450_v57 = vld [vmem:[#allocation8 + $0x288] sm:$0xff]  ;;  %v2730_v54 = vunpack.c.l.s8.bf16 %v2485_v48  ;;  %v2142_v24 = vadd.f32 %v5261_v19, %v5186_v52 }
 0x2cf   :  { %3176 = vmatprep.subr.bf16.mxu0 %v2948_v40  ;;  %3216 = vmatpush1.bf16.msra.mxu1 %v3015_v63  ;;  %v3060_v40 = vmul.bf16 %v5153_v15, %v2751_v46  ;;  %v2490_v63 = vld [vmem:[#allocation8 + $0x3c8] sm:$0xff]  ;;  %v2667_v46 = vunpack.c.l.s8.bf16 %v2454_v26  ;;  %v2659_v13 = vunpack.c.l.s8.bf16 %v2450_v57 }
 0x2d0   :  { %3217 = vmatprep.subr.bf16.mxu1 %v3012_v16  ;;  %v2992_v16 = vmul.bf16 %v5153_v15, %v2683_v12  ;;  %v2743_v59 = vunpack.c.h.s8.bf16 %v2490_v63  ;;  %v2739_v56 = vunpack.c.l.s8.bf16 %v2490_v63  ;;  %v3047_v6 = vmul.bf16 %v5159_v17, %v2738_v37  ;;  %v2449_v63 = vld [vmem:[#allocation8 + $0x280] sm:$0xff]  ;;  %v2383_v37 = vld [vmem:[#allocation8 + $0x70] sm:$0xff] }
 0x2d2   :  { %3177 = vmatpush1.bf16.msra.mxu0 %v2947_v18  ;;  %v3059_v18 = vmul.bf16 %v5159_v17, %v2750_v45  ;;  %v2482_v45 = vld [vmem:[#allocation8 + $0x388] sm:$0xff] }
 0x2d3   :  { %3178 = vmatprep.subr.bf16.mxu0 %v2944_v49  ;;  %3218 = vmatpush1.bf16.msra.mxu1 %v3011_v21  ;;  %v3056_v49 = vmul.bf16 %v5153_v15, %v2747_v51  ;;  %v2991_v21 = vmul.bf16 %v5159_v17, %v2682_v0  ;;  %v2663_v51 = vunpack.c.h.s8.bf16 %v2450_v57 }
 0x2d4   :  { %3219 = vmatprep.subr.bf16.mxu1 %v3008_v22  ;;  %v2988_v22 = vmul.bf16 %v5153_v15, %v2679_v5 }
 0x2d6   :  { %3179 = vmatpush1.bf16.msra.mxu0 %v2943_v27  ;;  %v3055_v27 = vmul.bf16 %v5159_v17, %v2746_v41  ;;  %v2727_v41 = vunpack.c.h.s8.bf16 %v2482_v45 }
 0x2d7   :  { %3180 = vmatprep.subr.bf16.mxu0 %v2940_v28  ;;  %3220 = vmatpush1.bf16.msra.mxu1 %v3007_v31  ;;  %v3052_v28 = vmul.bf16 %v5153_v15, %v2743_v59  ;;  %v2486_v31 = vld [vmem:[#allocation8 + $0x3a8] sm:$0xff]  ;;  %v2662_v59 = vunpack.c.h.s8.bf16 %v2449_v63 }
 0x2d8   :  { %3221 = vmatprep.subr.bf16.mxu1 %v3004_v33  ;;  %v2671_v33 = vunpack.c.h.s8.bf16 %v2454_v26  ;;  %v2735_v43 = vunpack.c.h.s8.bf16 %v2486_v31  ;;  %v2384_v26 = vld [vmem:[#allocation8 + $0x78] sm:$0xff] }
 0x2d9   :  { %v2529_v52 = vunpack.c.h.s8.bf16 %v2384_v26 }
 0x2da   :  { %3181 = vmatpush1.bf16.msra.mxu0 %v2939_v34  ;;  %v3051_v34 = vmul.bf16 %v5159_v17, %v2742_v4  ;;  %v2980_v42 = vmul.bf16 %v5153_v15, %v2671_v33  ;;  %v3044_v12 = vmul.bf16 %v5153_v15, %v2735_v43  ;;  %v3039_v4 = vmul.bf16 %v5159_v17, %v2730_v54 }
 0x2db   :  { %3182 = vmatprep.subr.bf16.mxu0 %v2936_v36  ;;  %3222 = vmatpush1.bf16.msra.mxu1 %v3003_v44  ;;  %v3048_v36 = vmul.bf16 %v5153_v15, %v2739_v56  ;;  %v2983_v44 = vmul.bf16 %v5159_v17, %v2674_v39  ;;  %v3036_v56 = vmul.bf16 %v5153_v15, %v2727_v41  ;;  %v5329_v39 = vld [vmem:[#allocation8 + $0x178] sm:$0xff] }
 0x2dc   :  { %3223 = vmatprep.subr.bf16.mxu1 %v3000_v50  ;;  %v2670_v50 = vunpack.c.h.s8.bf16 %v2453_v30  ;;  %v2968_v33 = vmul.bf16 %v5153_v15, %v2659_v13 }
 0x2de   :  { %3183 = vmatpush1.bf16.msra.mxu0 %v2935_v62  ;;  %v2770_v62 = vrot.slane %v5128_v23, %v4630_v20  ;;  %v2979_v11 = vmul.bf16 %v5159_v17, %v2670_v50  ;;  %v2976_v23 = vmul.bf16 %v5153_v15, %v2667_v46  ;;  %v2528_v50 = vunpack.c.h.s8.bf16 %v2383_v37 }
 0x2df   :  { %3184 = vmatprep.subr.bf16.mxu0 %v2996_v7  ;;  %3224 = vmatpush1.bf16.msra.mxu1 %v2999_v14  ;;  %v2734_v7 = vunpack.c.h.s8.bf16 %v2485_v48  ;;  %v2731_v14 = vunpack.c.l.s8.bf16 %v2486_v31  ;;  %v2723_v31 = vunpack.c.l.s8.bf16 %v2482_v45 }
 0x2e0   :  { %3225 = vmatprep.subr.bf16.mxu1 %v3060_v40  ;;  %v2666_v40 = vunpack.c.l.s8.bf16 %v2453_v30  ;;  %v2183_v30 = vadd.f32 %v5263_v25, %v2142_v24  ;;  %v2375_v24 = vld [vmem:[#allocation8 + $0x30] sm:$0xff] }
 0x2e1   :  { %v3043_v5 = vmul.bf16 %v5159_v17, %v2734_v7  ;;  %v3032_v48 = vmul.bf16 %v5153_v15, %v2723_v31  ;;  %v2380_v7 = vld [vmem:[#allocation8 + $0x58] sm:$0xff] }
 0x2e2   :  { %3185 = vmatpush2.bf16.msra.mxu0 %v2995_v61  ;;  %v4098_v61 = vld [vmem:[#allocation10] ss:$2 sm:$0xf]  ;;  %v2975_v38 = vmul.bf16 %v5159_v17, %v2666_v40  ;;  %v2357_v46 = vmax.f32 %v2183_v30, 0.0  ;;  %v2521_v40 = vunpack.c.h.s8.bf16 %v2380_v7  ;;  %v2517_v54 = vunpack.c.l.s8.bf16 %v2380_v7 }
 0x2e3   :  { %3186 = vmatprep.subr.bf16.mxu0 %v2992_v16  ;;  %3226 = vmatpush2.bf16.msra.mxu1 %v3059_v18  ;;  %v2766_v0 = vrot.slane %v4098_v61, %v4637_v10  ;;  %v2778_v16 = vpack.c.bf16 %v2770_v62, %v2770_v62  ;;  %v3040_v18 = vmul.bf16 %v5153_v15, %v2731_v14  ;;  %v2525_v62 = vunpack.c.l.s8.bf16 %v2384_v26 }
 0x2e4   :  { %3227 = vmatprep.subr.bf16.mxu1 %v3056_v49  ;;  %v2481_v49 = vld [vmem:[#allocation8 + $0x380] sm:$0xff]  ;;  %v2524_v14 = vunpack.c.l.s8.bf16 %v2383_v37  ;;  %v5347_v45 = vpack.c.bf16 %v2357_v46, %v2357_v46  ;;  %v2399_v46 = vld [vmem:[#allocation8 + $0xf0] sm:$0xff] }
 0x2e5   :  { %v2722_v43 = vunpack.c.l.s8.bf16 %v2481_v49 }
 0x2e6   :  { %3187 = vmatpush2.bf16.msra.mxu0 %v2991_v21  ;;  %v2972_v21 = vmul.bf16 %v5153_v15, %v2663_v51  ;;  %v2379_v51 = vld [vmem:[#allocation8 + $0x50] sm:$0xff] }
 0x2e7   :  { %3188 = vmatprep.subr.bf16.mxu0 %v2988_v22  ;;  %3228 = vmatpush2.bf16.msra.mxu1 %v3055_v27  ;;  %v2777_v22 = vpack.c.bf16 %v2766_v0, %v2766_v0  ;;  %v2801_v27 = vpack.i.b16 %v2778_v16, %v2778_v16  ;;  %v2520_v0 = vunpack.c.h.s8.bf16 %v2379_v51 }
 0x2e8   :  { %3229 = vmatprep.subr.bf16.mxu1 %v3052_v28  ;;  %v2726_v28 = vunpack.c.h.s8.bf16 %v2481_v49 }
 0x2e9   :  { %v2794_v19 = vpack.i.b16 %v2777_v22, %v2777_v22 }
 0x2ea   :  { %3189 = vmatpush2.bf16.msra.mxu0 %v2987_v32  ;;  %v2971_v32 = vmul.bf16 %v5159_v17, %v2662_v59 }
 0x2eb   :  { %3190 = vmatprep.subr.bf16.mxu0 %v2984_v58  ;;  %3230 = vmatpush2.bf16.msra.mxu1 %v3051_v34  ;;  %v2658_v58 = vunpack.c.l.s8.bf16 %v2449_v63  ;;  %v5334_v34 = vrot.slane %v2801_v27, %v4452_v3  ;;  %v5341_v25 = vrot.slane %v2794_v19, %v4452_v3  ;;  %v2512_v27 = vunpack.c.h.s8.bf16 %v2375_v24 }
 0x2ec   :  { %3231 = vmatprep.subr.bf16.mxu1 %v3048_v36  ;;  %v3035_v36 = vmul.bf16 %v5159_v17, %v2726_v28 }
 0x2ed   :  { %v2838_v57 = vmul.bf16 %v5334_v34, %v2529_v52  ;;  %v2833_v61 = vmul.bf16 %v5341_v25, %v2524_v14  ;;  %v2829_v59 = vmul.bf16 %v5341_v25, %v2520_v0  ;;  %v2826_v13 = vmul.bf16 %v5334_v34, %v2517_v54  ;;  %v2371_v52 = vld [vmem:[#allocation8 + $0x10] sm:$0xff] }
 0x2ee   :  { %3191 = vmatpush2.bf16.msra.mxu0 %v2983_v44  ;;  %v2593_v44 = vunpack.c.h.s8.bf16 %v5329_v39  ;;  %v2821_v31 = vmul.bf16 %v5341_v25, %v2512_v27  ;;  %v2504_v30 = vunpack.c.h.s8.bf16 %v2371_v52  ;;  %v2556_v14 = vunpack.c.l.s8.bf16 %v2399_v46 }
 0x2ef   :  { %3192 = vmatprep.subr.bf16.mxu0 %v2980_v42  ;;  %3232 = vmatpush2.bf16.msra.mxu1 %v3047_v6  ;;  %v2967_v42 = vmul.bf16 %v5159_v17, %v2658_v58  ;;  %v3031_v6 = vmul.bf16 %v5159_v17, %v2722_v43  ;;  %v2400_v43 = vld [vmem:[#allocation8 + $0xf8] sm:$0xff] }
 0x2f0   :  { %3233 = vmatprep.subr.bf16.mxu1 %v3044_v12  ;;  %v2902_v15 = vmul.bf16 %v5334_v34, %v2593_v44  ;;  %v2837_v12 = vmul.bf16 %v5341_v25, %v2528_v50  ;;  %v2500_v44 = vunpack.c.l.s8.bf16 %v2371_v52  ;;  %v2561_v50 = vunpack.c.h.s8.bf16 %v2400_v43 }
 0x2f1   :  { %v2557_v7 = vunpack.c.l.s8.bf16 %v2400_v43 }
 0x2f2   :  { %3193 = vmatpush2.bf16.msra.mxu0 %v2979_v11  ;;  %v2834_v11 = vmul.bf16 %v5334_v34, %v2525_v62  ;;  %v2560_v62 = vunpack.c.h.s8.bf16 %v2399_v46 }
 0x2f3   :  { %3194 = vmatprep.subr.bf16.mxu0 %v2976_v23  ;;  %3234 = vmatpush2.bf16.msra.mxu1 %v3043_v5  ;;  %v2830_v5 = vmul.bf16 %v5334_v34, %v2521_v40 }
 0x2f4   :  { %3235 = vmatprep.subr.bf16.mxu1 %v3040_v18  ;;  %v2376_v18 = vld [vmem:[#allocation8 + $0x38] sm:$0xff] }
 0x2f5   :  { %v2513_v22 = vunpack.c.h.s8.bf16 %v2376_v18  ;;  %v2509_v28 = vunpack.c.l.s8.bf16 %v2376_v18  ;;  %v2392_v18 = vld [vmem:[#allocation8 + $0xb8] sm:$0xff] }
 0x2f6   :  { %3195 = vmatpush2.bf16.msra.mxu0 %v2975_v38  ;;  %v2516_v38 = vunpack.c.l.s8.bf16 %v2379_v51  ;;  %v2395_v51 = vld [vmem:[#allocation8 + $0xd0] sm:$0xff] }
 0x2f7   :  { %3196 = vmatprep.subr.bf16.mxu0 %v2972_v21  ;;  %3236 = vmatpush2.bf16.msra.mxu1 %v3039_v4  ;;  %v2822_v4 = vmul.bf16 %v5334_v34, %v2513_v22  ;;  %v2552_v0 = vunpack.c.h.s8.bf16 %v2395_v51 }
 0x2f8   :  { %3237 = vmatprep.subr.bf16.mxu1 %v3036_v56  ;;  %v2825_v26 = vmul.bf16 %v5341_v25, %v2516_v38  ;;  %v2372_v56 = vld [vmem:[#allocation8 + $0x18] sm:$0xff]  ;;  %v2545_v38 = vunpack.c.h.s8.bf16 %v2392_v18 }
 0x2f9   :  { %v2505_v58 = vunpack.c.h.s8.bf16 %v2372_v56 }
 0x2fa   :  { %3197 = vmatpush2.bf16.msra.mxu0 %v2971_v32  ;;  %v2508_v32 = vunpack.c.l.s8.bf16 %v2375_v24  ;;  %v2854_v22 = vmul.bf16 %v5334_v34, %v2545_v38  ;;  %v2541_v24 = vunpack.c.l.s8.bf16 %v2392_v18  ;;  %v2415_v18 = vld [vmem:[#allocation8 + $0x170] sm:$0xff]  ;;  %v2440_v38 = vld [vmem:[#allocation8 + $0x238] sm:$0xff] }
 0x2fb   :  { %3198 = vmatprep.subr.bf16.mxu0 %v2968_v33  ;;  %3238 = vmatpush2.bf16.msra.mxu1 %v3035_v36  ;;  %v2818_v33 = vmul.bf16 %v5334_v34, %v2509_v28  ;;  %v2814_v37 = vmul.bf16 %v5334_v34, %v2505_v58  ;;  %v2501_v36 = vunpack.c.l.s8.bf16 %v2372_v56 }
 0x2fc   :  { %3239 = vmatprep.subr.bf16.mxu1 %v3032_v48  ;;  %v2817_v19 = vmul.bf16 %v5341_v25, %v2508_v32  ;;  %v2813_v48 = vmul.bf16 %v5341_v25, %v2504_v30  ;;  %v2850_v28 = vmul.bf16 %v5334_v34, %v2541_v24 }
 0x2fe   :  { %3199 = vmatpush2.bf16.msra.mxu0 %v2967_v42  ;;  %v2810_v42 = vmul.bf16 %v5334_v34, %v2501_v36 }
 0x2ff   :  { %3250 = vmatprep.subr.bf16.mxu0 %v2838_v57  ;;  %3240 = vmatpush2.bf16.msra.mxu1 %v3031_v6  ;;  %v2809_v57 = vmul.bf16 %v5341_v25, %v2500_v44  ;;  %v2870_v6 = vmul.bf16 %v5334_v34, %v2561_v50  ;;  %v1684_v44 = vrot.slane %v5242_v53, %v1064_v9 }
 0x300   :  { %3291 = vmatprep.subr.bf16.mxu1 %v2902_v15  ;;  %v2396_v15 = vld [vmem:[#allocation8 + $0xd8] sm:$0xff] }
 0x301   :  { %v5350_v63 = vpop.f32.mrf.mxu0  ;;  %v5352_v17 = vpop.f32.mrf.mxu1  ;;  %3201 = vmatmul.mubr.bf16.vlgmr.msra.gmra.mxu0 %v5347_v45  ;;  %v2553_v40 = vunpack.c.h.s8.bf16 %v2396_v15  ;;  %v2549_v54 = vunpack.c.l.s8.bf16 %v2396_v15 }
 0x302   :  { %3251 = vmatpush1.bf16.msra.mxu0 %v2837_v12  ;;  %3282 = vmatprep.mubr.bf16.mxu0 %v5169_v29  ;;  %v2869_v12 = vmul.bf16 %v5341_v25, %v2560_v62 }
 0x303   :  { %v5357_v23 = vpop.f32.mrf.mxu0  ;;  %v5359_v16 = vpop.f32.mrf.mxu1  ;;  %3252 = vmatprep.subr.bf16.mxu0 %v2834_v11  ;;  %v2866_v11 = vmul.bf16 %v5334_v34, %v2557_v7  ;;  %v2444_v7 = vld [vmem:[#allocation8 + $0x258] sm:$0xff] }
 0x305   :  { %v2227_v41 = vpop.f32.mrf.mxu0  ;;  %v2268_v49 = vpop.f32.mrf.mxu1 }
 0x306   :  { %3253 = vmatpush1.bf16.msra.mxu0 %v2833_v61  ;;  %v2865_v61 = vmul.bf16 %v5341_v25, %v2556_v14  ;;  %v2861_v41 = vmul.bf16 %v5341_v25, %v2552_v0  ;;  %v2548_v49 = vunpack.c.l.s8.bf16 %v2395_v51 }
 0x307   :  { %v2228_v21 = vpop.f32.mrf.mxu0  ;;  %v2269_v29 = vpop.f32.mrf.mxu1  ;;  %3254 = vmatprep.subr.bf16.mxu0 %v2830_v5  ;;  %v2862_v5 = vmul.bf16 %v5334_v34, %v2553_v40 }
 0x308   :  { %v2391_v21 = vld [vmem:[#allocation8 + $0xb0] sm:$0xff]  ;;  %v2857_v29 = vmul.bf16 %v5341_v25, %v2548_v49 }
 0x30a   :  { %3255 = vmatpush1.bf16.msra.mxu0 %v2829_v59  ;;  %v2858_v59 = vmul.bf16 %v5334_v34, %v2549_v54 }
 0x30b   :  { %3256 = vmatprep.subr.bf16.mxu0 %v2826_v13  ;;  %v2544_v13 = vunpack.c.h.s8.bf16 %v2391_v21 }
 0x30d   :  { %v2853_v27 = vmul.bf16 %v5341_v25, %v2544_v13 }
 0x30e   :  { %3257 = vmatpush1.bf16.msra.mxu0 %v2825_v26  ;;  %v2388_v26 = vld [vmem:[#allocation8 + $0x98] sm:$0xff] }
 0x30f   :  { %3258 = vmatprep.subr.bf16.mxu0 %v2822_v4  ;;  %v2540_v4 = vunpack.c.l.s8.bf16 %v2391_v21  ;;  %v2537_v56 = vunpack.c.h.s8.bf16 %v2388_v26  ;;  %v2533_v52 = vunpack.c.l.s8.bf16 %v2388_v26 }
 0x311   :  { %v2849_v32 = vmul.bf16 %v5341_v25, %v2540_v4  ;;  %v2846_v58 = vmul.bf16 %v5334_v34, %v2537_v56  ;;  %v2842_v36 = vmul.bf16 %v5334_v34, %v2533_v52  ;;  %v2439_v56 = vld [vmem:[#allocation8 + $0x230] sm:$0xff]  ;;  %v2588_v52 = vunpack.c.l.s8.bf16 %v2415_v18 }
 0x312   :  { %3259 = vmatpush1.bf16.msra.mxu0 %v2821_v31  ;;  %v2387_v31 = vld [vmem:[#allocation8 + $0x90] sm:$0xff] }
 0x313   :  { %3260 = vmatprep.subr.bf16.mxu0 %v2818_v33  ;;  %v2536_v33 = vunpack.c.h.s8.bf16 %v2387_v31 }
 0x315   :  { %v2845_v30 = vmul.bf16 %v5341_v25, %v2536_v33 }
 0x316   :  { %3261 = vmatpush1.bf16.msra.mxu0 %v2817_v19  ;;  %v2448_v19 = vld [vmem:[#allocation8 + $0x278] sm:$0xff] }
 0x317   :  { %3262 = vmatprep.subr.bf16.mxu0 %v2814_v37  ;;  %v2532_v37 = vunpack.c.l.s8.bf16 %v2387_v31  ;;  %v2657_v43 = vunpack.c.h.s8.bf16 %v2448_v19  ;;  %v2653_v62 = vunpack.c.l.s8.bf16 %v2448_v19  ;;  %v2412_v31 = vld [vmem:[#allocation8 + $0x158] sm:$0xff] }
 0x319   :  { %v2841_v50 = vmul.bf16 %v5341_v25, %v2532_v37  ;;  %v2962_v1 = vmul.bf16 %v5334_v34, %v2653_v62  ;;  %v2640_v37 = vunpack.c.h.s8.bf16 %v2439_v56  ;;  %v2636_v62 = vunpack.c.l.s8.bf16 %v2439_v56 }
 0x31a   :  { %3263 = vmatpush1.bf16.msra.mxu0 %v2813_v48  ;;  %v2447_v48 = vld [vmem:[#allocation8 + $0x270] sm:$0xff] }
 0x31b   :  { %3264 = vmatprep.subr.bf16.mxu0 %v2810_v42  ;;  %v1688_v42 = vrot.slane %v5242_v53, %v1068_v55  ;;  %v2656_v46 = vunpack.c.h.s8.bf16 %v2447_v48  ;;  %v2649_v55 = vunpack.c.h.s8.bf16 %v2444_v7  ;;  %v2443_v53 = vld [vmem:[#allocation8 + $0x250] sm:$0xff] }
 0x31d   :  { %v2226_v15 = vadd.f32 %v5357_v23, %v1688_v42  ;;  %v2965_v9 = vmul.bf16 %v5341_v25, %v2656_v46  ;;  %v2958_v54 = vmul.bf16 %v5334_v34, %v2649_v55  ;;  %v2897_v42 = vmul.bf16 %v5341_v25, %v2588_v52 }
 0x31e   :  { %3265 = vmatpush1.bf16.msra.mxu0 %v2809_v57  ;;  %v2966_v57 = vmul.bf16 %v5334_v34, %v2657_v43  ;;  %v2949_v46 = vmul.bf16 %v5341_v25, %v2640_v37  ;;  %v2945_v55 = vmul.bf16 %v5341_v25, %v2636_v62  ;;  %v2459_v37 = vld [vmem:[#allocation8 + $0x2d0] sm:$0xff] }
 0x31f   :  { %3266 = vmatprep.subr.bf16.mxu0 %v2870_v6  ;;  %v2224_v6 = vadd.f32 %v5350_v63, %v1684_v44  ;;  %v2267_v63 = vadd.f32 %v5359_v16, %v2226_v15  ;;  %v2436_v44 = vld [vmem:[#allocation8 + $0x218] sm:$0xff] }
 0x320   :  { %v2633_v15 = vunpack.c.h.s8.bf16 %v2436_v44 }
 0x321   :  { %v2265_v14 = vadd.f32 %v5352_v17, %v2224_v6  ;;  %v2645_v17 = vunpack.c.l.s8.bf16 %v2444_v7  ;;  %v2581_v6 = vunpack.c.l.s8.bf16 %v2412_v31 }
 0x322   :  { %3267 = vmatpush2.bf16.msra.mxu0 %v2869_v12  ;;  %v2652_v12 = vunpack.c.l.s8.bf16 %v2447_v48  ;;  %v2637_v48 = vunpack.c.l.s8.bf16 %v2440_v38 }
 0x323   :  { %3268 = vmatprep.subr.bf16.mxu0 %v2866_v11  ;;  %v2954_v26 = vmul.bf16 %v5334_v34, %v2645_v17 }
 0x324   :  { %v2961_v23 = vmul.bf16 %v5341_v25, %v2652_v12  ;;  %v2946_v7 = vmul.bf16 %v5334_v34, %v2637_v48  ;;  %v2408_v12 = vld [vmem:[#allocation8 + $0x138] sm:$0xff] }
 0x325   :  { %v2573_v17 = vunpack.c.l.s8.bf16 %v2408_v12 }
 0x326   :  { %3269 = vmatpush2.bf16.msra.mxu0 %v2865_v61  ;;  %v2648_v61 = vunpack.c.h.s8.bf16 %v2443_v53 }
 0x327   :  { %3270 = vmatprep.subr.bf16.mxu0 %v2862_v5 }
 0x328   :  { %v2957_v21 = vmul.bf16 %v5341_v25, %v2648_v61 }
 0x32a   :  { %3271 = vmatpush2.bf16.msra.mxu0 %v2861_v41 }
 0x32b   :  { %3272 = vmatprep.subr.bf16.mxu0 %v2858_v59 }
 0x32e   :  { %3273 = vmatpush2.bf16.msra.mxu0 %v2857_v29  ;;  %v2644_v29 = vunpack.c.l.s8.bf16 %v2443_v53  ;;  %v2890_v53 = vmul.bf16 %v5334_v34, %v2581_v6  ;;  %v2456_v6 = vld [vmem:[#allocation8 + $0x2b8] sm:$0xff] }
 0x32f   :  { %3274 = vmatprep.subr.bf16.mxu0 %v2854_v22 }
 0x332   :  { %3275 = vmatpush2.bf16.msra.mxu0 %v2853_v27  ;;  %v2589_v27 = vunpack.c.l.s8.bf16 %v5329_v39  ;;  %v2411_v39 = vld [vmem:[#allocation8 + $0x150] sm:$0xff] }
 0x333   :  { %3276 = vmatprep.subr.bf16.mxu0 %v2850_v28  ;;  %v2641_v28 = vunpack.c.h.s8.bf16 %v2440_v38 }
 0x335   :  { %v2950_v43 = vmul.bf16 %v5334_v34, %v2641_v28 }
 0x336   :  { %3277 = vmatpush2.bf16.msra.mxu0 %v2849_v32 }
 0x337   :  { %3278 = vmatprep.subr.bf16.mxu0 %v2846_v58  ;;  %v2953_v58 = vmul.bf16 %v5341_v25, %v2644_v29 }
 0x33a   :  { %3279 = vmatpush2.bf16.msra.mxu0 %v2845_v30  ;;  %v2898_v30 = vmul.bf16 %v5334_v34, %v2589_v27  ;;  %v2460_v27 = vld [vmem:[#allocation8 + $0x2d8] sm:$0xff] }
 0x33b   :  { %3280 = vmatprep.subr.bf16.mxu0 %v2842_v36  ;;  %v2585_v36 = vunpack.c.h.s8.bf16 %v2412_v31  ;;  %v2677_v62 = vunpack.c.l.s8.bf16 %v2460_v27 }
 0x33e   :  { %3281 = vmatpush2.bf16.msra.mxu0 %v2841_v50  ;;  %v2584_v50 = vunpack.c.h.s8.bf16 %v2411_v39 }
 0x33f   :  { %3332 = vmatprep.subr.bf16.mxu0 %v2966_v57  ;;  %v2894_v57 = vmul.bf16 %v5334_v34, %v2585_v36  ;;  %v2432_v36 = vld [vmem:[#allocation8 + $0x1f8] sm:$0xff] }
 0x341   :  { %v2305_v11 = vpop.f32.mrf.mxu0  ;;  %v2346_v40 = vpop.f32.mrf.mxu1  ;;  %3283 = vmatmul.mubr.bf16.vlgmr.msra.gmra.mxu0 %v5252_v60 }
 0x342   :  { %v2306_v51 = vadd.f32 %v2305_v11, %v2265_v14  ;;  %3333 = vmatpush1.bf16.msra.mxu0 %v2965_v9  ;;  %3364 = vmatprep.mubr.bf16.mxu0 %v5276_v35  ;;  %v2592_v35 = vunpack.c.h.s8.bf16 %v2415_v18  ;;  %v2435_v9 = vld [vmem:[#allocation8 + $0x210] sm:$0xff]  ;;  %v2577_v11 = vunpack.c.h.s8.bf16 %v2408_v12 }
 0x343   :  { %v2307_v0 = vpop.f32.mrf.mxu0  ;;  %v2348_v5 = vpop.f32.mrf.mxu1  ;;  %3334 = vmatprep.subr.bf16.mxu0 %v2962_v1  ;;  %v2580_v1 = vunpack.c.l.s8.bf16 %v2411_v39  ;;  %v2632_v14 = vunpack.c.h.s8.bf16 %v2435_v9  ;;  %v2628_v18 = vunpack.c.l.s8.bf16 %v2435_v9 }
 0x344   :  { %v2347_v41 = vadd.f32 %v2346_v40, %v2306_v51  ;;  %v2308_v49 = vadd.f32 %v2307_v0, %v2267_v63  ;;  %v2901_v33 = vmul.bf16 %v5341_v25, %v2592_v35  ;;  %v2407_v40 = vld [vmem:[#allocation8 + $0x130] sm:$0xff]  ;;  %v2942_v63 = vmul.bf16 %v5334_v34, %v2633_v15 }
 0x345   :  { %v2309_v59 = vpop.f32.mrf.mxu0  ;;  %v2350_v60 = vpop.f32.mrf.mxu1  ;;  %v2629_v51 = vunpack.c.l.s8.bf16 %v2436_v44  ;;  %v2889_v61 = vmul.bf16 %v5341_v25, %v2580_v1  ;;  %v2576_v0 = vunpack.c.h.s8.bf16 %v2407_v40  ;;  %v2882_v35 = vmul.bf16 %v5334_v34, %v2573_v17 }
 0x346   :  { %v2349_v16 = vadd.f32 %v2348_v5, %v2308_v49  ;;  %3335 = vmatpush1.bf16.msra.mxu0 %v2961_v23  ;;  %v2359_v13 = vmax.f32 %v2347_v41, 0.0  ;;  %v2464_v23 = vld [vmem:[#allocation8 + $0x2f8] sm:$0xff]  ;;  %v2941_v5 = vmul.bf16 %v5341_v25, %v2632_v14  ;;  %v2463_v59 = vld [vmem:[#allocation8 + $0x2f0] sm:$0xff]  ;;  %v2621_v1 = vunpack.c.l.s8.bf16 %v2432_v36 }
 0x347   :  { %v2310_v22 = vpop.f32.mrf.mxu0  ;;  %v2351_v24 = vpop.f32.mrf.mxu1  ;;  %3336 = vmatprep.subr.bf16.mxu0 %v2958_v54  ;;  %v2886_v54 = vmul.bf16 %v5334_v34, %v2577_v11  ;;  %v2938_v41 = vmul.bf16 %v5334_v34, %v2629_v51  ;;  %v2689_v49 = vunpack.c.h.s8.bf16 %v2464_v23  ;;  %v2404_v60 = vld [vmem:[#allocation8 + $0x118] sm:$0xff]  ;;  %v2885_v38 = vmul.bf16 %v5341_v25, %v2576_v0  ;;  %v2455_v14 = vld [vmem:[#allocation8 + $0x2b0] sm:$0xff] }
 0x348   :  { %v2360_v4 = vmax.f32 %v2349_v16, 0.0  ;;  %v5413_v19 = vpack.c.bf16 %v2359_v13, %v2359_v13  ;;  %v2572_v16 = vunpack.c.l.s8.bf16 %v2407_v40  ;;  %v2688_v29 = vunpack.c.h.s8.bf16 %v2463_v59  ;;  %v2403_v22 = vld [vmem:[#allocation8 + $0x110] sm:$0xff]  ;;  %v2428_v11 = vld [vmem:[#allocation8 + $0x1d8] sm:$0xff] }
 0x349   :  { %v2569_v13 = vunpack.c.h.s8.bf16 %v2404_v60  ;;  %v2998_v24 = vmul.bf16 %v5334_v34, %v2689_v49  ;;  %v2568_v28 = vunpack.c.h.s8.bf16 %v2403_v22  ;;  %v3454_v40 = vld [vmem:[%s5678_s6] ss:$2 sm:$0x3]  ;;  %v2672_v0 = vunpack.c.h.s8.bf16 %v2455_v14  ;;  %v2452_v49 = vld [vmem:[#allocation8 + $0x298] sm:$0xff] }
 0x34a   :  { %v5409_v32 = vpack.c.bf16 %v2360_v4, %v2360_v4  ;;  %3337 = vmatpush1.bf16.msra.mxu0 %v2957_v21  ;;  %v2937_v21 = vmul.bf16 %v5341_v25, %v2628_v18  ;;  %v2881_v4 = vmul.bf16 %v5341_v25, %v2572_v16  ;;  %v2997_v56 = vmul.bf16 %v5341_v25, %v2688_v29 }
 0x34b   :  { %3338 = vmatprep.subr.bf16.mxu0 %v2954_v26  ;;  %v2685_v26 = vunpack.c.l.s8.bf16 %v2464_v23  ;;  %v2878_v31 = vmul.bf16 %v5334_v34, %v2569_v13  ;;  %v2877_v39 = vmul.bf16 %v5341_v25, %v2568_v28  ;;  %v2669_v17 = vunpack.c.l.s8.bf16 %v2456_v6 }
 0x34c   :  { %3241 = vmatprep.mubr.bf16.mxu1 %v5409_v32  ;;  %v2981_v16 = vmul.bf16 %v5341_v25, %v2672_v0  ;;  %v3523_v29 = vrot.slane %v3454_v40, %v4452_v3  ;;  %v3427_v0 = vld [vmem:[#allocation11 + $0x28] sm:$0xff] }
 0x34d   :  { %3242 = vmatmul.mubr.bf16.vlgmr.msra.gmra.mxu1 %v5413_v19  ;;  %v2994_v52 = vmul.bf16 %v5334_v34, %v2685_v26  ;;  %v2978_v13 = vmul.bf16 %v5334_v34, %v2669_v17  ;;  %v2424_v26 = vld [vmem:[#allocation8 + $0x1b8] sm:$0xff] }
 0x34e   :  { %3292 = vmatpush1.bf16.msra.mxu1 %v2901_v33  ;;  %3323 = vmatprep.mubr.bf16.mxu1 %v5173_v8  ;;  %v2893_v8 = vmul.bf16 %v5341_v25, %v2584_v50  ;;  %v2684_v33 = vunpack.c.l.s8.bf16 %v2463_v59  ;;  %v2625_v50 = vunpack.c.h.s8.bf16 %v2432_v36  ;;  %v2661_v36 = vunpack.c.l.s8.bf16 %v2452_v49 }
 0x34f   :  { %3339 = vmatpush1.bf16.msra.mxu0 %v2953_v58  ;;  %3293 = vmatprep.subr.bf16.mxu1 %v2898_v30  ;;  %v2565_v58 = vunpack.c.l.s8.bf16 %v2404_v60  ;;  %v2681_v30 = vunpack.c.h.s8.bf16 %v2460_v27 }
 0x350   :  { %3340 = vmatprep.subr.bf16.mxu0 %v2950_v43  ;;  %v2564_v43 = vunpack.c.l.s8.bf16 %v2403_v22  ;;  %v2993_v48 = vmul.bf16 %v5341_v25, %v2684_v33  ;;  %v2934_v12 = vmul.bf16 %v5334_v34, %v2625_v50  ;;  %v2665_v22 = vunpack.c.h.s8.bf16 %v2452_v49 }
 0x351   :  { %v2874_v44 = vmul.bf16 %v5334_v34, %v2565_v58  ;;  %v2609_v58 = vunpack.c.h.s8.bf16 %v2424_v26 }
 0x352   :  { %3294 = vmatpush1.bf16.msra.mxu1 %v2897_v42  ;;  %v2680_v42 = vunpack.c.h.s8.bf16 %v2459_v37 }
 0x353   :  { %3341 = vmatpush1.bf16.msra.mxu0 %v2949_v46  ;;  %3295 = vmatprep.subr.bf16.mxu1 %v2894_v57  ;;  %v2431_v46 = vld [vmem:[#allocation8 + $0x1f0] sm:$0xff]  ;;  %v2990_v57 = vmul.bf16 %v5334_v34, %v2681_v30  ;;  %v3530_v30 = vpack.c.bf16 %v3523_v29, %v3523_v29 }
 0x354   :  { %3342 = vmatprep.subr.bf16.mxu0 %v2946_v7  ;;  %v2873_v7 = vmul.bf16 %v5341_v25, %v2564_v43  ;;  %v2624_v15 = vunpack.c.h.s8.bf16 %v2431_v46  ;;  %v2989_v9 = vmul.bf16 %v5341_v25, %v2680_v42  ;;  %v2620_v51 = vunpack.c.l.s8.bf16 %v2431_v46  ;;  %v3429_v43 = vld [vmem:[#allocation11 + $0x38] sm:$0xff] }
 0x355   :  { %v2918_v46 = vmul.bf16 %v5334_v34, %v2609_v58 }
 0x356   :  { %3296 = vmatpush1.bf16.msra.mxu1 %v2893_v8  ;;  %v2676_v8 = vunpack.c.l.s8.bf16 %v2459_v37  ;;  %v2929_v59 = vmul.bf16 %v5341_v25, %v2620_v51  ;;  %v2974_v37 = vmul.bf16 %v5334_v34, %v2665_v22 }
 0x357   :  { %3343 = vmatpush1.bf16.msra.mxu0 %v2945_v55  ;;  %3297 = vmatprep.subr.bf16.mxu1 %v2890_v53  ;;  %v2986_v55 = vmul.bf16 %v5334_v34, %v2677_v62  ;;  %v2673_v53 = vunpack.c.h.s8.bf16 %v2456_v6  ;;  %v3533_v62 = vpack.i.b16 %v3530_v30, %v3530_v30  ;;  %v2970_v6 = vmul.bf16 %v5334_v34, %v2661_v36 }
 0x358   :  { %3344 = vmatprep.subr.bf16.mxu0 %v2942_v63  ;;  %v2933_v63 = vmul.bf16 %v5341_v25, %v2624_v15  ;;  %v2985_v23 = vmul.bf16 %v5341_v25, %v2676_v8  ;;  %v3470_v15 = vunpack.c.h.s8.bf16 %v3429_v43 }
 0x359   :  { %v2982_v18 = vmul.bf16 %v5334_v34, %v2673_v53  ;;  %v5478_v51 = vrot.slane %v3533_v62, %v4452_v3 }
 0x35a   :  { %3298 = vmatpush1.bf16.msra.mxu1 %v2889_v61  ;;  %v2930_v61 = vmul.bf16 %v5334_v34, %v2621_v1 }
 0x35b   :  { %3345 = vmatpush1.bf16.msra.mxu0 %v2941_v5  ;;  %3299 = vmatprep.subr.bf16.mxu1 %v2886_v54  ;;  %v2617_v5 = vunpack.c.h.s8.bf16 %v2428_v11  ;;  %v2427_v54 = vld [vmem:[#allocation8 + $0x1d0] sm:$0xff] }
 0x35c   :  { %3346 = vmatprep.subr.bf16.mxu0 %v2938_v41  ;;  %v3527_v41 = vrot.slane %v3454_v40, %v4449_v2  ;;  %v2616_v60 = vunpack.c.h.s8.bf16 %v2427_v54  ;;  %v2419_v40 = vld [vmem:[#allocation8 + $0x190] sm:$0xff] }
 0x35e   :  { %3300 = vmatpush1.bf16.msra.mxu1 %v2885_v38  ;;  %v2668_v38 = vunpack.c.l.s8.bf16 %v2455_v14  ;;  %v3531_v27 = vpack.c.bf16 %v3527_v41, %v3527_v41  ;;  %v5475_v14 = vld [vmem:[#allocation10 + $0x1] ss:$2 sm:$0xf] }
 0x35f   :  { %3347 = vmatpush1.bf16.msra.mxu0 %v2937_v21  ;;  %3301 = vmatprep.subr.bf16.mxu1 %v2882_v35  ;;  %v2926_v21 = vmul.bf16 %v5334_v34, %v2617_v5  ;;  %v2613_v35 = vunpack.c.l.s8.bf16 %v2428_v11  ;;  %v3069_v5 = vrot.slane %v5475_v14, %v4452_v3 }
 0x360   :  { %3348 = vmatprep.subr.bf16.mxu0 %v2998_v24  ;;  %v2451_v24 = vld [vmem:[#allocation8 + $0x290] sm:$0xff]  ;;  %v2977_v28 = vmul.bf16 %v5341_v25, %v2668_v38  ;;  %v2480_v38 = vld [vmem:[#allocation8 + $0x378] sm:$0xff] }
 0x361   :  { %v2664_v33 = vunpack.c.h.s8.bf16 %v2451_v24  ;;  %v2660_v42 = vunpack.c.l.s8.bf16 %v2451_v24 }
 0x362   :  { %3302 = vmatpush1.bf16.msra.mxu1 %v2881_v4  ;;  %v2925_v4 = vmul.bf16 %v5341_v25, %v2616_v60  ;;  %v3073_v60 = vrot.slane %v5475_v14, %v4449_v2 }
 0x363   :  { %3349 = vmatpush2.bf16.msra.mxu0 %v2997_v56  ;;  %3303 = vmatprep.subr.bf16.mxu1 %v2878_v31  ;;  %v2612_v56 = vunpack.c.l.s8.bf16 %v2427_v54  ;;  %v2922_v31 = vmul.bf16 %v5334_v34, %v2613_v35  ;;  %v2973_v50 = vmul.bf16 %v5341_v25, %v2664_v33  ;;  %v2969_v1 = vmul.bf16 %v5341_v25, %v2660_v42  ;;  %v3426_v35 = vld [vmem:[#allocation11 + $0x20] sm:$0xff] }
 0x364   :  { %3350 = vmatprep.subr.bf16.mxu0 %v2994_v52  ;;  %v2423_v52 = vld [vmem:[#allocation8 + $0x1b0] sm:$0xff]  ;;  %v3465_v33 = vunpack.c.h.s8.bf16 %v3426_v35 }
 0x366   :  { %3304 = vmatpush1.bf16.msra.mxu1 %v2877_v39  ;;  %v3540_v39 = vpack.i.b16 %v3531_v27, %v3531_v27  ;;  %v3556_v62 = vmul.bf16 %v5478_v51, %v3465_v33 }
 0x367   :  { %3351 = vmatpush2.bf16.msra.mxu0 %v2993_v48  ;;  %3305 = vmatprep.subr.bf16.mxu1 %v2874_v44  ;;  %v2921_v48 = vmul.bf16 %v5341_v25, %v2612_v56  ;;  %v2608_v44 = vunpack.c.h.s8.bf16 %v2423_v52  ;;  %v2479_v56 = vld [vmem:[#allocation8 + $0x370] sm:$0xff] }
 0x368   :  { %3352 = vmatprep.subr.bf16.mxu0 %v2990_v57  ;;  %v2605_v57 = vunpack.c.l.s8.bf16 %v2424_v26  ;;  %v2596_v26 = vunpack.c.l.s8.bf16 %v2419_v40  ;;  %v2720_v42 = vunpack.c.h.s8.bf16 %v2479_v56 }
 0x369   :  { %v2917_v8 = vmul.bf16 %v5341_v25, %v2608_v44 }
 0x36a   :  { %3306 = vmatpush1.bf16.msra.mxu1 %v2873_v7  ;;  %v2420_v7 = vld [vmem:[#allocation8 + $0x198] sm:$0xff]  ;;  %v2914_v53 = vmul.bf16 %v5334_v34, %v2605_v57  ;;  %v2905_v44 = vmul.bf16 %v5341_v25, %v2596_v26  ;;  %v2717_v57 = vunpack.c.l.s8.bf16 %v2480_v38 }
 0x36b   :  { %3353 = vmatpush2.bf16.msra.mxu0 %v2989_v9  ;;  %3307 = vmatprep.subr.bf16.mxu1 %v2934_v12  ;;  %v5470_v9 = vrot.slane %v3540_v39, %v4452_v3  ;;  %v3428_v12 = vld [vmem:[#allocation11 + $0x30] sm:$0xff]  ;;  %v2601_v11 = vunpack.c.h.s8.bf16 %v2420_v7  ;;  %v2597_v41 = vunpack.c.l.s8.bf16 %v2420_v7  ;;  %v3425_v39 = vld [vmem:[#allocation11 + $0x18] sm:$0xff] }
 0x36c   :  { %3354 = vmatprep.subr.bf16.mxu0 %v2986_v55  ;;  %v2604_v55 = vunpack.c.l.s8.bf16 %v2423_v52 }
 0x36d   :  { %v2910_v17 = vmul.bf16 %v5334_v34, %v2601_v11  ;;  %v3026_v11 = vmul.bf16 %v5334_v34, %v2717_v57  ;;  %v2467_v57 = vld [vmem:[#allocation8 + $0x310] sm:$0xff] }
 0x36e   :  { %3308 = vmatpush2.bf16.msra.mxu1 %v2933_v63  ;;  %v3469_v63 = vunpack.c.h.s8.bf16 %v3428_v12  ;;  %v2913_v54 = vmul.bf16 %v5341_v25, %v2604_v55  ;;  %v3029_v55 = vmul.bf16 %v5341_v25, %v2720_v42 }
 0x36f   :  { %3355 = vmatpush2.bf16.msra.mxu0 %v2985_v23  ;;  %3309 = vmatprep.subr.bf16.mxu1 %v2930_v61  ;;  %v3561_v23 = vmul.bf16 %v5470_v9, %v3470_v15  ;;  %v3468_v61 = vunpack.c.l.s8.bf16 %v3429_v43  ;;  %v2476_v15 = vld [vmem:[#allocation8 + $0x358] sm:$0xff] }
 0x370   :  { %3356 = vmatprep.subr.bf16.mxu0 %v2982_v18  ;;  %v2600_v18 = vunpack.c.h.s8.bf16 %v2419_v40  ;;  %v3560_v49 = vmul.bf16 %v5478_v51, %v3469_v63  ;;  %v2713_v40 = vunpack.c.h.s8.bf16 %v2476_v15  ;;  %v2475_v63 = vld [vmem:[#allocation8 + $0x350] sm:$0xff] }
 0x372   :  { %3310 = vmatpush2.bf16.msra.mxu1 %v2929_v59  ;;  %v3467_v59 = vunpack.c.l.s8.bf16 %v3428_v12  ;;  %v2909_v24 = vmul.bf16 %v5341_v25, %v2600_v18 }
 0x373   :  { %3357 = vmatpush2.bf16.msra.mxu0 %v2981_v16  ;;  %3311 = vmatprep.subr.bf16.mxu1 %v2926_v21  ;;  %v3559_v16 = vmul.bf16 %v5470_v9, %v3468_v61  ;;  %v3466_v21 = vunpack.c.h.s8.bf16 %v3427_v0 }
 0x374   :  { %3358 = vmatprep.subr.bf16.mxu0 %v2978_v13 }
 0x376   :  { %3312 = vmatpush2.bf16.msra.mxu1 %v2925_v4  ;;  %v2906_v4 = vmul.bf16 %v5334_v34, %v2597_v41  ;;  %v3022_v41 = vmul.bf16 %v5334_v34, %v2713_v40 }
 0x377   :  { %3359 = vmatpush2.bf16.msra.mxu0 %v2977_v28  ;;  %3313 = vmatprep.subr.bf16.mxu1 %v2922_v31  ;;  %v2721_v28 = vunpack.c.h.s8.bf16 %v2480_v38  ;;  %v3558_v31 = vmul.bf16 %v5478_v51, %v3467_v59  ;;  %v2472_v38 = vld [vmem:[#allocation8 + $0x338] sm:$0xff] }
 0x378   :  { %3360 = vmatprep.subr.bf16.mxu0 %v2974_v37  ;;  %v3464_v37 = vunpack.c.l.s8.bf16 %v3427_v0 }
 0x37a   :  { %3314 = vmatpush2.bf16.msra.mxu1 %v2921_v48  ;;  %v3555_v12 = vmul.bf16 %v5470_v9, %v3464_v37  ;;  %v2468_v37 = vld [vmem:[#allocation8 + $0x318] sm:$0xff] }
 0x37b   :  { %3361 = vmatpush2.bf16.msra.mxu0 %v2973_v50  ;;  %3315 = vmatprep.subr.bf16.mxu1 %v2918_v46  ;;  %v3030_v46 = vmul.bf16 %v5334_v34, %v2721_v28  ;;  %v3437_v28 = vld [vmem:[#allocation11 + $0x78] sm:$0xff] }
 0x37c   :  { %3362 = vmatprep.subr.bf16.mxu0 %v2970_v6  ;;  %v3463_v6 = vunpack.c.l.s8.bf16 %v3426_v35  ;;  %v2708_v35 = vunpack.c.l.s8.bf16 %v2475_v63 }
 0x37e   :  { %3316 = vmatpush2.bf16.msra.mxu1 %v2917_v8  ;;  %v3462_v8 = vunpack.c.h.s8.bf16 %v3425_v39 }
 0x37f   :  { %3363 = vmatpush2.bf16.msra.mxu0 %v2969_v1  ;;  %3317 = vmatprep.subr.bf16.mxu1 %v2914_v53  ;;  %v3424_v1 = vld [vmem:[#allocation11 + $0x10] sm:$0xff]  ;;  %v2716_v53 = vunpack.c.l.s8.bf16 %v2479_v56  ;;  %v3017_v56 = vmul.bf16 %v5341_v25, %v2708_v35 }
 0x380   :  { %3623 = vmatprep.subr.bf16.mxu0 %v3561_v23  ;;  %v3554_v23 = vmul.bf16 %v5478_v51, %v3463_v6  ;;  %v3461_v61 = vunpack.c.h.s8.bf16 %v3424_v1  ;;  %v3553_v0 = vmul.bf16 %v5470_v9, %v3462_v8 }
 0x381   :  { %v3120_v29 = vpop.f32.mrf.mxu0  ;;  %v3025_v18 = vmul.bf16 %v5341_v25, %v2716_v53  ;;  %v2693_v53 = vunpack.c.l.s8.bf16 %v2468_v37 }
 0x382   :  { %v3121_v13 = vadd.f32 %v3120_v29, %v3069_v5  ;;  %v3161_v22 = vpop.f32.mrf.mxu1  ;;  %3318 = vmatpush2.bf16.msra.mxu1 %v2913_v54  ;;  %3365 = vmatmul.mubr.bf16.vlgmr.msra.gmra.mxu0 %v5347_v45  ;;  %v3557_v45 = vmul.bf16 %v5470_v9, %v3466_v21  ;;  %v3460_v5 = vunpack.c.l.s8.bf16 %v3425_v39  ;;  %v3423_v54 = vld [vmem:[#allocation11 + $0x8] sm:$0xff]  ;;  %v3552_v59 = vmul.bf16 %v5478_v51, %v3461_v61  ;;  %v3422_v21 = vld [vmem:[#allocation11] sm:$0xff] }
 0x383   :  { %v3122_v27 = vpop.f32.mrf.mxu0  ;;  %3319 = vmatprep.subr.bf16.mxu1 %v2910_v17  ;;  %3624 = vmatpush1.bf16.msra.mxu0 %v3560_v49  ;;  %v2712_v17 = vunpack.c.h.s8.bf16 %v2475_v63  ;;  %v2709_v49 = vunpack.c.l.s8.bf16 %v2476_v15  ;;  %v3457_v26 = vunpack.c.h.s8.bf16 %v3422_v21  ;;  %v3486_v39 = vunpack.c.h.s8.bf16 %v3437_v28  ;;  %v2496_v63 = vld [vmem:[#allocation8 + $0x3f8] sm:$0xff] }
 0x384   :  { %v5493_v58 = vadd.f32 %v3161_v22, %v3121_v13  ;;  %v3123_v52 = vadd.f32 %v3122_v27, %v3073_v60  ;;  %v3163_v30 = vpop.f32.mrf.mxu1  ;;  %3625 = vmatprep.subr.bf16.mxu0 %v3559_v16  ;;  %v3459_v60 = vunpack.c.l.s8.bf16 %v3424_v1  ;;  %v3551_v16 = vmul.bf16 %v5470_v9, %v3460_v5  ;;  %v2471_v22 = vld [vmem:[#allocation8 + $0x330] sm:$0xff] }
 0x385   :  { %v3124_v36 = vpop.f32.mrf.mxu0  ;;  %v3018_v29 = vmul.bf16 %v5334_v34, %v2709_v49  ;;  %v2705_v13 = vunpack.c.h.s8.bf16 %v2472_v38  ;;  %v2700_v42 = vunpack.c.l.s8.bf16 %v2471_v22  ;;  %v3484_v15 = vunpack.c.l.s8.bf16 %v3437_v28 }
 0x386   :  { %v5496_v43 = vadd.f32 %v3163_v30, %v3123_v52  ;;  %v3165_v48 = vpop.f32.mrf.mxu1  ;;  %3320 = vmatpush2.bf16.msra.mxu1 %v2909_v24  ;;  %v3550_v24 = vmul.bf16 %v5478_v51, %v3459_v60  ;;  %v2701_v52 = vunpack.c.l.s8.bf16 %v2472_v38  ;;  %v3548_v30 = vmul.bf16 %v5478_v51, %v3457_v26 }
 0x387   :  { %v3125_v50 = vpop.f32.mrf.mxu0  ;;  %3321 = vmatprep.subr.bf16.mxu1 %v2906_v4  ;;  %3626 = vmatpush1.bf16.msra.mxu0 %v3558_v31  ;;  %v3456_v4 = vunpack.c.l.s8.bf16 %v3423_v54  ;;  %v2704_v31 = vunpack.c.h.s8.bf16 %v2471_v22  ;;  %v3014_v33 = vmul.bf16 %v5334_v34, %v2705_v13  ;;  %v3436_v48 = vld [vmem:[#allocation11 + $0x70] sm:$0xff]  ;;  %v3009_v8 = vmul.bf16 %v5341_v25, %v2700_v42 }
 0x388   :  { %v3166_v7 = vpop.f32.mrf.mxu1  ;;  %3627 = vmatprep.subr.bf16.mxu0 %v3557_v45  ;;  %v3455_v45 = vunpack.c.l.s8.bf16 %v3422_v21  ;;  %v3010_v50 = vmul.bf16 %v5334_v34, %v2701_v52  ;;  %v3485_v6 = vunpack.c.h.s8.bf16 %v3436_v48  ;;  %v2696_v1 = vunpack.c.h.s8.bf16 %v2467_v57  ;;  %v2492_v22 = vld [vmem:[#allocation8 + $0x3d8] sm:$0xff] }
 0x389   :  { %v3547_v36 = vmul.bf16 %v5470_v9, %v3456_v4  ;;  %v3577_v7 = vmul.bf16 %v5470_v9, %v3486_v39  ;;  %v3483_v40 = vunpack.c.l.s8.bf16 %v3436_v48  ;;  %v2749_v35 = vunpack.c.l.s8.bf16 %v2496_v63 }
 0x38a   :  { %3322 = vmatpush2.bf16.msra.mxu1 %v2905_v44  ;;  %v3013_v44 = vmul.bf16 %v5341_v25, %v2704_v31  ;;  %v3005_v5 = vmul.bf16 %v5341_v25, %v2696_v1  ;;  %v2745_v31 = vunpack.c.h.s8.bf16 %v2492_v22  ;;  %v2741_v42 = vunpack.c.l.s8.bf16 %v2492_v22 }
 0x38b   :  { %3373 = vmatprep.subr.bf16.mxu1 %v3030_v46  ;;  %3628 = vmatpush1.bf16.msra.mxu0 %v3556_v62  ;;  %v2697_v46 = vunpack.c.h.s8.bf16 %v2468_v37  ;;  %v3546_v62 = vmul.bf16 %v5478_v51, %v3455_v45  ;;  %v3574_v49 = vmul.bf16 %v5478_v51, %v3483_v40 }
 0x38c   :  { %3629 = vmatprep.subr.bf16.mxu0 %v3555_v12  ;;  %v3435_v12 = vld [vmem:[#allocation11 + $0x68] sm:$0xff] }
 0x38d   :  { %3324 = vmatmul.mubr.bf16.vlgmr.msra.gmra.mxu1 %v5258_v47  ;;  %v3458_v47 = vunpack.c.h.s8.bf16 %v3423_v54  ;;  %v3482_v61 = vunpack.c.h.s8.bf16 %v3435_v12  ;;  %v2692_v54 = vunpack.c.l.s8.bf16 %v2467_v57  ;;  %v3480_v38 = vunpack.c.l.s8.bf16 %v3435_v12  ;;  %v2488_v57 = vld [vmem:[#allocation8 + $0x3b8] sm:$0xff] }
 0x38e   :  { %3374 = vmatpush1.bf16.msra.mxu1 %v3029_v55  ;;  %3405 = vmatprep.mubr.bf16.mxu1 %v5409_v32  ;;  %v3021_v32 = vmul.bf16 %v5341_v25, %v2712_v17  ;;  %v3006_v55 = vmul.bf16 %v5334_v34, %v2697_v46  ;;  %v2753_v17 = vunpack.c.h.s8.bf16 %v2496_v63  ;;  %v2737_v1 = vunpack.c.h.s8.bf16 %v2488_v57 }
 0x38f   :  { %3375 = vmatprep.subr.bf16.mxu1 %v3026_v11  ;;  %3630 = vmatpush1.bf16.msra.mxu0 %v3554_v23  ;;  %v3549_v27 = vmul.bf16 %v5470_v9, %v3458_v47  ;;  %v3576_v11 = vmul.bf16 %v5478_v51, %v3485_v6  ;;  %v3575_v23 = vmul.bf16 %v5470_v9, %v3484_v15 }
 0x390   :  { %3631 = vmatprep.subr.bf16.mxu0 %v3553_v0  ;;  %v3434_v0 = vld [vmem:[#allocation11 + $0x60] sm:$0xff]  ;;  %v3573_v60 = vmul.bf16 %v5470_v9, %v3482_v61  ;;  %v3001_v47 = vmul.bf16 %v5341_v25, %v2692_v54 }
 0x391   :  { %v3479_v13 = vunpack.c.l.s8.bf16 %v3434_v0 }
 0x392   :  { %3376 = vmatpush1.bf16.msra.mxu1 %v3025_v18  ;;  %v3002_v18 = vmul.bf16 %v5334_v34, %v2693_v53 }
 0x393   :  { %3377 = vmatprep.subr.bf16.mxu1 %v3022_v41  ;;  %3632 = vmatpush1.bf16.msra.mxu0 %v3552_v59  ;;  %v2495_v41 = vld [vmem:[#allocation8 + $0x3f0] sm:$0xff]  ;;  %v3481_v59 = vunpack.c.h.s8.bf16 %v3434_v0  ;;  %v3570_v52 = vmul.bf16 %v5478_v51, %v3479_v13  ;;  %v3046_v0 = vmul.bf16 %v5334_v34, %v2737_v1 }
 0x394   :  { %3633 = vmatprep.subr.bf16.mxu0 %v3551_v16  ;;  %v3433_v16 = vld [vmem:[#allocation11 + $0x58] sm:$0xff]  ;;  %v2752_v21 = vunpack.c.h.s8.bf16 %v2495_v41  ;;  %v2748_v28 = vunpack.c.l.s8.bf16 %v2495_v41 }
 0x395   :  { %v3478_v26 = vunpack.c.h.s8.bf16 %v3433_v16  ;;  %v3476_v37 = vunpack.c.l.s8.bf16 %v3433_v16  ;;  %v2483_v16 = vld [vmem:[#allocation8 + $0x390] sm:$0xff] }
 0x396   :  { %3378 = vmatpush1.bf16.msra.mxu1 %v3021_v32  ;;  %v3062_v32 = vmul.bf16 %v5334_v34, %v2753_v17  ;;  %v3061_v4 = vmul.bf16 %v5341_v25, %v2752_v21  ;;  %v3057_v39 = vmul.bf16 %v5341_v25, %v2748_v28  ;;  %v2484_v17 = vld [vmem:[#allocation8 + $0x398] sm:$0xff] }
 0x397   :  { %3379 = vmatprep.subr.bf16.mxu1 %v3018_v29  ;;  %3634 = vmatpush1.bf16.msra.mxu0 %v3550_v24  ;;  %v3572_v29 = vmul.bf16 %v5478_v51, %v3481_v59  ;;  %v3571_v24 = vmul.bf16 %v5470_v9, %v3480_v38  ;;  %v3569_v45 = vmul.bf16 %v5470_v9, %v3478_v26  ;;  %v2729_v38 = vunpack.c.h.s8.bf16 %v2484_v17 }
 0x398   :  { %3635 = vmatprep.subr.bf16.mxu0 %v3549_v27  ;;  %v3432_v27 = vld [vmem:[#allocation11 + $0x50] sm:$0xff]  ;;  %v2724_v26 = vunpack.c.l.s8.bf16 %v2483_v16 }
 0x399   :  { %v3475_v46 = vunpack.c.l.s8.bf16 %v3432_v27 }
 0x39a   :  { %3380 = vmatpush1.bf16.msra.mxu1 %v3017_v56  ;;  %v3058_v56 = vmul.bf16 %v5334_v34, %v2749_v35  ;;  %v3038_v35 = vmul.bf16 %v5334_v34, %v2729_v38 }
 0x39b   :  { %3381 = vmatprep.subr.bf16.mxu1 %v3014_v33  ;;  %3636 = vmatpush1.bf16.msra.mxu0 %v3548_v30  ;;  %v2491_v33 = vld [vmem:[#allocation8 + $0x3d0] sm:$0xff]  ;;  %v3477_v30 = vunpack.c.h.s8.bf16 %v3432_v27  ;;  %v3566_v53 = vmul.bf16 %v5478_v51, %v3475_v46 }
 0x39c   :  { %3637 = vmatprep.subr.bf16.mxu0 %v3547_v36  ;;  %v3431_v36 = vld [vmem:[#allocation11 + $0x48] sm:$0xff]  ;;  %v2744_v48 = vunpack.c.h.s8.bf16 %v2491_v33  ;;  %v2740_v12 = vunpack.c.l.s8.bf16 %v2491_v33 }
 0x39d   :  { %v3474_v6 = vunpack.c.h.s8.bf16 %v3431_v36  ;;  %v3472_v63 = vunpack.c.l.s8.bf16 %v3431_v36 }
 0x39e   :  { %3382 = vmatpush1.bf16.msra.mxu1 %v3013_v44  ;;  %v3054_v44 = vmul.bf16 %v5334_v34, %v2745_v31  ;;  %v3053_v15 = vmul.bf16 %v5341_v25, %v2744_v48  ;;  %v3033_v31 = vmul.bf16 %v5341_v25, %v2724_v26 }
 0x39f   :  { %3383 = vmatprep.subr.bf16.mxu1 %v3010_v50  ;;  %3638 = vmatpush1.bf16.msra.mxu0 %v3546_v62  ;;  %v3568_v50 = vmul.bf16 %v5478_v51, %v3477_v30  ;;  %v3567_v62 = vmul.bf16 %v5470_v9, %v3476_v37  ;;  %v3565_v40 = vmul.bf16 %v5470_v9, %v3474_v6  ;;  %v3444_v30 = vld [vmem:[#allocation11 + $0xb0] sm:$0xff]  ;;  %v3443_v37 = vld [vmem:[#allocation11 + $0xa8] sm:$0xff] }
 0x3a0   :  { %3639 = vmatprep.subr.bf16.mxu0 %v3577_v7  ;;  %v3430_v7 = vld [vmem:[#allocation11 + $0x40] sm:$0xff]  ;;  %v3563_v41 = vmul.bf16 %v5470_v9, %v3472_v63  ;;  %v3501_v36 = vunpack.c.h.s8.bf16 %v3444_v30  ;;  %v3498_v48 = vunpack.c.h.s8.bf16 %v3443_v37  ;;  %v3496_v46 = vunpack.c.l.s8.bf16 %v3443_v37 }
 0x3a2   :  { %3384 = vmatpush1.bf16.msra.mxu1 %v3009_v8  ;;  %v3050_v8 = vmul.bf16 %v5334_v34, %v2741_v42 }
 0x3a3   :  { %3385 = vmatprep.subr.bf16.mxu1 %v3006_v55  ;;  %3640 = vmatpush2.bf16.msra.mxu0 %v3576_v11  ;;  %v2487_v55 = vld [vmem:[#allocation8 + $0x3b0] sm:$0xff]  ;;  %v3473_v11 = vunpack.c.h.s8.bf16 %v3430_v7 }
 0x3a4   :  { %3641 = vmatprep.subr.bf16.mxu0 %v3575_v23  ;;  %v3049_v23 = vmul.bf16 %v5341_v25, %v2740_v12  ;;  %v2736_v61 = vunpack.c.h.s8.bf16 %v2487_v55  ;;  %v2732_v59 = vunpack.c.l.s8.bf16 %v2487_v55  ;;  %v3440_v12 = vld [vmem:[#allocation11 + $0x90] sm:$0xff] }
 0x3a5   :  { %v3564_v54 = vmul.bf16 %v5478_v51, %v3473_v11  ;;  %v3493_v1 = vunpack.c.h.s8.bf16 %v3440_v12  ;;  %v3439_v11 = vld [vmem:[#allocation11 + $0x88] sm:$0xff]  ;;  %v3491_v63 = vunpack.c.l.s8.bf16 %v3440_v12  ;;  %v3446_v12 = vld [vmem:[#allocation11 + $0xc0] sm:$0xff] }
 0x3a6   :  { %3386 = vmatpush1.bf16.msra.mxu1 %v3005_v5  ;;  %v2733_v5 = vunpack.c.l.s8.bf16 %v2488_v57  ;;  %v3041_v21 = vmul.bf16 %v5341_v25, %v2732_v59  ;;  %v3441_v57 = vld [vmem:[#allocation11 + $0x98] sm:$0xff] }
 0x3a7   :  { %3387 = vmatprep.subr.bf16.mxu1 %v3002_v18  ;;  %3642 = vmatpush2.bf16.msra.mxu0 %v3574_v49  ;;  %v3471_v18 = vunpack.c.l.s8.bf16 %v3430_v7  ;;  %v3045_v49 = vmul.bf16 %v5341_v25, %v2736_v61  ;;  %v3587_v7 = vmul.bf16 %v5470_v9, %v3496_v46  ;;  %v3490_v61 = vunpack.c.h.s8.bf16 %v3439_v11 }
 0x3a8   :  { %3643 = vmatprep.subr.bf16.mxu0 %v3573_v60  ;;  %v3042_v60 = vmul.bf16 %v5334_v34, %v2733_v5  ;;  %v3582_v5 = vmul.bf16 %v5478_v51, %v3491_v63 }
 0x3aa   :  { %3388 = vmatpush1.bf16.msra.mxu1 %v3001_v47  ;;  %v3562_v47 = vmul.bf16 %v5478_v51, %v3471_v18  ;;  %v3581_v18 = vmul.bf16 %v5470_v9, %v3490_v61  ;;  %v3503_v61 = vunpack.c.l.s8.bf16 %v3446_v12 }
 0x3ab   :  { %3389 = vmatprep.subr.bf16.mxu1 %v3062_v32  ;;  %3644 = vmatpush2.bf16.msra.mxu0 %v3572_v29  ;;  %v2728_v32 = vunpack.c.h.s8.bf16 %v2483_v16  ;;  %v2725_v29 = vunpack.c.l.s8.bf16 %v2484_v17  ;;  %v3488_v17 = vunpack.c.l.s8.bf16 %v3439_v11  ;;  %v3452_v16 = vld [vmem:[#allocation11 + $0xf0] sm:$0xff] }
 0x3ac   :  { %3645 = vmatprep.subr.bf16.mxu0 %v3571_v24 }
 0x3ad   :  { %v3037_v24 = vmul.bf16 %v5341_v25, %v2728_v32  ;;  %v3592_v25 = vmul.bf16 %v5478_v51, %v3501_v36 }
 0x3ae   :  { %3390 = vmatpush2.bf16.msra.mxu1 %v3061_v4  ;;  %v3034_v4 = vmul.bf16 %v5334_v34, %v2725_v29  ;;  %v3451_v29 = vld [vmem:[#allocation11 + $0xe8] sm:$0xff] }
 0x3af   :  { %3391 = vmatprep.subr.bf16.mxu1 %v3058_v56  ;;  %3646 = vmatpush2.bf16.msra.mxu0 %v3570_v52 }
 0x3b0   :  { %3647 = vmatprep.subr.bf16.mxu0 %v3569_v45 }
 0x3b2   :  { %3392 = vmatpush2.bf16.msra.mxu1 %v3057_v39  ;;  %v3499_v39 = vunpack.c.l.s8.bf16 %v3444_v30 }
 0x3b3   :  { %3393 = vmatprep.subr.bf16.mxu1 %v3054_v44  ;;  %3648 = vmatpush2.bf16.msra.mxu0 %v3568_v50  ;;  %v3442_v44 = vld [vmem:[#allocation11 + $0xa0] sm:$0xff]  ;;  %v3589_v50 = vmul.bf16 %v5470_v9, %v3498_v48 }
 0x3b4   :  { %3649 = vmatprep.subr.bf16.mxu0 %v3567_v62  ;;  %v3590_v42 = vmul.bf16 %v5478_v51, %v3499_v39  ;;  %v3495_v6 = vunpack.c.l.s8.bf16 %v3442_v44  ;;  %v3448_v39 = vld [vmem:[#allocation11 + $0xd0] sm:$0xff] }
 0x3b6   :  { %3394 = vmatpush2.bf16.msra.mxu1 %v3053_v15  ;;  %v3494_v15 = vunpack.c.h.s8.bf16 %v3441_v57 }
 0x3b7   :  { %3395 = vmatprep.subr.bf16.mxu1 %v3050_v8  ;;  %3650 = vmatpush2.bf16.msra.mxu0 %v3566_v53  ;;  %v3586_v8 = vmul.bf16 %v5478_v51, %v3495_v6  ;;  %v3492_v53 = vunpack.c.l.s8.bf16 %v3441_v57 }
 0x3b8   :  { %3651 = vmatprep.subr.bf16.mxu0 %v3565_v40  ;;  %v3585_v55 = vmul.bf16 %v5470_v9, %v3494_v15  ;;  %v3584_v40 = vmul.bf16 %v5478_v51, %v3493_v1 }
 0x3ba   :  { %3396 = vmatpush2.bf16.msra.mxu1 %v3049_v23  ;;  %v3583_v23 = vmul.bf16 %v5470_v9, %v3492_v53 }
 0x3bb   :  { %3397 = vmatprep.subr.bf16.mxu1 %v3046_v0  ;;  %3652 = vmatpush2.bf16.msra.mxu0 %v3564_v54  ;;  %v3438_v0 = vld [vmem:[#allocation11 + $0x80] sm:$0xff] }
 0x3bc   :  { %3653 = vmatprep.subr.bf16.mxu0 %v3563_v41  ;;  %v3489_v54 = vunpack.c.h.s8.bf16 %v3438_v0  ;;  %v3453_v41 = vld [vmem:[#allocation11 + $0xf8] sm:$0xff]  ;;  %v3487_v59 = vunpack.c.l.s8.bf16 %v3438_v0 }
 0x3bd   :  { %v3518_v38 = vunpack.c.h.s8.bf16 %v3453_v41 }
 0x3be   :  { %3398 = vmatpush2.bf16.msra.mxu1 %v3045_v49  ;;  %v3580_v49 = vmul.bf16 %v5478_v51, %v3489_v54 }
 0x3bf   :  { %3399 = vmatprep.subr.bf16.mxu1 %v3042_v60  ;;  %3654 = vmatpush2.bf16.msra.mxu0 %v3562_v47  ;;  %v3579_v60 = vmul.bf16 %v5470_v9, %v3488_v17  ;;  %v3578_v47 = vmul.bf16 %v5478_v51, %v3487_v59  ;;  %v3609_v32 = vmul.bf16 %v5470_v9, %v3518_v38 }
 0x3c0   :  { %v3594_v17 = vmul.bf16 %v5478_v51, %v3503_v61 }
 0x3c1   :  { %v3202_v13 = vpop.f32.mrf.mxu0 }
 0x3c2   :  { %v5558_v22 = vadd.f32 %v3202_v13, %v5493_v58  ;;  %3400 = vmatpush2.bf16.msra.mxu1 %v3041_v21  ;;  %v3445_v58 = vld [vmem:[#allocation11 + $0xb8] sm:$0xff]  ;;  %v3517_v21 = vunpack.c.h.s8.bf16 %v3452_v16 }
 0x3c3   :  { %v3204_v27 = vpop.f32.mrf.mxu0  ;;  %3401 = vmatprep.subr.bf16.mxu1 %v3038_v35  ;;  %v3502_v52 = vunpack.c.h.s8.bf16 %v3445_v58  ;;  %v3500_v45 = vunpack.c.l.s8.bf16 %v3445_v58  ;;  %v3516_v35 = vunpack.c.l.s8.bf16 %v3453_v41  ;;  %v3512_v58 = vunpack.c.l.s8.bf16 %v3451_v29 }
 0x3c4   :  { %v5563_v28 = vadd.f32 %v3204_v27, %v5496_v43  ;;  %v3608_v13 = vmul.bf16 %v5478_v51, %v3517_v21  ;;  %v3514_v27 = vunpack.c.h.s8.bf16 %v3451_v29 }
 0x3c5   :  { %v3206_v56 = vpop.f32.mrf.mxu0  ;;  %v3593_v34 = vmul.bf16 %v5470_v9, %v3502_v52  ;;  %v3591_v43 = vmul.bf16 %v5470_v9, %v3500_v45  ;;  %v3607_v26 = vmul.bf16 %v5470_v9, %v3516_v35  ;;  %v3449_v52 = vld [vmem:[#allocation11 + $0xd8] sm:$0xff]  ;;  %v3603_v37 = vmul.bf16 %v5470_v9, %v3512_v58 }
 0x3c6   :  { %3402 = vmatpush2.bf16.msra.mxu1 %v3037_v24  ;;  %v3515_v24 = vunpack.c.l.s8.bf16 %v3452_v16  ;;  %v3510_v36 = vunpack.c.h.s8.bf16 %v3449_v52 }
 0x3c7   :  { %v3207_v33 = vpop.f32.mrf.mxu0  ;;  %3403 = vmatprep.subr.bf16.mxu1 %v3034_v4  ;;  %v3450_v4 = vld [vmem:[#allocation11 + $0xe0] sm:$0xff] }
 0x3c8   :  { %v3606_v56 = vmul.bf16 %v5478_v51, %v3515_v24  ;;  %v3605_v33 = vmul.bf16 %v5470_v9, %v3514_v27  ;;  %v3511_v45 = vunpack.c.l.s8.bf16 %v3450_v4 }
 0x3ca   :  { %3404 = vmatpush2.bf16.msra.mxu1 %v3033_v31  ;;  %v3513_v31 = vunpack.c.h.s8.bf16 %v3450_v4  ;;  %v3716_v4 = vld [vmem:[#allocation13 + $0x38] sm:$0xff] }
 0x3cb   :  { %3664 = vmatprep.subr.bf16.mxu1 %v3593_v34  ;;  %v3602_v34 = vmul.bf16 %v5478_v51, %v3511_v45 }
 0x3cc   :  { %v3604_v30 = vmul.bf16 %v5478_v51, %v3513_v31 }
 0x3cd   :  { %3406 = vmatmul.mubr.bf16.vlgmr.msra.gmra.mxu1 %v5413_v19  ;;  %v3497_v19 = vunpack.c.h.s8.bf16 %v3442_v44  ;;  %v3601_v44 = vmul.bf16 %v5470_v9, %v3510_v36 }
 0x3ce   :  { %3665 = vmatpush1.bf16.msra.mxu1 %v3592_v25  ;;  %v3508_v25 = vunpack.c.l.s8.bf16 %v3449_v52  ;;  %v3715_v52 = vld [vmem:[#allocation13 + $0x30] sm:$0xff] }
 0x3cf   :  { %3666 = vmatprep.subr.bf16.mxu1 %v3591_v43  ;;  %v3588_v62 = vmul.bf16 %v5478_v51, %v3497_v19  ;;  %v3509_v43 = vunpack.c.h.s8.bf16 %v3448_v39 }
 0x3d0   :  { %v3599_v57 = vmul.bf16 %v5470_v9, %v3508_v25 }
 0x3d1   :  { %v3600_v19 = vmul.bf16 %v5478_v51, %v3509_v43  ;;  %v3711_v43 = vld [vmem:[#allocation13 + $0x10] sm:$0xff] }
 0x3d2   :  { %3667 = vmatpush1.bf16.msra.mxu1 %v3590_v42 }
 0x3d3   :  { %3668 = vmatprep.subr.bf16.mxu1 %v3589_v50  ;;  %v3507_v50 = vunpack.c.l.s8.bf16 %v3448_v39 }
 0x3d5   :  { %v3598_v6 = vmul.bf16 %v5478_v51, %v3507_v50 }
 0x3d6   :  { %3669 = vmatpush1.bf16.msra.mxu1 %v3588_v62 }
 0x3d7   :  { %3670 = vmatprep.subr.bf16.mxu1 %v3587_v7  ;;  %v3447_v7 = vld [vmem:[#allocation11 + $0xc8] sm:$0xff] }
 0x3d8   :  { %v3506_v15 = vunpack.c.h.s8.bf16 %v3447_v7  ;;  %v3504_v63 = vunpack.c.l.s8.bf16 %v3447_v7 }
 0x3da   :  { %3671 = vmatpush1.bf16.msra.mxu1 %v3586_v8  ;;  %v3505_v8 = vunpack.c.h.s8.bf16 %v3446_v12  ;;  %v3595_v54 = vmul.bf16 %v5470_v9, %v3504_v63 }
 0x3db   :  { %3672 = vmatprep.subr.bf16.mxu1 %v3585_v55  ;;  %v3597_v55 = vmul.bf16 %v5470_v9, %v3506_v15  ;;  %v3081_v9 = vrot.slane %v5475_v14, %v4630_v20 }
 0x3dc   :  { %v3596_v11 = vmul.bf16 %v5478_v51, %v3505_v8 }
 0x3de   :  { %3673 = vmatpush1.bf16.msra.mxu1 %v3584_v40 }
 0x3df   :  { %3674 = vmatprep.subr.bf16.mxu1 %v3583_v23 }
 0x3e2   :  { %3675 = vmatpush1.bf16.msra.mxu1 %v3582_v5 }
 0x3e3   :  { %3676 = vmatprep.subr.bf16.mxu1 %v3581_v18 }
 0x3e6   :  { %3677 = vmatpush1.bf16.msra.mxu1 %v3580_v49 }
 0x3e7   :  { %3678 = vmatprep.subr.bf16.mxu1 %v3579_v60 }
 0x3ea   :  { %3679 = vmatpush1.bf16.msra.mxu1 %v3578_v47 }
 0x3eb   :  { %3680 = vmatprep.subr.bf16.mxu1 %v3609_v32 }
 0x3ee   :  { %3681 = vmatpush2.bf16.msra.mxu1 %v3608_v13 }
 0x3ef   :  { %3682 = vmatprep.subr.bf16.mxu1 %v3607_v26 }
 0x3f2   :  { %3683 = vmatpush2.bf16.msra.mxu1 %v3606_v56  ;;  %v3717_v56 = vld [vmem:[%s5680_s8] sm:$0x1] }
 0x3f3   :  { %3684 = vmatprep.subr.bf16.mxu1 %v3605_v33  ;;  %v3734_v31 = vpack.c.bf16 %v3717_v56, %v3717_v56  ;;  %v3733_v33 = vunpack.c.h.s8.bf16 %v3716_v4 }
 0x3f5   :  { %v3736_v58 = vpack.i.b16 %v3734_v31, %v3734_v31 }
 0x3f6   :  { %3685 = vmatpush2.bf16.msra.mxu1 %v3604_v30 }
 0x3f7   :  { %3686 = vmatprep.subr.bf16.mxu1 %v3603_v37  ;;  %v5609_v30 = vrot.slane %v3736_v58, %v4452_v3 }
 0x3f9   :  { %v3757_v37 = vmul.bf16 %v5609_v30, %v3733_v33  ;;  %v3807_v33 = vld [vmem:[#allocation14 + $0x10] sm:$0xff] }
 0x3fa   :  { %3687 = vmatpush2.bf16.msra.mxu1 %v3602_v34  ;;  %v3731_v34 = vunpack.c.h.s8.bf16 %v3715_v52 }
 0x3fb   :  { %3688 = vmatprep.subr.bf16.mxu1 %v3601_v44  ;;  %3981 = vmatprep.subr.bf16.mxu0 %v3757_v37  ;;  %v3723_v44 = vunpack.c.h.s8.bf16 %v3711_v43 }
 0x3fc   :  { %v3755_v25 = vmul.bf16 %v5609_v30, %v3731_v34  ;;  %v3977_v34 = vld [vmem:[%s5678_s6 + $0x1] ss:$2 sm:$0x3] }
 0x3fd   :  { %v3747_v50 = vmul.bf16 %v5609_v30, %v3723_v44 }
 0x3fe   :  { %3689 = vmatpush2.bf16.msra.mxu1 %v3600_v19  ;;  %v3714_v19 = vld [vmem:[#allocation13 + $0x28] sm:$0xff] }
 0x3ff   :  { %3690 = vmatprep.subr.bf16.mxu1 %v3599_v57  ;;  %v3728_v8 = vunpack.c.l.s8.bf16 %v3714_v19 }
 0x401   :  { %v3284_v48 = vpop.f32.mrf.mxu0 }
 0x402   :  { %3691 = vmatpush2.bf16.msra.mxu1 %v3598_v6  ;;  %v3710_v6 = vld [vmem:[#allocation13 + $0x8] sm:$0xff] }
 0x403   :  { %v3286_v42 = vpop.f32.mrf.mxu0  ;;  %3692 = vmatprep.subr.bf16.mxu1 %v3597_v55  ;;  %v3721_v15 = vunpack.c.h.s8.bf16 %v3710_v6  ;;  %v3720_v55 = vunpack.c.l.s8.bf16 %v3710_v6 }
 0x404   :  { %v3287_v51 = vadd.f32 %v3286_v42, %v3081_v9  ;;  %v3730_v42 = vunpack.c.l.s8.bf16 %v3715_v52 }
 0x405   :  { %v3288_v46 = vpop.f32.mrf.mxu0 }
 0x406   :  { %3693 = vmatpush2.bf16.msra.mxu1 %v3596_v11  ;;  %v3722_v46 = vunpack.c.l.s8.bf16 %v3711_v43  ;;  %v3754_v57 = vmul.bf16 %v5609_v30, %v3730_v42  ;;  %v3744_v11 = vmul.bf16 %v5609_v30, %v3720_v55  ;;  %v3616_v43 = vrot.slane %v3977_v34, %v4452_v3  ;;  %v3805_v55 = vld [vmem:[#allocation14] sm:$0xff] }
 0x407   :  { %v3289_v62 = vpop.f32.mrf.mxu0  ;;  %3694 = vmatprep.subr.bf16.mxu1 %v3595_v54 }
 0x408   :  { %v3729_v62 = vunpack.c.h.s8.bf16 %v3714_v19  ;;  %v3746_v7 = vmul.bf16 %v5609_v30, %v3722_v46 }
 0x40a   :  { %3695 = vmatpush2.bf16.msra.mxu1 %v3594_v17  ;;  %v3753_v12 = vmul.bf16 %v5609_v30, %v3729_v62 }
 0x40d   :  { %v3243_v1 = vpop.f32.mrf.mxu1 }
 0x40e   :  { %v3244_v53 = vadd.f32 %v3243_v1, %v5558_v22  ;;  %v3745_v1 = vmul.bf16 %v5609_v30, %v3721_v15 }
 0x40f   :  { %v3245_v40 = vpop.f32.mrf.mxu1 }
 0x410   :  { %v3246_v23 = vadd.f32 %v3245_v40, %v5563_v28  ;;  %v3414_v0 = vmax.f32 %v3244_v53, 0.0  ;;  %v3077_v28 = vrot.slane %v5475_v14, %v4637_v10  ;;  %v3712_v10 = vld [vmem:[#allocation13 + $0x18] sm:$0xff]  ;;  %v3732_v14 = vunpack.c.l.s8.bf16 %v3716_v4 }
 0x411   :  { %v3247_v5 = vpop.f32.mrf.mxu1  ;;  %v3725_v20 = vunpack.c.h.s8.bf16 %v3712_v10  ;;  %v3724_v45 = vunpack.c.l.s8.bf16 %v3712_v10  ;;  %v3752_v53 = vmul.bf16 %v5609_v30, %v3728_v8 }
 0x412   :  { %v3415_v18 = vmax.f32 %v3246_v23, 0.0  ;;  %v3418_v22 = vpack.c.bf16 %v3414_v0, %v3414_v0  ;;  %v3285_v47 = vadd.f32 %v3284_v48, %v3077_v28  ;;  %v3756_v39 = vmul.bf16 %v5609_v30, %v3732_v14 }
 0x413   :  { %v3248_v41 = vpop.f32.mrf.mxu1  ;;  %v3749_v36 = vmul.bf16 %v5609_v30, %v3725_v20  ;;  %v3748_v48 = vmul.bf16 %v5609_v30, %v3724_v45  ;;  %v3815_v14 = vunpack.c.h.s8.bf16 %v3807_v33  ;;  %v3806_v45 = vld [vmem:[#allocation14 + $0x8] sm:$0xff] }
 0x414   :  { %v3419_v49 = vpack.c.bf16 %v3415_v18, %v3415_v18  ;;  %v3812_v8 = vunpack.c.l.s8.bf16 %v3806_v45 }
 0x416   :  { %3655 = vmatprep.mubr.bf16.mxu0 %v3419_v49  ;;  %v3713_v49 = vld [vmem:[#allocation13 + $0x20] sm:$0xff] }
 0x417   :  { %3656 = vmatmul.mubr.bf16.vlgmr.msra.gmra.mxu0 %v3418_v22  ;;  %v3727_v22 = vunpack.c.h.s8.bf16 %v3713_v49 }
 0x418   :  { %3982 = vmatpush3.bf16.msra.mxu0 %v3749_v36  ;;  %v3813_v36 = vunpack.c.h.s8.bf16 %v3806_v45 }
 0x419   :  { %3983 = vmatprep.subr.bf16.mxu0 %v3756_v39  ;;  %v3751_v28 = vmul.bf16 %v5609_v30, %v3727_v22 }
 0x41c   :  { %3984 = vmatpush3.bf16.msra.mxu0 %v3748_v48  ;;  %v3620_v48 = vrot.slane %v3977_v34, %v4449_v2  ;;  %v3980_v34 = vld [vmem:[%s5684_s12 + $0x1] ss:$0 sm:$0xff] }
 0x41d   :  { %3985 = vmatprep.subr.bf16.mxu0 %v3755_v25 }
 0x420   :  { %3986 = vmatpush3.bf16.msra.mxu0 %v3747_v50 }
 0x421   :  { %3987 = vmatprep.subr.bf16.mxu0 %v3754_v57 }
 0x424   :  { %3988 = vmatpush3.bf16.msra.mxu0 %v3746_v7 }
 0x425   :  { %3989 = vmatprep.subr.bf16.mxu0 %v3753_v12 }
 0x428   :  { %3990 = vmatpush3.bf16.msra.mxu0 %v3745_v1 }
 0x429   :  { %3991 = vmatprep.subr.bf16.mxu0 %v3752_v53  ;;  %v3811_v53 = vunpack.c.h.s8.bf16 %v3805_v55 }
 0x42c   :  { %3992 = vmatpush3.bf16.msra.mxu0 %v3744_v11  ;;  %v3810_v11 = vunpack.c.l.s8.bf16 %v3805_v55 }
 0x42d   :  { %3993 = vmatprep.subr.bf16.mxu0 %v3751_v28 }
 0x442   :  { %v3366_v59 = vpop.f32.mrf.mxu0 }
 0x444   :  { %v3368_v60 = vpop.f32.mrf.mxu0 }
 0x446   :  { %v3370_v38 = vpop.f32.mrf.mxu0 }
 0x448   :  { %v3371_v16 = vpop.f32.mrf.mxu0 }
 0x44d   :  { %v3325_v21 = vpop.f32.mrf.mxu1 }
 0x44e   :  { %v3326_v32 = vadd.f32 %v3325_v21, %v3285_v47  ;;  %v3726_v47 = vunpack.c.l.s8.bf16 %v3713_v49 }
 0x44f   :  { %v3327_v35 = vpop.f32.mrf.mxu1 }
 0x450   :  { %v3328_v29 = vadd.f32 %v3327_v35, %v3287_v51  ;;  %v3367_v13 = vadd.f32 %v3366_v59, %v3326_v32  ;;  %v3709_v59 = vld [vmem:[#allocation13] sm:$0xff]  ;;  %v3750_v32 = vmul.bf16 %v5609_v30, %v3726_v47 }
 0x451   :  { %v3329_v24 = vpop.f32.mrf.mxu1  ;;  %v3718_v21 = vunpack.c.l.s8.bf16 %v3709_v59 }
 0x452   :  { %v3369_v26 = vadd.f32 %v3368_v60, %v3328_v29  ;;  %v3719_v60 = vunpack.c.h.s8.bf16 %v3709_v59  ;;  %v3809_v24 = vld [vmem:[%s5682_s10] sm:$0x1] }
 0x453   :  { %v3330_v27 = vpop.f32.mrf.mxu1  ;;  %v3742_v35 = vmul.bf16 %v5609_v30, %v3718_v21 }
 0x454   :  { %v3743_v16 = vmul.bf16 %v5609_v30, %v3719_v60  ;;  %v3818_v27 = vpack.c.bf16 %v3809_v24, %v3809_v24  ;;  %v3814_v30 = vunpack.c.l.s8.bf16 %v3807_v33 }
 0x456   :  { %3994 = vmatpush3.bf16.msra.mxu0 %v3743_v16  ;;  %v3820_v56 = vpack.i.b16 %v3818_v27, %v3818_v27 }
 0x457   :  { %3995 = vmatprep.subr.bf16.mxu0 %v3750_v32 }
 0x458   :  { %v3825_v10 = vrot.slane %v3820_v56, %v4452_v3  ;;  %v3881_v56 = vld [vmem:[#allocation16] sm:$0xff] }
 0x459   :  { %v3886_v33 = vunpack.c.l.s8.bf16 %v3881_v56 }
 0x45a   :  { %3996 = vmatpush3.bf16.msra.mxu0 %v3742_v35  ;;  %v3831_v52 = vmul.bf16 %v3825_v10, %v3815_v14  ;;  %v3830_v37 = vmul.bf16 %v3825_v10, %v3814_v30  ;;  %v3829_v39 = vmul.bf16 %v3825_v10, %v3813_v36  ;;  %v3828_v1 = vmul.bf16 %v3825_v10, %v3812_v8 }
 0x45b   :  { %v3827_v2 = vmul.bf16 %v3825_v10, %v3811_v53 }
 0x48d   :  { %v3407_v40 = vpop.f32.mrf.mxu1 }
 0x48e   :  { %v3408_v63 = vadd.f32 %v3407_v40, %v3367_v13  ;;  %v3808_v13 = vld [vmem:[#allocation14 + $0x18] sm:$0xff]  ;;  %v3826_v40 = vmul.bf16 %v3825_v10, %v3810_v11 }
 0x48f   :  { %v3409_v23 = vpop.f32.mrf.mxu1  ;;  %v3817_v4 = vunpack.c.h.s8.bf16 %v3808_v13  ;;  %v3816_v31 = vunpack.c.l.s8.bf16 %v3808_v13 }
 0x490   :  { %v3410_v61 = vadd.f32 %v3409_v23, %v3369_v26  ;;  %v3416_v0 = vmax.f32 %v3408_v63, 0.0  ;;  %v4329_v26 = vmov 0.0   ;;  %v3884_v63 = vld [vmem:[#allocation16 + $0x18] sm:$0xff]  ;;  %v3885_v23 = vld [vmem:[%s5684_s12] sm:$0x1] }
 0x491   :  { %v3411_v5 = vpop.f32.mrf.mxu1  ;;  %4021 = vmatprep.subr.bf16.mxu1 %v4329_v26  ;;  %4041 = vmatprep.subr.bf16.mxu0 %v4329_v26  ;;  %v3833_v58 = vmul.bf16 %v3825_v10, %v3817_v4  ;;  %v3832_v20 = vmul.bf16 %v3825_v10, %v3816_v31  ;;  %v3887_v10 = vunpack.c.h.s8.bf16 %v3881_v56 }
 0x492   :  { %v3417_v54 = vmax.f32 %v3410_v61, 0.0  ;;  %v3420_v41 = vpack.c.bf16 %v3416_v0, %v3416_v0  ;;  %v3894_v61 = vpack.c.bf16 %v3885_v23, %v3885_v23  ;;  %v3893_v0 = vunpack.c.h.s8.bf16 %v3884_v63 }
 0x493   :  { %v3412_v18 = vpop.f32.mrf.mxu1 }
 0x494   :  { %v3421_v17 = vpack.c.bf16 %v3417_v54, %v3417_v54  ;;  %v3896_v5 = vpack.i.b16 %v3894_v61, %v3894_v61  ;;  %v3892_v18 = vunpack.c.l.s8.bf16 %v3884_v63 }
 0x496   :  { %3696 = vmatprep.mubr.bf16.mxu1 %v3421_v17  ;;  %v3901_v54 = vrot.slane %v3896_v5, %v4452_v3  ;;  %v3883_v17 = vld [vmem:[#allocation16 + $0x10] sm:$0xff] }
 0x497   :  { %3697 = vmatmul.mubr.bf16.vlgmr.msra.gmra.mxu1 %v3420_v41  ;;  %v3891_v22 = vunpack.c.h.s8.bf16 %v3883_v17  ;;  %v3890_v60 = vunpack.c.l.s8.bf16 %v3883_v17 }
 0x498   :  { %4022 = vmatpush3.bf16.msra.mxu1 %v3833_v58  ;;  %4037 = vmatprep.mubr.msk.bf16.mxu1 %vm4330_vm0, %v4329_v26  ;;  %v3909_v41 = vmul.bf16 %v3901_v54, %v3893_v0  ;;  %v3908_v49 = vmul.bf16 %v3901_v54, %v3892_v18  ;;  %v3903_v31 = vmul.bf16 %v3901_v54, %v3887_v10 }
 0x499   :  { %4023 = vmatprep.subr.bf16.mxu1 %v4329_v26  ;;  %v3907_v59 = vmul.bf16 %v3901_v54, %v3891_v22  ;;  %v3906_v28 = vmul.bf16 %v3901_v54, %v3890_v60  ;;  %v3902_v58 = vmul.bf16 %v3901_v54, %v3886_v33 }
 0x49c   :  { %4024 = vmatpush3.bf16.msra.mxu1 %v3832_v20  ;;  %v3979_v20 = vld [vmem:[%s5682_s10 + $0x1] ss:$0 sm:$0xff] }
 0x49d   :  { %4025 = vmatprep.subr.bf16.mxu1 %v4329_v26 }
 0x4a0   :  { %4026 = vmatpush3.bf16.msra.mxu1 %v3831_v52 }
 0x4a1   :  { %4027 = vmatprep.subr.bf16.mxu1 %v4329_v26 }
 0x4a4   :  { %4028 = vmatpush3.bf16.msra.mxu1 %v3830_v37 }
 0x4a5   :  { %4029 = vmatprep.subr.bf16.mxu1 %v4329_v26 }
 0x4a8   :  { %4030 = vmatpush3.bf16.msra.mxu1 %v3829_v39 }
 0x4a9   :  { %4031 = vmatprep.subr.bf16.mxu1 %v4329_v26 }
 0x4ac   :  { %4032 = vmatpush3.bf16.msra.mxu1 %v3828_v1 }
 0x4ad   :  { %4033 = vmatprep.subr.bf16.mxu1 %v4329_v26 }
 0x4b0   :  { %4034 = vmatpush3.bf16.msra.mxu1 %v3827_v2 }
 0x4b1   :  { %4035 = vmatprep.subr.bf16.mxu1 %v4329_v26 }
 0x4b4   :  { %4036 = vmatpush3.bf16.msra.mxu1 %v3826_v40 }
 0x4d7   :  { %v3657_v38 = vpop.f32.mrf.mxu0 }
 0x4d8   :  { %v3658_v44 = vadd.f32 %v3657_v38, %v3616_v43  ;;  %v3882_v38 = vld [vmem:[#allocation16 + $0x8] sm:$0xff] }
 0x4d9   :  { %v3659_v9 = vpop.f32.mrf.mxu0  ;;  %v3889_v16 = vunpack.c.h.s8.bf16 %v3882_v38 }
 0x4da   :  { %v3660_v42 = vadd.f32 %v3659_v9, %v3620_v48  ;;  %v3888_v9 = vunpack.c.l.s8.bf16 %v3882_v38 }
 0x4db   :  { %v3661_v51 = vpop.f32.mrf.mxu0  ;;  %v3905_v3 = vmul.bf16 %v3901_v54, %v3889_v16 }
 0x4dc   :  { %v3904_v47 = vmul.bf16 %v3901_v54, %v3888_v9  ;;  %v3978_v51 = vld [vmem:[%s5680_s8 + $0x1] ss:$0 sm:$0xff] }
 0x4dd   :  { %v3662_v29 = vpop.f32.mrf.mxu0 }
 0x557   :  { %v3698_v25 = vpop.f32.mrf.mxu1 }
 0x558   :  { %v3699_v19 = vadd.f32 %v3698_v25, %v3658_v44 }
 0x559   :  { %v3700_v50 = vpop.f32.mrf.mxu1 }
 0x55a   :  { %v3701_v46 = vadd.f32 %v3700_v50, %v3660_v42  ;;  %v3705_v57 = vmax.f32 %v3699_v19, 0.0 }
 0x55b   :  { %v3702_v62 = vpop.f32.mrf.mxu1 }
 0x55c   :  { %v3706_v6 = vmax.f32 %v3701_v46, 0.0  ;;  %v3707_v12 = vpack.c.bf16 %v3705_v57, %v3705_v57 }
 0x55d   :  { %v3703_v7 = vpop.f32.mrf.mxu1 }
 0x55e   :  { %v3708_v15 = vpack.c.bf16 %v3706_v6, %v3706_v6 }
 0x560   :  { %3795 = vmatprep.mubr.bf16.mxu0 %v3708_v15 }
 0x561   :  { %3796 = vmatmul.mubr.bf16.vlgmr.msra.gmra.mxu0 %v3707_v12 }
 0x562   :  { %4057 = vmatprep.mubr.msk.bf16.mxu0 %vm4330_vm0, %v4329_v26  ;;  %4042 = vmatpush3.bf16.msra.mxu0 %v3909_v41 }
 0x563   :  { %4043 = vmatprep.subr.bf16.mxu0 %v4329_v26 }
 0x566   :  { %4044 = vmatpush3.bf16.msra.mxu0 %v3908_v49 }
 0x567   :  { %4045 = vmatprep.subr.bf16.mxu0 %v4329_v26 }
 0x56a   :  { %4046 = vmatpush3.bf16.msra.mxu0 %v3907_v59 }
 0x56b   :  { %4047 = vmatprep.subr.bf16.mxu0 %v4329_v26 }
 0x56e   :  { %4048 = vmatpush3.bf16.msra.mxu0 %v3906_v28 }
 0x56f   :  { %4049 = vmatprep.subr.bf16.mxu0 %v4329_v26 }
 0x572   :  { %4050 = vmatpush3.bf16.msra.mxu0 %v3905_v3 }
 0x573   :  { %4051 = vmatprep.subr.bf16.mxu0 %v4329_v26 }
 0x576   :  { %4052 = vmatpush3.bf16.msra.mxu0 %v3904_v47 }
 0x577   :  { %4053 = vmatprep.subr.bf16.mxu0 %v4329_v26 }
 0x57a   :  { %4054 = vmatpush3.bf16.msra.mxu0 %v3903_v31 }
 0x57b   :  { %4055 = vmatprep.subr.bf16.mxu0 %v4329_v26 }
 0x57e   :  { %4056 = vmatpush3.bf16.msra.mxu0 %v3902_v58 }
 0x621   :  { %v3997_v21 = vpop.f32.mrf.mxu0 }
 0x623   :  { %v3998_v32 = vpop.f32.mrf.mxu0 }
 0x624   :  { %v3999_v35 = vadd.f32 %v3998_v32, %v3997_v21 }
 0x625   :  { %v4000_v29 = vpop.f32.mrf.mxu0 }
 0x626   :  { %v3798_v13 = vadd.f32 %v3999_v35, %v3978_v51 }
 0x627   :  { %v4001_v24 = vpop.f32.mrf.mxu0 }
 0x628   :  { %v3803_v27 = vmax.f32 %v3798_v13, 0.0 }
 0x62a   :  { %v3804_v4 = vpack.c.bf16 %v3803_v27, %v3803_v27 }
 0x62c   :  { %4038 = vmatmul.mubr.bf16.vlgmr.msra.gmra.mxu1 %v3804_v4 }
 0x6ec   :  { %v3873_v14 = vpop.f32.mrf.mxu1 }
 0x6ed   :  { %v3874_v52 = vadd.f32 %v3979_v20, %v3873_v14 }
 0x6ee   :  { %v4039_v30 = vpop.f32.mrf.mxu1 }
 0x6ef   :  { %v3879_v45 = vmax.f32 %v3874_v52, 0.0 }
 0x6f0   :  { %v3876_v37 = vpop.f32.mrf.mxu1 }
 0x6f1   :  { %v3880_v36 = vpack.c.bf16 %v3879_v45, %v3879_v45 }
 0x6f2   :  { %v4040_v39 = vpop.f32.mrf.mxu1 }
 0x6f3   :  { %4058 = vmatmul.mubr.bf16.vlgmr.msra.gmra.mxu0 %v3880_v36 }
 0x7b3   :  { %v3949_v43 = vpop.f32.mrf.mxu0 }
 0x7b4   :  { %v3950_v26 = vadd.f32 %v3980_v34, %v3949_v43 }
 0x7b5   :  { %v4059_v48 = vpop.f32.mrf.mxu0 }
 0x7b6   :  { %3955 = vst [vmem:[#allocation17] sm:$0xff] %v3950_v26 }
 0x7b7   :  { %v3952_v44 = vpop.f32.mrf.mxu0 }
 0x7b9   :  { %v4060_v25 = vpop.f32.mrf.mxu0 }
 0x7ba   :  { %3960 = vsyncadd [#allocation4], 96  ;;  %s4331_s10 = smov [#allocation17]  }
 0x7bb   :  { %s3961_s24 = sshll.u32 %s4331_s10, 4  ;;  %s3962_s24 = int_to_ptr.vmem [resolvable:$true] %s3961_s24 }
 0x7bc   :  { %s4279_s25 = scalar_lea.vmem %s3962_s24, 32  ;;  %s4283_s30 = scalar_lea.vmem %s3962_s24, 128 }
 0x7bd   :  { %p4280_p3 = scmp.ne.s32.totalorder %s3962_s24, %s4279_s25  ;;  %p4284_p4 = scmp.lt.s32.totalorder %s3962_s24, %s3962_s24 }
 0x7be   :  { %p4285_p5 = scmp.lt.s32.totalorder %s4283_s30, %s4279_s25 }
 0x7c0   :  { %p4286_p6 = por %p4285_p5, %p4284_p4 }
 0x7c2   :  { %p4287_p7 = pnand %p4286_p6, %p4280_p3 }
 0x7c4   :  { %4290 = shalt.err (!%p4287_p7)
}
 0x7c5   :  { %s4332_s14 = smov 2  }
 0x7c6   :  { %3967 = dma.vmem_to_hbm [thread:$0]  %s3962_s24, 32, %s5685_s13, [#allocation4], %s4316_s19, %s4316_s19, %s4332_s14  }
 0x7c7   :  { %4309 = dma.done.wait [#allocation4], 128  }
 0x7c8   :  { %4310 = vsyncadd [#allocation4], 4294967168 }
 0x7c9   :  { %3971 = vsyncpa [#allocation3], 1 }
 0x7ca   :  { %3972 = vsyncpa [#allocation6], 1 }
 0x7cb   :  { %3973 = vsyncpa [#allocation9], 1 }
 0x7cc   :  { %3974 = vsyncpa [#allocation12], 1 }
 0x7cd   :  { %3975 = vsyncpa [#allocation15], 1 }
 0x7ce   :  { %3976 = vsyncpa [#allocation4], 1 }

</bundles_post_ra>
